<compile_context>
chip_gen: v5e
topology: v5e:2x2
jax: 0.10.0
libtpu: 0.0.40
codegen_flags: <defaults>
</compile_context>

<pallas_src>
import functools

import jax
import jax.numpy as jnp
from jax import lax
from jax.experimental import pallas as pl
from jax.experimental.pallas import tpu as pltpu


_MASK_VALUE = -1e30
# Whether pl.Buffered(1) (single-buffered constant-index weight operands) is
# accepted by this jax / Mosaic version; flipped to False on first failure.
_SINGLE_BUFFER_WEIGHTS = {"ok": hasattr(pl, "Buffered")}


def _mha_kernel(x_ref, wq_ref, wk_ref, wv_ref, wproj_ref, bias_ref, o_ref,
                ctx_ref, *, num_heads, n_valid):
    # x_ref:     (block_b, N_pad, C)  activations (compute dtype)
    # wq/wk/wv:  (C, C)               W{q,k,v}^T, head-major hd-wide column
    #                                 groups; softmax scale folded into Wq.
    # wproj_ref: (C, C)               Wproj^T, rows in the same head-major order
    # bias_ref:  (1, C)               proj bias (f32)
    # o_ref:     (block_b, N_pad, C)  output (original input dtype)
    # ctx_ref:   (block_b*N_pad, C)   VMEM staging buffer for the head merge
    bb, n_tok, c = x_ref.shape
    hd = c // num_heads
    m = bb * n_tok
    cdt = wq_ref.dtype                       # MXU input dtype (bf16 or f32)

    x2 = x_ref[...].reshape(m, c)            # merge of major dims -> no relayout

    # Full-width QKV projections: (M, C) @ (C, C) keeps the MXU N-dim at C and
    # avoids materializing H copies of x.  f32 accumulation, then cast.
    q2 = jnp.dot(x2, wq_ref[...], preferred_element_type=jnp.float32).astype(cdt)
    k2 = jnp.dot(x2, wk_ref[...], preferred_element_type=jnp.float32).astype(cdt)
    v2 = jnp.dot(x2, wv_ref[...], preferred_element_type=jnp.float32).astype(cdt)

    if n_valid < n_tok:
        # Additive mask for padded key columns (computed once, broadcast in-loop).
        key_pos = lax.broadcasted_iota(jnp.int32, (1, 1, n_tok), 2)
        neg_bias = jnp.where(key_pos < n_valid, 0.0, _MASK_VALUE).astype(jnp.float32)
    else:
        neg_bias = None

    # Attention, one head at a time (unrolled at trace time).  The MXU matmul
    # shapes are identical to a head-batched dot_general; this form keeps only
    # one (bb, N, N) f32 score matrix live and needs no head-batched relayout.
    for h in range(num_heads):
        lo, hi = h * hd, (h + 1) * hd
        q_h = q2[:, lo:hi].reshape(bb, n_tok, hd)
        k_h = k2[:, lo:hi].reshape(bb, n_tok, hd)
        v_h = v2[:, lo:hi].reshape(bb, n_tok, hd)

        s = jnp.einsum("bqd,bkd->bqk", q_h, k_h,
                       preferred_element_type=jnp.float32)      # (bb, N, N) f32
        if neg_bias is not None:
            s = s + neg_bias                                     # mask padded keys
        s = s - jnp.max(s, axis=-1, keepdims=True)
        p = jnp.exp(s)
        denom = jnp.sum(p, axis=-1, keepdims=True)               # (bb, N, 1)
        ctx_h = jnp.einsum("bqk,bkd->bqd", p.astype(cdt), v_h,
                           preferred_element_type=jnp.float32)   # (bb, N, hd)
        # Deferred softmax normalization: scale the (N, hd) context instead of
        # the (N, N) probabilities; the reciprocal uses the EUP slot.
        ctx_h = ctx_h * pl.reciprocal(denom, approx=True)
        # Head merge: stage head h into its hd-wide lane group so the output
        # projection is a single full-K matmul (head sum done by the MXU
        # accumulator, not the VPU).  attn_drop(p=0.0) is the identity.
        ctx_ref[:, lo:hi] = ctx_h.astype(cdt).reshape(m, hd)

    out = jnp.dot(ctx_ref[...], wproj_ref[...],
                  preferred_element_type=jnp.float32)            # (M, C) f32
    out = out + bias_ref[...]
    # TODO(synk): attn_drop / proj_drop are identity at the module-default
    # ratio 0.0; training-time stochastic dropout is not implemented.
    o_ref[...] = out.reshape(bb, n_tok, c).astype(o_ref.dtype)


def pack_mha_params(wqkv, wproj, bproj, *, num_heads, qk_scale=None,
                    compute_dtype=jnp.bfloat16):
    """One-time weight repacking (hoisted out of the per-forward path).

    wqkv:  (3C, C)  nn.Linear weight (out_features, in_features), qkv_bias=False
    wproj: (C, C)   nn.Linear weight
    bproj: (C,)     proj bias
    """
    three_c, c = wqkv.shape
    assert three_c == 3 * c
    assert c % num_heads == 0
    hd = c // num_heads
    scale = qk_scale if qk_scale is not None else hd ** (-0.5)

    wqkv_t = wqkv.astype(jnp.float32).T                        # (C, 3C) == Wqkv^T
    # nn.Linear output features are ordered [q|k|v] x [head] x [head_dim], so
    # the C-wide q/k/v column blocks are already head-major hd-wide groups.
    wq = (wqkv_t[:, 0 * c:1 * c] * scale).astype(compute_dtype)   # scale folded
    wk = wqkv_t[:, 1 * c:2 * c].astype(compute_dtype)
    wv = wqkv_t[:, 2 * c:3 * c].astype(compute_dtype)
    wp = wproj.astype(jnp.float32).T.astype(compute_dtype)        # (C, C)
    b = bproj.astype(jnp.float32).reshape(1, c)
    return dict(wq=wq, wk=wk, wv=wv, wproj=wp, bias=b,
                num_heads=num_heads, compute_dtype=compute_dtype)


def _round_up(x, m):
    return -(-x // m) * m


def _vmem_bytes_estimate(block_b, n_pad, c, num_heads, compute_dtype, out_dtype):
    cb = jnp.dtype(compute_dtype).itemsize
    ob = jnp.dtype(out_dtype).itemsize
    hd = c // num_heads
    m = block_b * n_pad
    est = 0
    est += 2 * m * c * cb                        # x block (double-buffered)
    est += 2 * m * c * ob                        # out block (double-buffered)
    est += 2 * (4 * c * c * cb + c * 4)          # weights + bias (worst case x2)
    est += 3 * m * c * (4 + cb)                  # q/k/v f32 results + casts
    est += 2 * m * c * cb                        # x2 view + ctx staging buffer
    est += m * c * 4                             # f32 projection output
    est += 2 * (2 * n_pad * n_pad + n_pad * hd) * block_b * 4   # ~2 heads live
    return est


def _vmem_capacity_bytes():
    try:
        return int(pltpu.get_tpu_info().vmem_capacity_bytes)
    except Exception:
        return 128 * 1024 * 1024


def _pick_block_b(batch, n_pad, c, num_heads, compute_dtype, out_dtype, vmem_cap):
    small_vmem = vmem_cap <= 80 * 1024 * 1024     # v7x-class (64 MiB per TC)
    target_m = 256 if small_vmem else 768         # rows per projection matmul
    min_steps = 4 if small_vmem else 2            # keep the 1-D grid pipelined
    bb = min(batch, max(1, target_m // n_pad))
    while bb > 1 and pl.cdiv(batch, bb) < min_steps:
        bb -= 1
    while batch % bb:
        bb -= 1
    while bb > 1 and _vmem_bytes_estimate(
            bb, n_pad, c, num_heads, compute_dtype, out_dtype) > (vmem_cap * 5) // 8:
        bb -= 1
        while batch % bb:
            bb -= 1
    return bb


def multi_headed_attention_packed(x, params, *, block_b=None):
    """Forward pass of Multi_headed_Attention with pre-packed parameters."""
    B, N, C = x.shape
    num_heads = params["num_heads"]
    compute_dtype = params["compute_dtype"]
    assert params["wq"].shape == (C, C)

    # Pad the token axis: multiple of 8 keeps every reshape a pure regrouping,
    # multiple of 128 for long sequences (ViT's 197 -> 256) makes the score /
    # softmax lane axis dense.  Padded keys are masked inside the kernel.
    n_pad = _round_up(N, 128) if N >= 128 else _round_up(N, 8)
    x_c = x.astype(compute_dtype)
    if n_pad != N:
        x_c = jnp.pad(x_c, ((0, 0), (0, n_pad - N), (0, 0)))

    vmem_cap = _vmem_capacity_bytes()
    if block_b is None:
        block_b = _pick_block_b(B, n_pad, C, num_heads, compute_dtype, x.dtype,
                                vmem_cap)
    assert B % block_b == 0, "block_b must divide the batch"
    grid = (B // block_b,)

    est = _vmem_bytes_estimate(block_b, n_pad, C, num_heads, compute_dtype, x.dtype)
    vmem_limit = max(int(1.5 * est), 32 * 1024 * 1024)
    vmem_limit = int(min(vmem_limit, vmem_cap - 8 * 1024 * 1024))

    kernel = functools.partial(_mha_kernel, num_heads=num_heads, n_valid=N)

    def const_spec(shape, single_buffer):
        index_map = lambda b: (0,) * len(shape)
        if single_buffer:
            # Constant-index operands: one VMEM copy is enough.
            return pl.BlockSpec(shape, index_map,
                                pipeline_mode=pl.Buffered(buffer_count=1))
        return pl.BlockSpec(shape, index_map)

    def run(single_buffer):
        return pl.pallas_call(
            kernel,
            out_shape=jax.ShapeDtypeStruct((B, n_pad, C), x.dtype),
            grid_spec=pltpu.PrefetchScalarGridSpec(
                num_scalar_prefetch=0,
                grid=grid,
                in_specs=[
                    pl.BlockSpec((block_b, n_pad, C), lambda b: (b, 0, 0)),  # x
                    const_spec((C, C), single_buffer),      # Wq (pre-scaled)
                    const_spec((C, C), single_buffer),      # Wk
                    const_spec((C, C), single_buffer),      # Wv
                    const_spec((C, C), single_buffer),      # Wproj
                    const_spec((1, C), single_buffer),      # proj bias
                ],
                out_specs=pl.BlockSpec((block_b, n_pad, C), lambda b: (b, 0, 0)),
                scratch_shapes=[pltpu.VMEM((block_b * n_pad, C), compute_dtype)],
            ),
            compiler_params=pltpu.CompilerParams(
                dimension_semantics=("parallel",),
                vmem_limit_bytes=vmem_limit),
        )(x_c, params["wq"], params["wk"], params["wv"],
          params["wproj"], params["bias"])

    if _SINGLE_BUFFER_WEIGHTS["ok"]:
        try:
            out = run(True)
        except Exception:
            # pl.Buffered(1) unsupported on this jax / Mosaic version: fall back
            # to default double-buffered constant-index weight operands.
            _SINGLE_BUFFER_WEIGHTS["ok"] = False
            out = run(False)
    else:
        out = run(False)

    return out[:, :N, :] if n_pad != N else out


def multi_headed_attention(x, wqkv, wproj, bproj, *, num_heads, qk_scale=None,
                           block_b=None, compute_dtype=jnp.bfloat16):
    """Convenience wrapper: packs PyTorch-layout weights, then runs the kernel.

    Prefer pack_mha_params(...) once + multi_headed_attention_packed(...) per
    forward so the weight repacking is not repeated on every call.
    """
    params = pack_mha_params(wqkv, wproj, bproj, num_heads=num_heads,
                             qk_scale=qk_scale, compute_dtype=compute_dtype)
    return multi_headed_attention_packed(x, params, block_b=block_b)


def _reference(x, wqkv, wproj, bproj, *, num_heads):
    """Pure-JAX f32 reference mirroring the PyTorch forward."""
    B, N, C = x.shape
    hd = C // num_heads
    scale = hd ** (-0.5)
    qkv = x @ wqkv.T                                            # (B, N, 3C)
    qkv = qkv.reshape(B, N, 3, num_heads, hd).transpose(2, 0, 3, 1, 4)
    q, k, v = qkv[0], qkv[1], qkv[2]                            # (B, H, N, hd)
    attn = (q @ jnp.swapaxes(k, -2, -1)) * scale
    attn = jax.nn.softmax(attn, axis=-1)
    out = (attn @ v).transpose(0, 2, 1, 3).reshape(B, N, C)
    return out @ wproj.T + bproj


if __name__ == "__main__":
    # Small shapes consistent with the module: batch=4, seq=16, dim=64,
    # num_heads=8 (module default) -> head_dim=8.
    B, N, C = 4, 16, 64
    NUM_HEADS = 8

    key = jax.random.PRNGKey(0)
    kx, kqkv, kproj, kb, kx2 = jax.random.split(key, 5)
    x = jax.random.normal(kx, (B, N, C), dtype=jnp.float32)
    wqkv = jax.random.normal(kqkv, (3 * C, C), dtype=jnp.float32) * 0.05
    wproj = jax.random.normal(kproj, (C, C), dtype=jnp.float32) * 0.05
    bproj = jax.random.normal(kb, (C,), dtype=jnp.float32) * 0.05

    ref = _reference(x, wqkv, wproj, bproj, num_heads=NUM_HEADS)

    # Weight repacking is hoisted out of the per-forward path (done once).
    params_f32 = pack_mha_params(wqkv, wproj, bproj, num_heads=NUM_HEADS,
                                 compute_dtype=jnp.float32)
    out_f32 = jax.block_until_ready(
        multi_headed_attention_packed(x, params_f32, block_b=2))
    assert out_f32.shape == (B, N, C)
    assert jnp.allclose(out_f32, ref, atol=5e-3, rtol=5e-3), "f32 mismatch"

    # bf16 MXU inputs with f32 softmax/accumulation: the production path.
    params_bf16 = pack_mha_params(wqkv, wproj, bproj, num_heads=NUM_HEADS,
                                  compute_dtype=jnp.bfloat16)
    out_bf16 = jax.block_until_ready(
        multi_headed_attention_packed(x, params_bf16))
    assert out_bf16.shape == (B, N, C)
    assert jnp.allclose(out_bf16, ref, atol=4e-2, rtol=4e-2), "bf16 mismatch"

    # Exercise the token-padding + key-masking path (N not a multiple of 8),
    # which is what production ViT (N=197 -> 256) relies on.
    x_odd = jax.random.normal(kx2, (2, 12, C), dtype=jnp.float32)
    ref_odd = _reference(x_odd, wqkv, wproj, bproj, num_heads=NUM_HEADS)
    out_odd = jax.block_until_ready(
        multi_headed_attention_packed(x_odd, params_f32))
    assert out_odd.shape == (2, 12, C)
    assert jnp.allclose(out_odd, ref_odd, atol=5e-3, rtol=5e-3), "padded mismatch"

    print("KERNEL_OK")
</pallas_src>

<mosaic_0001>
module attributes {stable_mosaic.version = 11 : i64} {
  func.func @_mha_kernel(%arg0: i32, %arg1: memref<2x16x64xf32, #tpu.memory_space<vmem>>, %arg2: memref<64x64xf32, #tpu.memory_space<vmem>>, %arg3: memref<64x64xf32, #tpu.memory_space<vmem>>, %arg4: memref<64x64xf32, #tpu.memory_space<vmem>>, %arg5: memref<64x64xf32, #tpu.memory_space<vmem>>, %arg6: memref<1x64xf32, #tpu.memory_space<vmem>>, %arg7: memref<2x16x64xf32, #tpu.memory_space<vmem>>, %arg8: memref<32x64xf32, #tpu.memory_space<vmem>>) attributes {dimension_semantics = [#tpu.dimension_semantics<parallel>], iteration_bounds = array<i64: 2>, scalar_prefetch = 0 : i64, scratch_operands = 1 : i64, tpu.core_type = #tpu.core_type<tc>, window_params = [{transform_indices = @transform_0, window_bounds = array<i64: 2, 16, 64>}, {pipeline_mode = #tpu.pipeline_mode<synchronous>, transform_indices = @transform_1, window_bounds = array<i64: 64, 64>}, {pipeline_mode = #tpu.pipeline_mode<synchronous>, transform_indices = @transform_2, window_bounds = array<i64: 64, 64>}, {pipeline_mode = #tpu.pipeline_mode<synchronous>, transform_indices = @transform_3, window_bounds = array<i64: 64, 64>}, {pipeline_mode = #tpu.pipeline_mode<synchronous>, transform_indices = @transform_4, window_bounds = array<i64: 64, 64>}, {pipeline_mode = #tpu.pipeline_mode<synchronous>, transform_indices = @transform_5, window_bounds = array<i64: 1, 64>}, {transform_indices = @transform_6, window_bounds = array<i64: 2, 16, 64>}]} {
    %c0 = arith.constant 0 : index
    %c0_0 = arith.constant 0 : index
    %c0_1 = arith.constant 0 : index
    %0 = vector.load %arg1[%c0, %c0_0, %c0_1] : memref<2x16x64xf32, #tpu.memory_space<vmem>>, vector<2x16x64xf32>
    %1 = vector.shape_cast %0 : vector<2x16x64xf32> to vector<32x64xf32>
    %c0_2 = arith.constant 0 : index
    %c0_3 = arith.constant 0 : index
    %2 = vector.load %arg2[%c0_2, %c0_3] : memref<64x64xf32, #tpu.memory_space<vmem>>, vector<64x64xf32>
    %cst = arith.constant dense<0.000000e+00> : vector<32x64xf32>
    %3 = tpu.matmul %1, %2, %cst {dimension_numbers = #tpu.dot_dimension_numbers<[1], [0], [0], [1], [0, 0, 1, 1], [], []>} : vector<32x64xf32>, vector<64x64xf32>, vector<32x64xf32> -> vector<32x64xf32>
    %c0_4 = arith.constant 0 : index
    %c0_5 = arith.constant 0 : index
    %4 = vector.load %arg3[%c0_4, %c0_5] : memref<64x64xf32, #tpu.memory_space<vmem>>, vector<64x64xf32>
    %cst_6 = arith.constant dense<0.000000e+00> : vector<32x64xf32>
    %5 = tpu.matmul %1, %4, %cst_6 {dimension_numbers = #tpu.dot_dimension_numbers<[1], [0], [0], [1], [0, 0, 1, 1], [], []>} : vector<32x64xf32>, vector<64x64xf32>, vector<32x64xf32> -> vector<32x64xf32>
    %c0_7 = arith.constant 0 : index
    %c0_8 = arith.constant 0 : index
    %6 = vector.load %arg4[%c0_7, %c0_8] : memref<64x64xf32, #tpu.memory_space<vmem>>, vector<64x64xf32>
    %cst_9 = arith.constant dense<0.000000e+00> : vector<32x64xf32>
    %7 = tpu.matmul %1, %6, %cst_9 {dimension_numbers = #tpu.dot_dimension_numbers<[1], [0], [0], [1], [0, 0, 1, 1], [], []>} : vector<32x64xf32>, vector<64x64xf32>, vector<32x64xf32> -> vector<32x64xf32>
    %8 = vector.extract_strided_slice %3 {offsets = [0, 0], sizes = [32, 8], strides = [1, 1]} : vector<32x64xf32> to vector<32x8xf32>
    %9 = vector.shape_cast %8 : vector<32x8xf32> to vector<2x16x8xf32>
    %10 = vector.extract_strided_slice %5 {offsets = [0, 0], sizes = [32, 8], strides = [1, 1]} : vector<32x64xf32> to vector<32x8xf32>
    %11 = vector.shape_cast %10 : vector<32x8xf32> to vector<2x16x8xf32>
    %12 = vector.extract_strided_slice %7 {offsets = [0, 0], sizes = [32, 8], strides = [1, 1]} : vector<32x64xf32> to vector<32x8xf32>
    %13 = vector.shape_cast %12 : vector<32x8xf32> to vector<2x16x8xf32>
    "tpu.trace_start"() <{level = 10 : i32, message = "bqd,bkd->bqk"}> : () -> ()
    %cst_10 = arith.constant dense<0.000000e+00> : vector<2x16x16xf32>
    %14 = tpu.matmul %9, %11, %cst_10 {dimension_numbers = #tpu.dot_dimension_numbers<[2], [2], [1], [1], [0, 0, 0, 1, 1, 1], [0], [0]>} : vector<2x16x8xf32>, vector<2x16x8xf32>, vector<2x16x16xf32> -> vector<2x16x16xf32>
    "tpu.trace_stop"() : () -> ()
    %cst_11 = arith.constant dense<0xFF800000> : vector<2x16xf32>
    %15 = vector.multi_reduction <maximumf>, %14, %cst_11 [2] : vector<2x16x16xf32> to vector<2x16xf32>
    %16 = vector.shape_cast %15 : vector<2x16xf32> to vector<2x16x1xf32>
    %17 = vector.broadcast %16 : vector<2x16x1xf32> to vector<2x16x16xf32>
    %18 = arith.subf %14, %17 : vector<2x16x16xf32>
    %19 = math.exp %18 : vector<2x16x16xf32>
    %cst_12 = arith.constant dense<0.000000e+00> : vector<2x16xf32>
    %20 = vector.multi_reduction <add>, %19, %cst_12 [2] : vector<2x16x16xf32> to vector<2x16xf32>
    %21 = vector.shape_cast %20 : vector<2x16xf32> to vector<2x16x1xf32>
    "tpu.trace_start"() <{level = 10 : i32, message = "bqk,bkd->bqd"}> : () -> ()
    %cst_13 = arith.constant dense<0.000000e+00> : vector<2x16x8xf32>
    %22 = tpu.matmul %19, %13, %cst_13 {dimension_numbers = #tpu.dot_dimension_numbers<[2], [1], [1], [2], [0, 0, 0, 1, 1, 2], [0], [0]>} : vector<2x16x16xf32>, vector<2x16x8xf32>, vector<2x16x8xf32> -> vector<2x16x8xf32>
    "tpu.trace_stop"() : () -> ()
    %23 = tpu.reciprocal %21 {approx = true} : vector<2x16x1xf32> -> vector<2x16x1xf32>
    %24 = vector.broadcast %23 : vector<2x16x1xf32> to vector<2x16x8xf32>
    %25 = arith.mulf %22, %24 : vector<2x16x8xf32>
    %26 = vector.shape_cast %25 : vector<2x16x8xf32> to vector<32x8xf32>
    %c0_14 = arith.constant 0 : index
    %c0_15 = arith.constant 0 : index
    %27 = vector.load %arg8[%c0_14, %c0_15] : memref<32x64xf32, #tpu.memory_space<vmem>>, vector<32x8xf32>
    tpu.vector_store %arg8[%c0_14, %c0_15], %26 {strides = array<i32>} : memref<32x64xf32, #tpu.memory_space<vmem>>, vector<32x8xf32>,
    %28 = vector.extract_strided_slice %3 {offsets = [0, 8], sizes = [32, 8], strides = [1, 1]} : vector<32x64xf32> to vector<32x8xf32>
    %29 = vector.shape_cast %28 : vector<32x8xf32> to vector<2x16x8xf32>
    %30 = vector.extract_strided_slice %5 {offsets = [0, 8], sizes = [32, 8], strides = [1, 1]} : vector<32x64xf32> to vector<32x8xf32>
    %31 = vector.shape_cast %30 : vector<32x8xf32> to vector<2x16x8xf32>
    %32 = vector.extract_strided_slice %7 {offsets = [0, 8], sizes = [32, 8], strides = [1, 1]} : vector<32x64xf32> to vector<32x8xf32>
    %33 = vector.shape_cast %32 : vector<32x8xf32> to vector<2x16x8xf32>
    "tpu.trace_start"() <{level = 10 : i32, message = "bqd,bkd->bqk"}> : () -> ()
    %cst_16 = arith.constant dense<0.000000e+00> : vector<2x16x16xf32>
    %34 = tpu.matmul %29, %31, %cst_16 {dimension_numbers = #tpu.dot_dimension_numbers<[2], [2], [1], [1], [0, 0, 0, 1, 1, 1], [0], [0]>} : vector<2x16x8xf32>, vector<2x16x8xf32>, vector<2x16x16xf32> -> vector<2x16x16xf32>
    "tpu.trace_stop"() : () -> ()
    %cst_17 = arith.constant dense<0xFF800000> : vector<2x16xf32>
    %35 = vector.multi_reduction <maximumf>, %34, %cst_17 [2] : vector<2x16x16xf32> to vector<2x16xf32>
    %36 = vector.shape_cast %35 : vector<2x16xf32> to vector<2x16x1xf32>
    %37 = vector.broadcast %36 : vector<2x16x1xf32> to vector<2x16x16xf32>
    %38 = arith.subf %34, %37 : vector<2x16x16xf32>
    %39 = math.exp %38 : vector<2x16x16xf32>
    %cst_18 = arith.constant dense<0.000000e+00> : vector<2x16xf32>
    %40 = vector.multi_reduction <add>, %39, %cst_18 [2] : vector<2x16x16xf32> to vector<2x16xf32>
    %41 = vector.shape_cast %40 : vector<2x16xf32> to vector<2x16x1xf32>
    "tpu.trace_start"() <{level = 10 : i32, message = "bqk,bkd->bqd"}> : () -> ()
    %cst_19 = arith.constant dense<0.000000e+00> : vector<2x16x8xf32>
    %42 = tpu.matmul %39, %33, %cst_19 {dimension_numbers = #tpu.dot_dimension_numbers<[2], [1], [1], [2], [0, 0, 0, 1, 1, 2], [0], [0]>} : vector<2x16x16xf32>, vector<2x16x8xf32>, vector<2x16x8xf32> -> vector<2x16x8xf32>
    "tpu.trace_stop"() : () -> ()
    %43 = tpu.reciprocal %41 {approx = true} : vector<2x16x1xf32> -> vector<2x16x1xf32>
    %44 = vector.broadcast %43 : vector<2x16x1xf32> to vector<2x16x8xf32>
    %45 = arith.mulf %42, %44 : vector<2x16x8xf32>
    %46 = vector.shape_cast %45 : vector<2x16x8xf32> to vector<32x8xf32>
    %c0_20 = arith.constant 0 : index
    %c8 = arith.constant 8 : index
    %47 = vector.load %arg8[%c0_20, %c8] : memref<32x64xf32, #tpu.memory_space<vmem>>, vector<32x8xf32>
    tpu.vector_store %arg8[%c0_20, %c8], %46 {strides = array<i32>} : memref<32x64xf32, #tpu.memory_space<vmem>>, vector<32x8xf32>,
    %48 = vector.extract_strided_slice %3 {offsets = [0, 16], sizes = [32, 8], strides = [1, 1]} : vector<32x64xf32> to vector<32x8xf32>
    %49 = vector.shape_cast %48 : vector<32x8xf32> to vector<2x16x8xf32>
    %50 = vector.extract_strided_slice %5 {offsets = [0, 16], sizes = [32, 8], strides = [1, 1]} : vector<32x64xf32> to vector<32x8xf32>
    %51 = vector.shape_cast %50 : vector<32x8xf32> to vector<2x16x8xf32>
    %52 = vector.extract_strided_slice %7 {offsets = [0, 16], sizes = [32, 8], strides = [1, 1]} : vector<32x64xf32> to vector<32x8xf32>
    %53 = vector.shape_cast %52 : vector<32x8xf32> to vector<2x16x8xf32>
    "tpu.trace_start"() <{level = 10 : i32, message = "bqd,bkd->bqk"}> : () -> ()
    %cst_21 = arith.constant dense<0.000000e+00> : vector<2x16x16xf32>
    %54 = tpu.matmul %49, %51, %cst_21 {dimension_numbers = #tpu.dot_dimension_numbers<[2], [2], [1], [1], [0, 0, 0, 1, 1, 1], [0], [0]>} : vector<2x16x8xf32>, vector<2x16x8xf32>, vector<2x16x16xf32> -> vector<2x16x16xf32>
    "tpu.trace_stop"() : () -> ()
    %cst_22 = arith.constant dense<0xFF800000> : vector<2x16xf32>
    %55 = vector.multi_reduction <maximumf>, %54, %cst_22 [2] : vector<2x16x16xf32> to vector<2x16xf32>
    %56 = vector.shape_cast %55 : vector<2x16xf32> to vector<2x16x1xf32>
    %57 = vector.broadcast %56 : vector<2x16x1xf32> to vector<2x16x16xf32>
    %58 = arith.subf %54, %57 : vector<2x16x16xf32>
    %59 = math.exp %58 : vector<2x16x16xf32>
    %cst_23 = arith.constant dense<0.000000e+00> : vector<2x16xf32>
    %60 = vector.multi_reduction <add>, %59, %cst_23 [2] : vector<2x16x16xf32> to vector<2x16xf32>
    %61 = vector.shape_cast %60 : vector<2x16xf32> to vector<2x16x1xf32>
    "tpu.trace_start"() <{level = 10 : i32, message = "bqk,bkd->bqd"}> : () -> ()
    %cst_24 = arith.constant dense<0.000000e+00> : vector<2x16x8xf32>
    %62 = tpu.matmul %59, %53, %cst_24 {dimension_numbers = #tpu.dot_dimension_numbers<[2], [1], [1], [2], [0, 0, 0, 1, 1, 2], [0], [0]>} : vector<2x16x16xf32>, vector<2x16x8xf32>, vector<2x16x8xf32> -> vector<2x16x8xf32>
    "tpu.trace_stop"() : () -> ()
    %63 = tpu.reciprocal %61 {approx = true} : vector<2x16x1xf32> -> vector<2x16x1xf32>
    %64 = vector.broadcast %63 : vector<2x16x1xf32> to vector<2x16x8xf32>
    %65 = arith.mulf %62, %64 : vector<2x16x8xf32>
    %66 = vector.shape_cast %65 : vector<2x16x8xf32> to vector<32x8xf32>
    %c0_25 = arith.constant 0 : index
    %c16 = arith.constant 16 : index
    %67 = vector.load %arg8[%c0_25, %c16] : memref<32x64xf32, #tpu.memory_space<vmem>>, vector<32x8xf32>
    tpu.vector_store %arg8[%c0_25, %c16], %66 {strides = array<i32>} : memref<32x64xf32, #tpu.memory_space<vmem>>, vector<32x8xf32>,
    %68 = vector.extract_strided_slice %3 {offsets = [0, 24], sizes = [32, 8], strides = [1, 1]} : vector<32x64xf32> to vector<32x8xf32>
    %69 = vector.shape_cast %68 : vector<32x8xf32> to vector<2x16x8xf32>
    %70 = vector.extract_strided_slice %5 {offsets = [0, 24], sizes = [32, 8], strides = [1, 1]} : vector<32x64xf32> to vector<32x8xf32>
    %71 = vector.shape_cast %70 : vector<32x8xf32> to vector<2x16x8xf32>
    %72 = vector.extract_strided_slice %7 {offsets = [0, 24], sizes = [32, 8], strides = [1, 1]} : vector<32x64xf32> to vector<32x8xf32>
    %73 = vector.shape_cast %72 : vector<32x8xf32> to vector<2x16x8xf32>
    "tpu.trace_start"() <{level = 10 : i32, message = "bqd,bkd->bqk"}> : () -> ()
    %cst_26 = arith.constant dense<0.000000e+00> : vector<2x16x16xf32>
    %74 = tpu.matmul %69, %71, %cst_26 {dimension_numbers = #tpu.dot_dimension_numbers<[2], [2], [1], [1], [0, 0, 0, 1, 1, 1], [0], [0]>} : vector<2x16x8xf32>, vector<2x16x8xf32>, vector<2x16x16xf32> -> vector<2x16x16xf32>
    "tpu.trace_stop"() : () -> ()
    %cst_27 = arith.constant dense<0xFF800000> : vector<2x16xf32>
    %75 = vector.multi_reduction <maximumf>, %74, %cst_27 [2] : vector<2x16x16xf32> to vector<2x16xf32>
    %76 = vector.shape_cast %75 : vector<2x16xf32> to vector<2x16x1xf32>
    %77 = vector.broadcast %76 : vector<2x16x1xf32> to vector<2x16x16xf32>
    %78 = arith.subf %74, %77 : vector<2x16x16xf32>
    %79 = math.exp %78 : vector<2x16x16xf32>
    %cst_28 = arith.constant dense<0.000000e+00> : vector<2x16xf32>
    %80 = vector.multi_reduction <add>, %79, %cst_28 [2] : vector<2x16x16xf32> to vector<2x16xf32>
    %81 = vector.shape_cast %80 : vector<2x16xf32> to vector<2x16x1xf32>
    "tpu.trace_start"() <{level = 10 : i32, message = "bqk,bkd->bqd"}> : () -> ()
    %cst_29 = arith.constant dense<0.000000e+00> : vector<2x16x8xf32>
    %82 = tpu.matmul %79, %73, %cst_29 {dimension_numbers = #tpu.dot_dimension_numbers<[2], [1], [1], [2], [0, 0, 0, 1, 1, 2], [0], [0]>} : vector<2x16x16xf32>, vector<2x16x8xf32>, vector<2x16x8xf32> -> vector<2x16x8xf32>
    "tpu.trace_stop"() : () -> ()
    %83 = tpu.reciprocal %81 {approx = true} : vector<2x16x1xf32> -> vector<2x16x1xf32>
    %84 = vector.broadcast %83 : vector<2x16x1xf32> to vector<2x16x8xf32>
    %85 = arith.mulf %82, %84 : vector<2x16x8xf32>
    %86 = vector.shape_cast %85 : vector<2x16x8xf32> to vector<32x8xf32>
    %c0_30 = arith.constant 0 : index
    %c24 = arith.constant 24 : index
    %87 = vector.load %arg8[%c0_30, %c24] : memref<32x64xf32, #tpu.memory_space<vmem>>, vector<32x8xf32>
    tpu.vector_store %arg8[%c0_30, %c24], %86 {strides = array<i32>} : memref<32x64xf32, #tpu.memory_space<vmem>>, vector<32x8xf32>,
    %88 = vector.extract_strided_slice %3 {offsets = [0, 32], sizes = [32, 8], strides = [1, 1]} : vector<32x64xf32> to vector<32x8xf32>
    %89 = vector.shape_cast %88 : vector<32x8xf32> to vector<2x16x8xf32>
    %90 = vector.extract_strided_slice %5 {offsets = [0, 32], sizes = [32, 8], strides = [1, 1]} : vector<32x64xf32> to vector<32x8xf32>
    %91 = vector.shape_cast %90 : vector<32x8xf32> to vector<2x16x8xf32>
    %92 = vector.extract_strided_slice %7 {offsets = [0, 32], sizes = [32, 8], strides = [1, 1]} : vector<32x64xf32> to vector<32x8xf32>
    %93 = vector.shape_cast %92 : vector<32x8xf32> to vector<2x16x8xf32>
    "tpu.trace_start"() <{level = 10 : i32, message = "bqd,bkd->bqk"}> : () -> ()
    %cst_31 = arith.constant dense<0.000000e+00> : vector<2x16x16xf32>
    %94 = tpu.matmul %89, %91, %cst_31 {dimension_numbers = #tpu.dot_dimension_numbers<[2], [2], [1], [1], [0, 0, 0, 1, 1, 1], [0], [0]>} : vector<2x16x8xf32>, vector<2x16x8xf32>, vector<2x16x16xf32> -> vector<2x16x16xf32>
    "tpu.trace_stop"() : () -> ()
    %cst_32 = arith.constant dense<0xFF800000> : vector<2x16xf32>
    %95 = vector.multi_reduction <maximumf>, %94, %cst_32 [2] : vector<2x16x16xf32> to vector<2x16xf32>
    %96 = vector.shape_cast %95 : vector<2x16xf32> to vector<2x16x1xf32>
    %97 = vector.broadcast %96 : vector<2x16x1xf32> to vector<2x16x16xf32>
    %98 = arith.subf %94, %97 : vector<2x16x16xf32>
    %99 = math.exp %98 : vector<2x16x16xf32>
    %cst_33 = arith.constant dense<0.000000e+00> : vector<2x16xf32>
    %100 = vector.multi_reduction <add>, %99, %cst_33 [2] : vector<2x16x16xf32> to vector<2x16xf32>
    %101 = vector.shape_cast %100 : vector<2x16xf32> to vector<2x16x1xf32>
    "tpu.trace_start"() <{level = 10 : i32, message = "bqk,bkd->bqd"}> : () -> ()
    %cst_34 = arith.constant dense<0.000000e+00> : vector<2x16x8xf32>
    %102 = tpu.matmul %99, %93, %cst_34 {dimension_numbers = #tpu.dot_dimension_numbers<[2], [1], [1], [2], [0, 0, 0, 1, 1, 2], [0], [0]>} : vector<2x16x16xf32>, vector<2x16x8xf32>, vector<2x16x8xf32> -> vector<2x16x8xf32>
    "tpu.trace_stop"() : () -> ()
    %103 = tpu.reciprocal %101 {approx = true} : vector<2x16x1xf32> -> vector<2x16x1xf32>
    %104 = vector.broadcast %103 : vector<2x16x1xf32> to vector<2x16x8xf32>
    %105 = arith.mulf %102, %104 : vector<2x16x8xf32>
    %106 = vector.shape_cast %105 : vector<2x16x8xf32> to vector<32x8xf32>
    %c0_35 = arith.constant 0 : index
    %c32 = arith.constant 32 : index
    %107 = vector.load %arg8[%c0_35, %c32] : memref<32x64xf32, #tpu.memory_space<vmem>>, vector<32x8xf32>
    tpu.vector_store %arg8[%c0_35, %c32], %106 {strides = array<i32>} : memref<32x64xf32, #tpu.memory_space<vmem>>, vector<32x8xf32>,
    %108 = vector.extract_strided_slice %3 {offsets = [0, 40], sizes = [32, 8], strides = [1, 1]} : vector<32x64xf32> to vector<32x8xf32>
    %109 = vector.shape_cast %108 : vector<32x8xf32> to vector<2x16x8xf32>
    %110 = vector.extract_strided_slice %5 {offsets = [0, 40], sizes = [32, 8], strides = [1, 1]} : vector<32x64xf32> to vector<32x8xf32>
    %111 = vector.shape_cast %110 : vector<32x8xf32> to vector<2x16x8xf32>
    %112 = vector.extract_strided_slice %7 {offsets = [0, 40], sizes = [32, 8], strides = [1, 1]} : vector<32x64xf32> to vector<32x8xf32>
    %113 = vector.shape_cast %112 : vector<32x8xf32> to vector<2x16x8xf32>
    "tpu.trace_start"() <{level = 10 : i32, message = "bqd,bkd->bqk"}> : () -> ()
    %cst_36 = arith.constant dense<0.000000e+00> : vector<2x16x16xf32>
    %114 = tpu.matmul %109, %111, %cst_36 {dimension_numbers = #tpu.dot_dimension_numbers<[2], [2], [1], [1], [0, 0, 0, 1, 1, 1], [0], [0]>} : vector<2x16x8xf32>, vector<2x16x8xf32>, vector<2x16x16xf32> -> vector<2x16x16xf32>
    "tpu.trace_stop"() : () -> ()
    %cst_37 = arith.constant dense<0xFF800000> : vector<2x16xf32>
    %115 = vector.multi_reduction <maximumf>, %114, %cst_37 [2] : vector<2x16x16xf32> to vector<2x16xf32>
    %116 = vector.shape_cast %115 : vector<2x16xf32> to vector<2x16x1xf32>
    %117 = vector.broadcast %116 : vector<2x16x1xf32> to vector<2x16x16xf32>
    %118 = arith.subf %114, %117 : vector<2x16x16xf32>
    %119 = math.exp %118 : vector<2x16x16xf32>
    %cst_38 = arith.constant dense<0.000000e+00> : vector<2x16xf32>
    %120 = vector.multi_reduction <add>, %119, %cst_38 [2] : vector<2x16x16xf32> to vector<2x16xf32>
    %121 = vector.shape_cast %120 : vector<2x16xf32> to vector<2x16x1xf32>
    "tpu.trace_start"() <{level = 10 : i32, message = "bqk,bkd->bqd"}> : () -> ()
    %cst_39 = arith.constant dense<0.000000e+00> : vector<2x16x8xf32>
    %122 = tpu.matmul %119, %113, %cst_39 {dimension_numbers = #tpu.dot_dimension_numbers<[2], [1], [1], [2], [0, 0, 0, 1, 1, 2], [0], [0]>} : vector<2x16x16xf32>, vector<2x16x8xf32>, vector<2x16x8xf32> -> vector<2x16x8xf32>
    "tpu.trace_stop"() : () -> ()
    %123 = tpu.reciprocal %121 {approx = true} : vector<2x16x1xf32> -> vector<2x16x1xf32>
    %124 = vector.broadcast %123 : vector<2x16x1xf32> to vector<2x16x8xf32>
    %125 = arith.mulf %122, %124 : vector<2x16x8xf32>
    %126 = vector.shape_cast %125 : vector<2x16x8xf32> to vector<32x8xf32>
    %c0_40 = arith.constant 0 : index
    %c40 = arith.constant 40 : index
    %127 = vector.load %arg8[%c0_40, %c40] : memref<32x64xf32, #tpu.memory_space<vmem>>, vector<32x8xf32>
    tpu.vector_store %arg8[%c0_40, %c40], %126 {strides = array<i32>} : memref<32x64xf32, #tpu.memory_space<vmem>>, vector<32x8xf32>,
    %128 = vector.extract_strided_slice %3 {offsets = [0, 48], sizes = [32, 8], strides = [1, 1]} : vector<32x64xf32> to vector<32x8xf32>
    %129 = vector.shape_cast %128 : vector<32x8xf32> to vector<2x16x8xf32>
    %130 = vector.extract_strided_slice %5 {offsets = [0, 48], sizes = [32, 8], strides = [1, 1]} : vector<32x64xf32> to vector<32x8xf32>
    %131 = vector.shape_cast %130 : vector<32x8xf32> to vector<2x16x8xf32>
    %132 = vector.extract_strided_slice %7 {offsets = [0, 48], sizes = [32, 8], strides = [1, 1]} : vector<32x64xf32> to vector<32x8xf32>
    %133 = vector.shape_cast %132 : vector<32x8xf32> to vector<2x16x8xf32>
    "tpu.trace_start"() <{level = 10 : i32, message = "bqd,bkd->bqk"}> : () -> ()
    %cst_41 = arith.constant dense<0.000000e+00> : vector<2x16x16xf32>
    %134 = tpu.matmul %129, %131, %cst_41 {dimension_numbers = #tpu.dot_dimension_numbers<[2], [2], [1], [1], [0, 0, 0, 1, 1, 1], [0], [0]>} : vector<2x16x8xf32>, vector<2x16x8xf32>, vector<2x16x16xf32> -> vector<2x16x16xf32>
    "tpu.trace_stop"() : () -> ()
    %cst_42 = arith.constant dense<0xFF800000> : vector<2x16xf32>
    %135 = vector.multi_reduction <maximumf>, %134, %cst_42 [2] : vector<2x16x16xf32> to vector<2x16xf32>
    %136 = vector.shape_cast %135 : vector<2x16xf32> to vector<2x16x1xf32>
    %137 = vector.broadcast %136 : vector<2x16x1xf32> to vector<2x16x16xf32>
    %138 = arith.subf %134, %137 : vector<2x16x16xf32>
    %139 = math.exp %138 : vector<2x16x16xf32>
    %cst_43 = arith.constant dense<0.000000e+00> : vector<2x16xf32>
    %140 = vector.multi_reduction <add>, %139, %cst_43 [2] : vector<2x16x16xf32> to vector<2x16xf32>
    %141 = vector.shape_cast %140 : vector<2x16xf32> to vector<2x16x1xf32>
    "tpu.trace_start"() <{level = 10 : i32, message = "bqk,bkd->bqd"}> : () -> ()
    %cst_44 = arith.constant dense<0.000000e+00> : vector<2x16x8xf32>
    %142 = tpu.matmul %139, %133, %cst_44 {dimension_numbers = #tpu.dot_dimension_numbers<[2], [1], [1], [2], [0, 0, 0, 1, 1, 2], [0], [0]>} : vector<2x16x16xf32>, vector<2x16x8xf32>, vector<2x16x8xf32> -> vector<2x16x8xf32>
    "tpu.trace_stop"() : () -> ()
    %143 = tpu.reciprocal %141 {approx = true} : vector<2x16x1xf32> -> vector<2x16x1xf32>
    %144 = vector.broadcast %143 : vector<2x16x1xf32> to vector<2x16x8xf32>
    %145 = arith.mulf %142, %144 : vector<2x16x8xf32>
    %146 = vector.shape_cast %145 : vector<2x16x8xf32> to vector<32x8xf32>
    %c0_45 = arith.constant 0 : index
    %c48 = arith.constant 48 : index
    %147 = vector.load %arg8[%c0_45, %c48] : memref<32x64xf32, #tpu.memory_space<vmem>>, vector<32x8xf32>
    tpu.vector_store %arg8[%c0_45, %c48], %146 {strides = array<i32>} : memref<32x64xf32, #tpu.memory_space<vmem>>, vector<32x8xf32>,
    %148 = vector.extract_strided_slice %3 {offsets = [0, 56], sizes = [32, 8], strides = [1, 1]} : vector<32x64xf32> to vector<32x8xf32>
    %149 = vector.shape_cast %148 : vector<32x8xf32> to vector<2x16x8xf32>
    %150 = vector.extract_strided_slice %5 {offsets = [0, 56], sizes = [32, 8], strides = [1, 1]} : vector<32x64xf32> to vector<32x8xf32>
    %151 = vector.shape_cast %150 : vector<32x8xf32> to vector<2x16x8xf32>
    %152 = vector.extract_strided_slice %7 {offsets = [0, 56], sizes = [32, 8], strides = [1, 1]} : vector<32x64xf32> to vector<32x8xf32>
    %153 = vector.shape_cast %152 : vector<32x8xf32> to vector<2x16x8xf32>
    "tpu.trace_start"() <{level = 10 : i32, message = "bqd,bkd->bqk"}> : () -> ()
    %cst_46 = arith.constant dense<0.000000e+00> : vector<2x16x16xf32>
    %154 = tpu.matmul %149, %151, %cst_46 {dimension_numbers = #tpu.dot_dimension_numbers<[2], [2], [1], [1], [0, 0, 0, 1, 1, 1], [0], [0]>} : vector<2x16x8xf32>, vector<2x16x8xf32>, vector<2x16x16xf32> -> vector<2x16x16xf32>
    "tpu.trace_stop"() : () -> ()
    %cst_47 = arith.constant dense<0xFF800000> : vector<2x16xf32>
    %155 = vector.multi_reduction <maximumf>, %154, %cst_47 [2] : vector<2x16x16xf32> to vector<2x16xf32>
    %156 = vector.shape_cast %155 : vector<2x16xf32> to vector<2x16x1xf32>
    %157 = vector.broadcast %156 : vector<2x16x1xf32> to vector<2x16x16xf32>
    %158 = arith.subf %154, %157 : vector<2x16x16xf32>
    %159 = math.exp %158 : vector<2x16x16xf32>
    %cst_48 = arith.constant dense<0.000000e+00> : vector<2x16xf32>
    %160 = vector.multi_reduction <add>, %159, %cst_48 [2] : vector<2x16x16xf32> to vector<2x16xf32>
    %161 = vector.shape_cast %160 : vector<2x16xf32> to vector<2x16x1xf32>
    "tpu.trace_start"() <{level = 10 : i32, message = "bqk,bkd->bqd"}> : () -> ()
    %cst_49 = arith.constant dense<0.000000e+00> : vector<2x16x8xf32>
    %162 = tpu.matmul %159, %153, %cst_49 {dimension_numbers = #tpu.dot_dimension_numbers<[2], [1], [1], [2], [0, 0, 0, 1, 1, 2], [0], [0]>} : vector<2x16x16xf32>, vector<2x16x8xf32>, vector<2x16x8xf32> -> vector<2x16x8xf32>
    "tpu.trace_stop"() : () -> ()
    %163 = tpu.reciprocal %161 {approx = true} : vector<2x16x1xf32> -> vector<2x16x1xf32>
    %164 = vector.broadcast %163 : vector<2x16x1xf32> to vector<2x16x8xf32>
    %165 = arith.mulf %162, %164 : vector<2x16x8xf32>
    %166 = vector.shape_cast %165 : vector<2x16x8xf32> to vector<32x8xf32>
    %c0_50 = arith.constant 0 : index
    %c56 = arith.constant 56 : index
    %167 = vector.load %arg8[%c0_50, %c56] : memref<32x64xf32, #tpu.memory_space<vmem>>, vector<32x8xf32>
    tpu.vector_store %arg8[%c0_50, %c56], %166 {strides = array<i32>} : memref<32x64xf32, #tpu.memory_space<vmem>>, vector<32x8xf32>,
    %c0_51 = arith.constant 0 : index
    %c0_52 = arith.constant 0 : index
    %168 = vector.load %arg8[%c0_51, %c0_52] : memref<32x64xf32, #tpu.memory_space<vmem>>, vector<32x64xf32>
    %c0_53 = arith.constant 0 : index
    %c0_54 = arith.constant 0 : index
    %169 = vector.load %arg5[%c0_53, %c0_54] : memref<64x64xf32, #tpu.memory_space<vmem>>, vector<64x64xf32>
    %cst_55 = arith.constant dense<0.000000e+00> : vector<32x64xf32>
    %170 = tpu.matmul %168, %169, %cst_55 {dimension_numbers = #tpu.dot_dimension_numbers<[1], [0], [0], [1], [0, 0, 1, 1], [], []>} : vector<32x64xf32>, vector<64x64xf32>, vector<32x64xf32> -> vector<32x64xf32>
    %c0_56 = arith.constant 0 : index
    %c0_57 = arith.constant 0 : index
    %171 = vector.load %arg6[%c0_56, %c0_57] : memref<1x64xf32, #tpu.memory_space<vmem>>, vector<1x64xf32>
    %172 = vector.broadcast %171 : vector<1x64xf32> to vector<32x64xf32>
    %173 = arith.addf %170, %172 : vector<32x64xf32>
    %174 = vector.shape_cast %173 : vector<32x64xf32> to vector<2x16x64xf32>
    %c0_58 = arith.constant 0 : index
    %c0_59 = arith.constant 0 : index
    %c0_60 = arith.constant 0 : index
    %175 = vector.load %arg7[%c0_58, %c0_59, %c0_60] : memref<2x16x64xf32, #tpu.memory_space<vmem>>, vector<2x16x64xf32>
    tpu.vector_store %arg7[%c0_58, %c0_59, %c0_60], %174 {strides = array<i32>} : memref<2x16x64xf32, #tpu.memory_space<vmem>>, vector<2x16x64xf32>,
    return
  }
  func.func @transform_0(%arg0: i32) -> (i32, i32, i32) {
    %c0_i32 = arith.constant 0 : i32
    %c0_i32_0 = arith.constant 0 : i32
    %c0_i32_1 = arith.constant 0 : i32
    return %arg0, %c0_i32, %c0_i32_0 : i32, i32, i32
  }
  func.func @transform_1(%arg0: i32) -> (i32, i32) {
    %c0_i32 = arith.constant 0 : i32
    %c0_i32_0 = arith.constant 0 : i32
    %c0_i32_1 = arith.constant 0 : i32
    return %c0_i32, %c0_i32_0 : i32, i32
  }
  func.func @transform_2(%arg0: i32) -> (i32, i32) {
    %c0_i32 = arith.constant 0 : i32
    %c0_i32_0 = arith.constant 0 : i32
    %c0_i32_1 = arith.constant 0 : i32
    return %c0_i32, %c0_i32_0 : i32, i32
  }
  func.func @transform_3(%arg0: i32) -> (i32, i32) {
    %c0_i32 = arith.constant 0 : i32
    %c0_i32_0 = arith.constant 0 : i32
    %c0_i32_1 = arith.constant 0 : i32
    return %c0_i32, %c0_i32_0 : i32, i32
  }
  func.func @transform_4(%arg0: i32) -> (i32, i32) {
    %c0_i32 = arith.constant 0 : i32
    %c0_i32_0 = arith.constant 0 : i32
    %c0_i32_1 = arith.constant 0 : i32
    return %c0_i32, %c0_i32_0 : i32, i32
  }
  func.func @transform_5(%arg0: i32) -> (i32, i32) {
    %c0_i32 = arith.constant 0 : i32
    %c0_i32_0 = arith.constant 0 : i32
    %c0_i32_1 = arith.constant 0 : i32
    return %c0_i32, %c0_i32_0 : i32, i32
  }
  func.func @transform_6(%arg0: i32) -> (i32, i32, i32) {
    %c0_i32 = arith.constant 0 : i32
    %c0_i32_0 = arith.constant 0 : i32
    %c0_i32_1 = arith.constant 0 : i32
    return %arg0, %c0_i32, %c0_i32_0 : i32, i32, i32
  }
}

module attributes {stable_mosaic.version = 11 : i64} {
  func.func @_mha_kernel(%arg0: i32, %arg1: memref<2x16x64xf32, #tpu.memory_space<vmem>>, %arg2: memref<64x64xf32, #tpu.memory_space<vmem>>, %arg3: memref<64x64xf32, #tpu.memory_space<vmem>>, %arg4: memref<64x64xf32, #tpu.memory_space<vmem>>, %arg5: memref<64x64xf32, #tpu.memory_space<vmem>>, %arg6: memref<1x64xf32, #tpu.memory_space<vmem>>, %arg7: memref<2x16x64xf32, #tpu.memory_space<vmem>>, %arg8: memref<32x64xf32, #tpu.memory_space<vmem>>) attributes {dimension_semantics = [#tpu.dimension_semantics<parallel>], iteration_bounds = array<i64: 2>, scalar_prefetch = 0 : i64, scratch_operands = 1 : i64, tpu.core_type = #tpu.core_type<tc>, window_params = [{transform_indices = @transform_0, window_bounds = array<i64: 2, 16, 64>}, {pipeline_mode = #tpu.pipeline_mode<synchronous>, transform_indices = @transform_1, window_bounds = array<i64: 64, 64>}, {pipeline_mode = #tpu.pipeline_mode<synchronous>, transform_indices = @transform_2, window_bounds = array<i64: 64, 64>}, {pipeline_mode = #tpu.pipeline_mode<synchronous>, transform_indices = @transform_3, window_bounds = array<i64: 64, 64>}, {pipeline_mode = #tpu.pipeline_mode<synchronous>, transform_indices = @transform_4, window_bounds = array<i64: 64, 64>}, {pipeline_mode = #tpu.pipeline_mode<synchronous>, transform_indices = @transform_5, window_bounds = array<i64: 1, 64>}, {transform_indices = @transform_6, window_bounds = array<i64: 2, 16, 64>}]} {
    %c0 = arith.constant 0 : index
    %c0_0 = arith.constant 0 : index
    %c0_1 = arith.constant 0 : index
    %0 = vector.load %arg1[%c0, %c0_0, %c0_1] : memref<2x16x64xf32, #tpu.memory_space<vmem>>, vector<2x16x64xf32>
    %1 = vector.shape_cast %0 : vector<2x16x64xf32> to vector<32x64xf32>
    %c0_2 = arith.constant 0 : index
    %c0_3 = arith.constant 0 : index
    %2 = vector.load %arg2[%c0_2, %c0_3] : memref<64x64xf32, #tpu.memory_space<vmem>>, vector<64x64xf32>
    %cst = arith.constant dense<0.000000e+00> : vector<32x64xf32>
    %3 = tpu.matmul %1, %2, %cst {dimension_numbers = #tpu.dot_dimension_numbers<[1], [0], [0], [1], [0, 0, 1, 1], [], []>} : vector<32x64xf32>, vector<64x64xf32>, vector<32x64xf32> -> vector<32x64xf32>
    %c0_4 = arith.constant 0 : index
    %c0_5 = arith.constant 0 : index
    %4 = vector.load %arg3[%c0_4, %c0_5] : memref<64x64xf32, #tpu.memory_space<vmem>>, vector<64x64xf32>
    %cst_6 = arith.constant dense<0.000000e+00> : vector<32x64xf32>
    %5 = tpu.matmul %1, %4, %cst_6 {dimension_numbers = #tpu.dot_dimension_numbers<[1], [0], [0], [1], [0, 0, 1, 1], [], []>} : vector<32x64xf32>, vector<64x64xf32>, vector<32x64xf32> -> vector<32x64xf32>
    %c0_7 = arith.constant 0 : index
    %c0_8 = arith.constant 0 : index
    %6 = vector.load %arg4[%c0_7, %c0_8] : memref<64x64xf32, #tpu.memory_space<vmem>>, vector<64x64xf32>
    %cst_9 = arith.constant dense<0.000000e+00> : vector<32x64xf32>
    %7 = tpu.matmul %1, %6, %cst_9 {dimension_numbers = #tpu.dot_dimension_numbers<[1], [0], [0], [1], [0, 0, 1, 1], [], []>} : vector<32x64xf32>, vector<64x64xf32>, vector<32x64xf32> -> vector<32x64xf32>
    %8 = vector.extract_strided_slice %3 {offsets = [0, 0], sizes = [32, 8], strides = [1, 1]} : vector<32x64xf32> to vector<32x8xf32>
    %9 = vector.shape_cast %8 : vector<32x8xf32> to vector<2x16x8xf32>
    %10 = vector.extract_strided_slice %5 {offsets = [0, 0], sizes = [32, 8], strides = [1, 1]} : vector<32x64xf32> to vector<32x8xf32>
    %11 = vector.shape_cast %10 : vector<32x8xf32> to vector<2x16x8xf32>
    %12 = vector.extract_strided_slice %7 {offsets = [0, 0], sizes = [32, 8], strides = [1, 1]} : vector<32x64xf32> to vector<32x8xf32>
    %13 = vector.shape_cast %12 : vector<32x8xf32> to vector<2x16x8xf32>
    "tpu.trace_start"() <{level = 10 : i32, message = "bqd,bkd->bqk"}> : () -> ()
    %cst_10 = arith.constant dense<0.000000e+00> : vector<2x16x16xf32>
    %14 = tpu.matmul %9, %11, %cst_10 {dimension_numbers = #tpu.dot_dimension_numbers<[2], [2], [1], [1], [0, 0, 0, 1, 1, 1], [0], [0]>} : vector<2x16x8xf32>, vector<2x16x8xf32>, vector<2x16x16xf32> -> vector<2x16x16xf32>
    "tpu.trace_stop"() : () -> ()
    %cst_11 = arith.constant dense<0xFF800000> : vector<2x16xf32>
    %15 = vector.multi_reduction <maximumf>, %14, %cst_11 [2] : vector<2x16x16xf32> to vector<2x16xf32>
    %16 = vector.shape_cast %15 : vector<2x16xf32> to vector<2x16x1xf32>
    %17 = vector.broadcast %16 : vector<2x16x1xf32> to vector<2x16x16xf32>
    %18 = arith.subf %14, %17 : vector<2x16x16xf32>
    %19 = math.exp %18 : vector<2x16x16xf32>
    %cst_12 = arith.constant dense<0.000000e+00> : vector<2x16xf32>
    %20 = vector.multi_reduction <add>, %19, %cst_12 [2] : vector<2x16x16xf32> to vector<2x16xf32>
    %21 = vector.shape_cast %20 : vector<2x16xf32> to vector<2x16x1xf32>
    "tpu.trace_start"() <{level = 10 : i32, message = "bqk,bkd->bqd"}> : () -> ()
    %cst_13 = arith.constant dense<0.000000e+00> : vector<2x16x8xf32>
    %22 = tpu.matmul %19, %13, %cst_13 {dimension_numbers = #tpu.dot_dimension_numbers<[2], [1], [1], [2], [0, 0, 0, 1, 1, 2], [0], [0]>} : vector<2x16x16xf32>, vector<2x16x8xf32>, vector<2x16x8xf32> -> vector<2x16x8xf32>
    "tpu.trace_stop"() : () -> ()
    %23 = tpu.reciprocal %21 {approx = true} : vector<2x16x1xf32> -> vector<2x16x1xf32>
    %24 = vector.broadcast %23 : vector<2x16x1xf32> to vector<2x16x8xf32>
    %25 = arith.mulf %22, %24 : vector<2x16x8xf32>
    %26 = vector.shape_cast %25 : vector<2x16x8xf32> to vector<32x8xf32>
    %c0_14 = arith.constant 0 : index
    %c0_15 = arith.constant 0 : index
    %27 = vector.load %arg8[%c0_14, %c0_15] : memref<32x64xf32, #tpu.memory_space<vmem>>, vector<32x8xf32>
    tpu.vector_store %arg8[%c0_14, %c0_15], %26 {strides = array<i32>} : memref<32x64xf32, #tpu.memory_space<vmem>>, vector<32x8xf32>,
    %28 = vector.extract_strided_slice %3 {offsets = [0, 8], sizes = [32, 8], strides = [1, 1]} : vector<32x64xf32> to vector<32x8xf32>
    %29 = vector.shape_cast %28 : vector<32x8xf32> to vector<2x16x8xf32>
    %30 = vector.extract_strided_slice %5 {offsets = [0, 8], sizes = [32, 8], strides = [1, 1]} : vector<32x64xf32> to vector<32x8xf32>
    %31 = vector.shape_cast %30 : vector<32x8xf32> to vector<2x16x8xf32>
    %32 = vector.extract_strided_slice %7 {offsets = [0, 8], sizes = [32, 8], strides = [1, 1]} : vector<32x64xf32> to vector<32x8xf32>
    %33 = vector.shape_cast %32 : vector<32x8xf32> to vector<2x16x8xf32>
    "tpu.trace_start"() <{level = 10 : i32, message = "bqd,bkd->bqk"}> : () -> ()
    %cst_16 = arith.constant dense<0.000000e+00> : vector<2x16x16xf32>
    %34 = tpu.matmul %29, %31, %cst_16 {dimension_numbers = #tpu.dot_dimension_numbers<[2], [2], [1], [1], [0, 0, 0, 1, 1, 1], [0], [0]>} : vector<2x16x8xf32>, vector<2x16x8xf32>, vector<2x16x16xf32> -> vector<2x16x16xf32>
    "tpu.trace_stop"() : () -> ()
    %cst_17 = arith.constant dense<0xFF800000> : vector<2x16xf32>
    %35 = vector.multi_reduction <maximumf>, %34, %cst_17 [2] : vector<2x16x16xf32> to vector<2x16xf32>
    %36 = vector.shape_cast %35 : vector<2x16xf32> to vector<2x16x1xf32>
    %37 = vector.broadcast %36 : vector<2x16x1xf32> to vector<2x16x16xf32>
    %38 = arith.subf %34, %37 : vector<2x16x16xf32>
    %39 = math.exp %38 : vector<2x16x16xf32>
    %cst_18 = arith.constant dense<0.000000e+00> : vector<2x16xf32>
    %40 = vector.multi_reduction <add>, %39, %cst_18 [2] : vector<2x16x16xf32> to vector<2x16xf32>
    %41 = vector.shape_cast %40 : vector<2x16xf32> to vector<2x16x1xf32>
    "tpu.trace_start"() <{level = 10 : i32, message = "bqk,bkd->bqd"}> : () -> ()
    %cst_19 = arith.constant dense<0.000000e+00> : vector<2x16x8xf32>
    %42 = tpu.matmul %39, %33, %cst_19 {dimension_numbers = #tpu.dot_dimension_numbers<[2], [1], [1], [2], [0, 0, 0, 1, 1, 2], [0], [0]>} : vector<2x16x16xf32>, vector<2x16x8xf32>, vector<2x16x8xf32> -> vector<2x16x8xf32>
    "tpu.trace_stop"() : () -> ()
    %43 = tpu.reciprocal %41 {approx = true} : vector<2x16x1xf32> -> vector<2x16x1xf32>
    %44 = vector.broadcast %43 : vector<2x16x1xf32> to vector<2x16x8xf32>
    %45 = arith.mulf %42, %44 : vector<2x16x8xf32>
    %46 = vector.shape_cast %45 : vector<2x16x8xf32> to vector<32x8xf32>
    %c0_20 = arith.constant 0 : index
    %c8 = arith.constant 8 : index
    %47 = vector.load %arg8[%c0_20, %c8] : memref<32x64xf32, #tpu.memory_space<vmem>>, vector<32x8xf32>
    tpu.vector_store %arg8[%c0_20, %c8], %46 {strides = array<i32>} : memref<32x64xf32, #tpu.memory_space<vmem>>, vector<32x8xf32>,
    %48 = vector.extract_strided_slice %3 {offsets = [0, 16], sizes = [32, 8], strides = [1, 1]} : vector<32x64xf32> to vector<32x8xf32>
    %49 = vector.shape_cast %48 : vector<32x8xf32> to vector<2x16x8xf32>
    %50 = vector.extract_strided_slice %5 {offsets = [0, 16], sizes = [32, 8], strides = [1, 1]} : vector<32x64xf32> to vector<32x8xf32>
    %51 = vector.shape_cast %50 : vector<32x8xf32> to vector<2x16x8xf32>
    %52 = vector.extract_strided_slice %7 {offsets = [0, 16], sizes = [32, 8], strides = [1, 1]} : vector<32x64xf32> to vector<32x8xf32>
    %53 = vector.shape_cast %52 : vector<32x8xf32> to vector<2x16x8xf32>
    "tpu.trace_start"() <{level = 10 : i32, message = "bqd,bkd->bqk"}> : () -> ()
    %cst_21 = arith.constant dense<0.000000e+00> : vector<2x16x16xf32>
    %54 = tpu.matmul %49, %51, %cst_21 {dimension_numbers = #tpu.dot_dimension_numbers<[2], [2], [1], [1], [0, 0, 0, 1, 1, 1], [0], [0]>} : vector<2x16x8xf32>, vector<2x16x8xf32>, vector<2x16x16xf32> -> vector<2x16x16xf32>
    "tpu.trace_stop"() : () -> ()
    %cst_22 = arith.constant dense<0xFF800000> : vector<2x16xf32>
    %55 = vector.multi_reduction <maximumf>, %54, %cst_22 [2] : vector<2x16x16xf32> to vector<2x16xf32>
    %56 = vector.shape_cast %55 : vector<2x16xf32> to vector<2x16x1xf32>
    %57 = vector.broadcast %56 : vector<2x16x1xf32> to vector<2x16x16xf32>
    %58 = arith.subf %54, %57 : vector<2x16x16xf32>
    %59 = math.exp %58 : vector<2x16x16xf32>
    %cst_23 = arith.constant dense<0.000000e+00> : vector<2x16xf32>
    %60 = vector.multi_reduction <add>, %59, %cst_23 [2] : vector<2x16x16xf32> to vector<2x16xf32>
    %61 = vector.shape_cast %60 : vector<2x16xf32> to vector<2x16x1xf32>
    "tpu.trace_start"() <{level = 10 : i32, message = "bqk,bkd->bqd"}> : () -> ()
    %cst_24 = arith.constant dense<0.000000e+00> : vector<2x16x8xf32>
    %62 = tpu.matmul %59, %53, %cst_24 {dimension_numbers = #tpu.dot_dimension_numbers<[2], [1], [1], [2], [0, 0, 0, 1, 1, 2], [0], [0]>} : vector<2x16x16xf32>, vector<2x16x8xf32>, vector<2x16x8xf32> -> vector<2x16x8xf32>
    "tpu.trace_stop"() : () -> ()
    %63 = tpu.reciprocal %61 {approx = true} : vector<2x16x1xf32> -> vector<2x16x1xf32>
    %64 = vector.broadcast %63 : vector<2x16x1xf32> to vector<2x16x8xf32>
    %65 = arith.mulf %62, %64 : vector<2x16x8xf32>
    %66 = vector.shape_cast %65 : vector<2x16x8xf32> to vector<32x8xf32>
    %c0_25 = arith.constant 0 : index
    %c16 = arith.constant 16 : index
    %67 = vector.load %arg8[%c0_25, %c16] : memref<32x64xf32, #tpu.memory_space<vmem>>, vector<32x8xf32>
    tpu.vector_store %arg8[%c0_25, %c16], %66 {strides = array<i32>} : memref<32x64xf32, #tpu.memory_space<vmem>>, vector<32x8xf32>,
    %68 = vector.extract_strided_slice %3 {offsets = [0, 24], sizes = [32, 8], strides = [1, 1]} : vector<32x64xf32> to vector<32x8xf32>
    %69 = vector.shape_cast %68 : vector<32x8xf32> to vector<2x16x8xf32>
    %70 = vector.extract_strided_slice %5 {offsets = [0, 24], sizes = [32, 8], strides = [1, 1]} : vector<32x64xf32> to vector<32x8xf32>
    %71 = vector.shape_cast %70 : vector<32x8xf32> to vector<2x16x8xf32>
    %72 = vector.extract_strided_slice %7 {offsets = [0, 24], sizes = [32, 8], strides = [1, 1]} : vector<32x64xf32> to vector<32x8xf32>
    %73 = vector.shape_cast %72 : vector<32x8xf32> to vector<2x16x8xf32>
    "tpu.trace_start"() <{level = 10 : i32, message = "bqd,bkd->bqk"}> : () -> ()
    %cst_26 = arith.constant dense<0.000000e+00> : vector<2x16x16xf32>
    %74 = tpu.matmul %69, %71, %cst_26 {dimension_numbers = #tpu.dot_dimension_numbers<[2], [2], [1], [1], [0, 0, 0, 1, 1, 1], [0], [0]>} : vector<2x16x8xf32>, vector<2x16x8xf32>, vector<2x16x16xf32> -> vector<2x16x16xf32>
    "tpu.trace_stop"() : () -> ()
    %cst_27 = arith.constant dense<0xFF800000> : vector<2x16xf32>
    %75 = vector.multi_reduction <maximumf>, %74, %cst_27 [2] : vector<2x16x16xf32> to vector<2x16xf32>
    %76 = vector.shape_cast %75 : vector<2x16xf32> to vector<2x16x1xf32>
    %77 = vector.broadcast %76 : vector<2x16x1xf32> to vector<2x16x16xf32>
    %78 = arith.subf %74, %77 : vector<2x16x16xf32>
    %79 = math.exp %78 : vector<2x16x16xf32>
    %cst_28 = arith.constant dense<0.000000e+00> : vector<2x16xf32>
    %80 = vector.multi_reduction <add>, %79, %cst_28 [2] : vector<2x16x16xf32> to vector<2x16xf32>
    %81 = vector.shape_cast %80 : vector<2x16xf32> to vector<2x16x1xf32>
    "tpu.trace_start"() <{level = 10 : i32, message = "bqk,bkd->bqd"}> : () -> ()
    %cst_29 = arith.constant dense<0.000000e+00> : vector<2x16x8xf32>
    %82 = tpu.matmul %79, %73, %cst_29 {dimension_numbers = #tpu.dot_dimension_numbers<[2], [1], [1], [2], [0, 0, 0, 1, 1, 2], [0], [0]>} : vector<2x16x16xf32>, vector<2x16x8xf32>, vector<2x16x8xf32> -> vector<2x16x8xf32>
    "tpu.trace_stop"() : () -> ()
    %83 = tpu.reciprocal %81 {approx = true} : vector<2x16x1xf32> -> vector<2x16x1xf32>
    %84 = vector.broadcast %83 : vector<2x16x1xf32> to vector<2x16x8xf32>
    %85 = arith.mulf %82, %84 : vector<2x16x8xf32>
    %86 = vector.shape_cast %85 : vector<2x16x8xf32> to vector<32x8xf32>
    %c0_30 = arith.constant 0 : index
    %c24 = arith.constant 24 : index
    %87 = vector.load %arg8[%c0_30, %c24] : memref<32x64xf32, #tpu.memory_space<vmem>>, vector<32x8xf32>
    tpu.vector_store %arg8[%c0_30, %c24], %86 {strides = array<i32>} : memref<32x64xf32, #tpu.memory_space<vmem>>, vector<32x8xf32>,
    %88 = vector.extract_strided_slice %3 {offsets = [0, 32], sizes = [32, 8], strides = [1, 1]} : vector<32x64xf32> to vector<32x8xf32>
    %89 = vector.shape_cast %88 : vector<32x8xf32> to vector<2x16x8xf32>
    %90 = vector.extract_strided_slice %5 {offsets = [0, 32], sizes = [32, 8], strides = [1, 1]} : vector<32x64xf32> to vector<32x8xf32>
    %91 = vector.shape_cast %90 : vector<32x8xf32> to vector<2x16x8xf32>
    %92 = vector.extract_strided_slice %7 {offsets = [0, 32], sizes = [32, 8], strides = [1, 1]} : vector<32x64xf32> to vector<32x8xf32>
    %93 = vector.shape_cast %92 : vector<32x8xf32> to vector<2x16x8xf32>
    "tpu.trace_start"() <{level = 10 : i32, message = "bqd,bkd->bqk"}> : () -> ()
    %cst_31 = arith.constant dense<0.000000e+00> : vector<2x16x16xf32>
    %94 = tpu.matmul %89, %91, %cst_31 {dimension_numbers = #tpu.dot_dimension_numbers<[2], [2], [1], [1], [0, 0, 0, 1, 1, 1], [0], [0]>} : vector<2x16x8xf32>, vector<2x16x8xf32>, vector<2x16x16xf32> -> vector<2x16x16xf32>
    "tpu.trace_stop"() : () -> ()
    %cst_32 = arith.constant dense<0xFF800000> : vector<2x16xf32>
    %95 = vector.multi_reduction <maximumf>, %94, %cst_32 [2] : vector<2x16x16xf32> to vector<2x16xf32>
    %96 = vector.shape_cast %95 : vector<2x16xf32> to vector<2x16x1xf32>
    %97 = vector.broadcast %96 : vector<2x16x1xf32> to vector<2x16x16xf32>
    %98 = arith.subf %94, %97 : vector<2x16x16xf32>
    %99 = math.exp %98 : vector<2x16x16xf32>
    %cst_33 = arith.constant dense<0.000000e+00> : vector<2x16xf32>
    %100 = vector.multi_reduction <add>, %99, %cst_33 [2] : vector<2x16x16xf32> to vector<2x16xf32>
    %101 = vector.shape_cast %100 : vector<2x16xf32> to vector<2x16x1xf32>
    "tpu.trace_start"() <{level = 10 : i32, message = "bqk,bkd->bqd"}> : () -> ()
    %cst_34 = arith.constant dense<0.000000e+00> : vector<2x16x8xf32>
    %102 = tpu.matmul %99, %93, %cst_34 {dimension_numbers = #tpu.dot_dimension_numbers<[2], [1], [1], [2], [0, 0, 0, 1, 1, 2], [0], [0]>} : vector<2x16x16xf32>, vector<2x16x8xf32>, vector<2x16x8xf32> -> vector<2x16x8xf32>
    "tpu.trace_stop"() : () -> ()
    %103 = tpu.reciprocal %101 {approx = true} : vector<2x16x1xf32> -> vector<2x16x1xf32>
    %104 = vector.broadcast %103 : vector<2x16x1xf32> to vector<2x16x8xf32>
    %105 = arith.mulf %102, %104 : vector<2x16x8xf32>
    %106 = vector.shape_cast %105 : vector<2x16x8xf32> to vector<32x8xf32>
    %c0_35 = arith.constant 0 : index
    %c32 = arith.constant 32 : index
    %107 = vector.load %arg8[%c0_35, %c32] : memref<32x64xf32, #tpu.memory_space<vmem>>, vector<32x8xf32>
    tpu.vector_store %arg8[%c0_35, %c32], %106 {strides = array<i32>} : memref<32x64xf32, #tpu.memory_space<vmem>>, vector<32x8xf32>,
    %108 = vector.extract_strided_slice %3 {offsets = [0, 40], sizes = [32, 8], strides = [1, 1]} : vector<32x64xf32> to vector<32x8xf32>
    %109 = vector.shape_cast %108 : vector<32x8xf32> to vector<2x16x8xf32>
    %110 = vector.extract_strided_slice %5 {offsets = [0, 40], sizes = [32, 8], strides = [1, 1]} : vector<32x64xf32> to vector<32x8xf32>
    %111 = vector.shape_cast %110 : vector<32x8xf32> to vector<2x16x8xf32>
    %112 = vector.extract_strided_slice %7 {offsets = [0, 40], sizes = [32, 8], strides = [1, 1]} : vector<32x64xf32> to vector<32x8xf32>
    %113 = vector.shape_cast %112 : vector<32x8xf32> to vector<2x16x8xf32>
    "tpu.trace_start"() <{level = 10 : i32, message = "bqd,bkd->bqk"}> : () -> ()
    %cst_36 = arith.constant dense<0.000000e+00> : vector<2x16x16xf32>
    %114 = tpu.matmul %109, %111, %cst_36 {dimension_numbers = #tpu.dot_dimension_numbers<[2], [2], [1], [1], [0, 0, 0, 1, 1, 1], [0], [0]>} : vector<2x16x8xf32>, vector<2x16x8xf32>, vector<2x16x16xf32> -> vector<2x16x16xf32>
    "tpu.trace_stop"() : () -> ()
    %cst_37 = arith.constant dense<0xFF800000> : vector<2x16xf32>
    %115 = vector.multi_reduction <maximumf>, %114, %cst_37 [2] : vector<2x16x16xf32> to vector<2x16xf32>
    %116 = vector.shape_cast %115 : vector<2x16xf32> to vector<2x16x1xf32>
    %117 = vector.broadcast %116 : vector<2x16x1xf32> to vector<2x16x16xf32>
    %118 = arith.subf %114, %117 : vector<2x16x16xf32>
    %119 = math.exp %118 : vector<2x16x16xf32>
    %cst_38 = arith.constant dense<0.000000e+00> : vector<2x16xf32>
    %120 = vector.multi_reduction <add>, %119, %cst_38 [2] : vector<2x16x16xf32> to vector<2x16xf32>
    %121 = vector.shape_cast %120 : vector<2x16xf32> to vector<2x16x1xf32>
    "tpu.trace_start"() <{level = 10 : i32, message = "bqk,bkd->bqd"}> : () -> ()
    %cst_39 = arith.constant dense<0.000000e+00> : vector<2x16x8xf32>
    %122 = tpu.matmul %119, %113, %cst_39 {dimension_numbers = #tpu.dot_dimension_numbers<[2], [1], [1], [2], [0, 0, 0, 1, 1, 2], [0], [0]>} : vector<2x16x16xf32>, vector<2x16x8xf32>, vector<2x16x8xf32> -> vector<2x16x8xf32>
    "tpu.trace_stop"() : () -> ()
    %123 = tpu.reciprocal %121 {approx = true} : vector<2x16x1xf32> -> vector<2x16x1xf32>
    %124 = vector.broadcast %123 : vector<2x16x1xf32> to vector<2x16x8xf32>
    %125 = arith.mulf %122, %124 : vector<2x16x8xf32>
    %126 = vector.shape_cast %125 : vector<2x16x8xf32> to vector<32x8xf32>
    %c0_40 = arith.constant 0 : index
    %c40 = arith.constant 40 : index
    %127 = vector.load %arg8[%c0_40, %c40] : memref<32x64xf32, #tpu.memory_space<vmem>>, vector<32x8xf32>
    tpu.vector_store %arg8[%c0_40, %c40], %126 {strides = array<i32>} : memref<32x64xf32, #tpu.memory_space<vmem>>, vector<32x8xf32>,
    %128 = vector.extract_strided_slice %3 {offsets = [0, 48], sizes = [32, 8], strides = [1, 1]} : vector<32x64xf32> to vector<32x8xf32>
    %129 = vector.shape_cast %128 : vector<32x8xf32> to vector<2x16x8xf32>
    %130 = vector.extract_strided_slice %5 {offsets = [0, 48], sizes = [32, 8], strides = [1, 1]} : vector<32x64xf32> to vector<32x8xf32>
    %131 = vector.shape_cast %130 : vector<32x8xf32> to vector<2x16x8xf32>
    %132 = vector.extract_strided_slice %7 {offsets = [0, 48], sizes = [32, 8], strides = [1, 1]} : vector<32x64xf32> to vector<32x8xf32>
    %133 = vector.shape_cast %132 : vector<32x8xf32> to vector<2x16x8xf32>
    "tpu.trace_start"() <{level = 10 : i32, message = "bqd,bkd->bqk"}> : () -> ()
    %cst_41 = arith.constant dense<0.000000e+00> : vector<2x16x16xf32>
    %134 = tpu.matmul %129, %131, %cst_41 {dimension_numbers = #tpu.dot_dimension_numbers<[2], [2], [1], [1], [0, 0, 0, 1, 1, 1], [0], [0]>} : vector<2x16x8xf32>, vector<2x16x8xf32>, vector<2x16x16xf32> -> vector<2x16x16xf32>
    "tpu.trace_stop"() : () -> ()
    %cst_42 = arith.constant dense<0xFF800000> : vector<2x16xf32>
    %135 = vector.multi_reduction <maximumf>, %134, %cst_42 [2] : vector<2x16x16xf32> to vector<2x16xf32>
    %136 = vector.shape_cast %135 : vector<2x16xf32> to vector<2x16x1xf32>
    %137 = vector.broadcast %136 : vector<2x16x1xf32> to vector<2x16x16xf32>
    %138 = arith.subf %134, %137 : vector<2x16x16xf32>
    %139 = math.exp %138 : vector<2x16x16xf32>
    %cst_43 = arith.constant dense<0.000000e+00> : vector<2x16xf32>
    %140 = vector.multi_reduction <add>, %139, %cst_43 [2] : vector<2x16x16xf32> to vector<2x16xf32>
    %141 = vector.shape_cast %140 : vector<2x16xf32> to vector<2x16x1xf32>
    "tpu.trace_start"() <{level = 10 : i32, message = "bqk,bkd->bqd"}> : () -> ()
    %cst_44 = arith.constant dense<0.000000e+00> : vector<2x16x8xf32>
    %142 = tpu.matmul %139, %133, %cst_44 {dimension_numbers = #tpu.dot_dimension_numbers<[2], [1], [1], [2], [0, 0, 0, 1, 1, 2], [0], [0]>} : vector<2x16x16xf32>, vector<2x16x8xf32>, vector<2x16x8xf32> -> vector<2x16x8xf32>
    "tpu.trace_stop"() : () -> ()
    %143 = tpu.reciprocal %141 {approx = true} : vector<2x16x1xf32> -> vector<2x16x1xf32>
    %144 = vector.broadcast %143 : vector<2x16x1xf32> to vector<2x16x8xf32>
    %145 = arith.mulf %142, %144 : vector<2x16x8xf32>
    %146 = vector.shape_cast %145 : vector<2x16x8xf32> to vector<32x8xf32>
    %c0_45 = arith.constant 0 : index
    %c48 = arith.constant 48 : index
    %147 = vector.load %arg8[%c0_45, %c48] : memref<32x64xf32, #tpu.memory_space<vmem>>, vector<32x8xf32>
    tpu.vector_store %arg8[%c0_45, %c48], %146 {strides = array<i32>} : memref<32x64xf32, #tpu.memory_space<vmem>>, vector<32x8xf32>,
    %148 = vector.extract_strided_slice %3 {offsets = [0, 56], sizes = [32, 8], strides = [1, 1]} : vector<32x64xf32> to vector<32x8xf32>
    %149 = vector.shape_cast %148 : vector<32x8xf32> to vector<2x16x8xf32>
    %150 = vector.extract_strided_slice %5 {offsets = [0, 56], sizes = [32, 8], strides = [1, 1]} : vector<32x64xf32> to vector<32x8xf32>
    %151 = vector.shape_cast %150 : vector<32x8xf32> to vector<2x16x8xf32>
    %152 = vector.extract_strided_slice %7 {offsets = [0, 56], sizes = [32, 8], strides = [1, 1]} : vector<32x64xf32> to vector<32x8xf32>
    %153 = vector.shape_cast %152 : vector<32x8xf32> to vector<2x16x8xf32>
    "tpu.trace_start"() <{level = 10 : i32, message = "bqd,bkd->bqk"}> : () -> ()
    %cst_46 = arith.constant dense<0.000000e+00> : vector<2x16x16xf32>
    %154 = tpu.matmul %149, %151, %cst_46 {dimension_numbers = #tpu.dot_dimension_numbers<[2], [2], [1], [1], [0, 0, 0, 1, 1, 1], [0], [0]>} : vector<2x16x8xf32>, vector<2x16x8xf32>, vector<2x16x16xf32> -> vector<2x16x16xf32>
    "tpu.trace_stop"() : () -> ()
    %cst_47 = arith.constant dense<0xFF800000> : vector<2x16xf32>
    %155 = vector.multi_reduction <maximumf>, %154, %cst_47 [2] : vector<2x16x16xf32> to vector<2x16xf32>
    %156 = vector.shape_cast %155 : vector<2x16xf32> to vector<2x16x1xf32>
    %157 = vector.broadcast %156 : vector<2x16x1xf32> to vector<2x16x16xf32>
    %158 = arith.subf %154, %157 : vector<2x16x16xf32>
    %159 = math.exp %158 : vector<2x16x16xf32>
    %cst_48 = arith.constant dense<0.000000e+00> : vector<2x16xf32>
    %160 = vector.multi_reduction <add>, %159, %cst_48 [2] : vector<2x16x16xf32> to vector<2x16xf32>
    %161 = vector.shape_cast %160 : vector<2x16xf32> to vector<2x16x1xf32>
    "tpu.trace_start"() <{level = 10 : i32, message = "bqk,bkd->bqd"}> : () -> ()
    %cst_49 = arith.constant dense<0.000000e+00> : vector<2x16x8xf32>
    %162 = tpu.matmul %159, %153, %cst_49 {dimension_numbers = #tpu.dot_dimension_numbers<[2], [1], [1], [2], [0, 0, 0, 1, 1, 2], [0], [0]>} : vector<2x16x16xf32>, vector<2x16x8xf32>, vector<2x16x8xf32> -> vector<2x16x8xf32>
    "tpu.trace_stop"() : () -> ()
    %163 = tpu.reciprocal %161 {approx = true} : vector<2x16x1xf32> -> vector<2x16x1xf32>
    %164 = vector.broadcast %163 : vector<2x16x1xf32> to vector<2x16x8xf32>
    %165 = arith.mulf %162, %164 : vector<2x16x8xf32>
    %166 = vector.shape_cast %165 : vector<2x16x8xf32> to vector<32x8xf32>
    %c0_50 = arith.constant 0 : index
    %c56 = arith.constant 56 : index
    %167 = vector.load %arg8[%c0_50, %c56] : memref<32x64xf32, #tpu.memory_space<vmem>>, vector<32x8xf32>
    tpu.vector_store %arg8[%c0_50, %c56], %166 {strides = array<i32>} : memref<32x64xf32, #tpu.memory_space<vmem>>, vector<32x8xf32>,
    %c0_51 = arith.constant 0 : index
    %c0_52 = arith.constant 0 : index
    %168 = vector.load %arg8[%c0_51, %c0_52] : memref<32x64xf32, #tpu.memory_space<vmem>>, vector<32x64xf32>
    %c0_53 = arith.constant 0 : index
    %c0_54 = arith.constant 0 : index
    %169 = vector.load %arg5[%c0_53, %c0_54] : memref<64x64xf32, #tpu.memory_space<vmem>>, vector<64x64xf32>
    %cst_55 = arith.constant dense<0.000000e+00> : vector<32x64xf32>
    %170 = tpu.matmul %168, %169, %cst_55 {dimension_numbers = #tpu.dot_dimension_numbers<[1], [0], [0], [1], [0, 0, 1, 1], [], []>} : vector<32x64xf32>, vector<64x64xf32>, vector<32x64xf32> -> vector<32x64xf32>
    %c0_56 = arith.constant 0 : index
    %c0_57 = arith.constant 0 : index
    %171 = vector.load %arg6[%c0_56, %c0_57] : memref<1x64xf32, #tpu.memory_space<vmem>>, vector<1x64xf32>
    %172 = vector.broadcast %171 : vector<1x64xf32> to vector<32x64xf32>
    %173 = arith.addf %170, %172 : vector<32x64xf32>
    %174 = vector.shape_cast %173 : vector<32x64xf32> to vector<2x16x64xf32>
    %c0_58 = arith.constant 0 : index
    %c0_59 = arith.constant 0 : index
    %c0_60 = arith.constant 0 : index
    %175 = vector.load %arg7[%c0_58, %c0_59, %c0_60] : memref<2x16x64xf32, #tpu.memory_space<vmem>>, vector<2x16x64xf32>
    tpu.vector_store %arg7[%c0_58, %c0_59, %c0_60], %174 {strides = array<i32>} : memref<2x16x64xf32, #tpu.memory_space<vmem>>, vector<2x16x64xf32>,
    return
  }
  func.func @transform_0(%arg0: i32) -> (i32, i32, i32) {
    %c0_i32 = arith.constant 0 : i32
    %c0_i32_0 = arith.constant 0 : i32
    %c0_i32_1 = arith.constant 0 : i32
    return %arg0, %c0_i32, %c0_i32_0 : i32, i32, i32
  }
  func.func @transform_1(%arg0: i32) -> (i32, i32) {
    %c0_i32 = arith.constant 0 : i32
    %c0_i32_0 = arith.constant 0 : i32
    %c0_i32_1 = arith.constant 0 : i32
    return %c0_i32, %c0_i32_0 : i32, i32
  }
  func.func @transform_2(%arg0: i32) -> (i32, i32) {
    %c0_i32 = arith.constant 0 : i32
    %c0_i32_0 = arith.constant 0 : i32
    %c0_i32_1 = arith.constant 0 : i32
    return %c0_i32, %c0_i32_0 : i32, i32
  }
  func.func @transform_3(%arg0: i32) -> (i32, i32) {
    %c0_i32 = arith.constant 0 : i32
    %c0_i32_0 = arith.constant 0 : i32
    %c0_i32_1 = arith.constant 0 : i32
    return %c0_i32, %c0_i32_0 : i32, i32
  }
  func.func @transform_4(%arg0: i32) -> (i32, i32) {
    %c0_i32 = arith.constant 0 : i32
    %c0_i32_0 = arith.constant 0 : i32
    %c0_i32_1 = arith.constant 0 : i32
    return %c0_i32, %c0_i32_0 : i32, i32
  }
  func.func @transform_5(%arg0: i32) -> (i32, i32) {
    %c0_i32 = arith.constant 0 : i32
    %c0_i32_0 = arith.constant 0 : i32
    %c0_i32_1 = arith.constant 0 : i32
    return %c0_i32, %c0_i32_0 : i32, i32
  }
  func.func @transform_6(%arg0: i32) -> (i32, i32, i32) {
    %c0_i32 = arith.constant 0 : i32
    %c0_i32_0 = arith.constant 0 : i32
    %c0_i32_1 = arith.constant 0 : i32
    return %arg0, %c0_i32, %c0_i32_0 : i32, i32, i32
  }
}

</mosaic_0001>

<bundles_post_ra>
// kernel: tpu_custom_call.1
= control target key start
LH: loop header
LB: loop body
LE: loop exit
PB: predicated region body
PF: predicated region fallthrough
CT: control target
= control target key end

     0   :  { %11 = vsyncpa [#allocation4], 0  ;;  %s3942_s0 = inlined_call_operand.hbm [shape: f32[4,16,64], index: 0, kind: input, shape index: {}]   ;;  %s3943_s1 = inlined_call_operand.hbm [shape: f32[64,64], index: 1, kind: input, shape index: {}]   ;;  %s3944_s2 = inlined_call_operand.hbm [shape: f32[64,64], index: 2, kind: input, shape index: {}]   ;;  %s3945_s3 = inlined_call_operand.hbm [shape: f32[64,64], index: 3, kind: input, shape index: {}]   ;;  %s3946_s4 = inlined_call_operand.hbm [shape: f32[64,64], index: 4, kind: input, shape index: {}]   ;;  %s3947_s5 = inlined_call_operand.vmem [shape: f32[1,64], index: 5, kind: input, shape index: {}]   ;;  %s3948_s6 = inlined_call_operand.hbm [shape: f32[4,16,64], index: 6, kind: output, shape index: {}]  }
   0x1   :  { %13 = vsyncpa [#allocation4 + $0x1], 0 }
   0x2   :  { %14 = vsyncpa [#allocation7], 0 }
   0x3   :  { %15 = vsyncpa [#allocation10], 0 }
   0x4   :  { %16 = vsyncpa [#allocation5], 0 }
   0x5   :  { %18 = vsyncpa [#allocation5 + $0x1], 0  ;;  %s3064_s21 = smov 0   ;;  %s3066_s22 = smov 0  }
   0x6   :  { %s3068_s23 = smov 0   ;;  %s3070_s24 = smov 0  }
   0x7 LB: > { %s3085_s25 = sadd.s32 4294967295, %s3006_s24   ;;  %s2331_s26 = sadd.s32 4294967294, %s3006_s24   ;;  %s3006_s24 = sphi %s3070_s24, %s3963_s24   ;;  %s3002_s23 = sphi %s3068_s23, %s3962_s23   ;;  %s2998_s22 = sphi %s3066_s22, %s3961_s22   ;;  %s2994_s21 = sphi %s3064_s21, %s3960_s21  }
   0x8   : > { %p44_p0 = scmp.ne.s32.totalorder %s2998_s22, %s2994_s21  ;;  %p45_p1 = scmp.eq.s32.totalorder %s3085_s25, 0 }
   0x9   : > { %p173_p2 = scmp.eq.s32.totalorder %s3085_s25, 1  ;;  %p179_p3 = scmp.eq.s32.totalorder %s2331_s26, 1 }
   0xa   : > { %p3094_p4 = por %p45_p1, %p44_p0  ;;  %p2332_p5 = scmp.ge.s32.totalorder %s3006_s24, 1 }
   0xb   : > { %p3099_p6 = por %p179_p3, %p44_p0  ;;  %p186_p7 = scmp.lt.s32.totalorder %s3006_s24, 3 }
   0xc   : > { %s197_s7 = sshll.u32 %s3943_s1, 4  ;;  %s3008_s9 = smov [#allocation6]   ;;  %s198_s7 = int_to_ptr.hbm [resolvable:$true] %s197_s7 }
   0xd   : > { %p3107_p8 = pnand %p2332_p5, %p186_p7  ;;  %s199_s10 = sshll.u32 %s3008_s9, 4  ;;  %s200_s10 = int_to_ptr.vmem [resolvable:$true] %s199_s10 }
   0xe   : > { %s225_s14 = sshll.u32 %s3945_s3, 4  ;;  %s3949_s15 = smov 128   ;;  %s226_s14 = int_to_ptr.hbm [resolvable:$true] %s225_s14 }
   0xf   : > { %p2499_p9 = pneg %p3107_p8  ;;  %s3950_s16 = smov 8  }
  0x10   : > { %s3011_s17 = smov [#allocation9]   ;;  %s211_s26 = sshll.u32 %s3944_s2, 4  ;;  %s212_s26 = int_to_ptr.hbm [resolvable:$true] %s211_s26 }
  0x11   : > { %p3115_p10 = pnand %p2499_p9, %p45_p1  ;;  %s227_s18 = sshll.u32 %s3011_s17, 4  ;;  %s228_s18 = int_to_ptr.vmem [resolvable:$true] %s227_s18 }
  0x12   : > { %s3012_s9 = smov [#allocation8]   ;;  %s3013_s12 = smov [#allocation11]  }
  0x13   : > { %2502 = dma.hbm_to_vmem [thread:$0]  (!%p3115_p10), %s198_s7, 1024, %s200_s10, [#allocation7], %s3949_s15, %s3949_s15, %s3950_s16  }
  0x14   : > { %2508 = dma.hbm_to_vmem [thread:$0]  (!%p3115_p10), %s226_s14, 1024, %s228_s18, [#allocation10], %s3949_s15, %s3949_s15, %s3950_s16  }
  0x15   : > { %s239_s7 = sshll.u32 %s3946_s4, 4  ;;  %s213_s10 = sshll.u32 %s3012_s9, 4  ;;  %s240_s7 = int_to_ptr.hbm [resolvable:$true] %s239_s7  ;;  %s214_s10 = int_to_ptr.vmem [resolvable:$true] %s213_s10 }
  0x16   : > { %2505 = dma.hbm_to_vmem [thread:$0]  (!%p3115_p10), %s212_s26, 1024, %s214_s10, [#allocation7], %s3949_s15, %s3949_s15, %s3950_s16  }
  0x17   : > { %s241_s13 = sshll.u32 %s3013_s12, 4  ;;  %s3150_s14 = sadd.s32 1, %s3006_s24   ;;  %s242_s13 = int_to_ptr.vmem [resolvable:$true] %s241_s13 }
  0x18   : > { %2511 = dma.hbm_to_vmem [thread:$0]  (!%p3115_p10), %s240_s7, 1024, %s242_s13, [#allocation10], %s3949_s15, %s3949_s15, %s3950_s16  }
  0x19   : > { %s31_s17 = sadd.s32 1, %s3002_s23  ;;  %s28_s18 = ssub.s32 %s3006_s24, %s3150_s14 }
  0x1a   : > { %p38_p12 = scmp.ne.s32.totalorder %s3002_s23, %s2998_s22  ;;  %p29_p13 = scmp.eq.s32.totalorder %s28_s18, 0 }
  0x1b   : > { %p39_p0 = scmp.eq.s32.totalorder %s3006_s24, 0  ;;  %p2524_p5 = scmp.lt.s32.totalorder %s3006_s24, 2 }
  0x1c   : > { %p3160_p3 = por %p173_p2, %p38_p12  ;;  %s258_s11 = sand.u32 1, %s3002_s23  }
  0x1d   : > { %s3166_s20 = scalar_select %p29_p13, %s3002_s23, %s31_s17  }
  0x1e   : > { %p40_p7 = por %p39_p0, %p38_p12  ;;  %s2338_s26 = sshll.u32 %s258_s11, 5 }
  0x1f   : > { %s2468_s29 = sshll.u32 %s3006_s24, 5  ;;  %s262_s10 = scalar_lea.vmem [#allocation3], %s2338_s26 }
  0x20   : > { %s268_s9 = scalar_lea.hbm %s3942_s0, %s2468_s29  ;;  %s271_s12 = sshll.u32 %s262_s10, 4  ;;  %s272_s12 = int_to_ptr.vmem [resolvable:$true] %s271_s12 }
  0x21   : > { %s269_s13 = sshll.u32 %s268_s9, 4  ;;  %p3173_p2 = pnand %p2524_p5, %p40_p7  ;;  %s270_s13 = int_to_ptr.hbm [resolvable:$true] %s269_s13 }
  0x22   : > { %s259_s17 = scalar_lea.sflag [#allocation4], %s258_s11  ;;  %s2902_s15 = sshra.s32 %s270_s13, 4  ;;  %s2903_s15 = int_to_ptr.hbm [resolvable:$true] %s2902_s15 }
  0x23   : > { %s2904_s16 = scalar_lea.hbm %s2903_s15, 32  ;;  %p2906_p10 = pneg %p3173_p2 }
  0x24   : > { %p2905_p9 = scmp.ne.s32.totalorder %s2903_s15, %s2904_s16  ;;  %s2909_s30 = scalar_lea.hbm %s3942_s0, 64 }
  0x25   : > { %p2910_p0 = scmp.lt.s32.totalorder %s2903_s15, %s3942_s0  ;;  %p2911_p5 = scmp.lt.s32.totalorder %s2909_s30, %s2904_s16 }
  0x26   : > { %p2907_p12 = pnand %p2906_p10, %p2905_p9 }
  0x27   : > { %p2912_p7 = por %p2911_p5, %p2910_p0 }
  0x28   : > { %p2908_p13 = pneg %p2907_p12 }
  0x2a   : > { %p2913_p11 = pnand %p2912_p7, %p2908_p13 }
  0x2c   : > { %2916 = shalt.err (!%p2913_p11)
}
  0x2d   : > { %s3957_s11 = smov 8   ;;  %s3958_s10 = smov 128  }
  0x2e   : > { %2515 = dma.hbm_to_vmem [thread:$0]  (!%p3173_p2), %s270_s13, 512, %s272_s12, %s259_s17, %s3958_s10, %s3958_s10, %s3957_s11  }
  0x2f   : > { %283 = sbr.rel (%p3107_p8) target bundleno = 1205 (0x4b5), region = 44  ;;  %s3193_s29 = sand.u32 (!%p3107_p8), 1, %s2998_s22  }
  0x30   : > { %s2343_s15 = sshll.u32 (!%p3107_p8), %s3193_s29, 5  ;;  %s286_s16 = scalar_lea.sflag (!%p3107_p8), [#allocation4], %s3193_s29 }
  0x31   : > { %s3199_s26 = scalar_lea.vmem (!%p3107_p8), [#allocation3], %s2343_s15 }
  0x34   : > { %2977 = dma.done.wait (%p3094_p4), %s286_s16, 512  }
  0x35   : > { %2979 = vsyncadd (%p3094_p4), %s286_s16, 4294966784 }
  0x36   : > { %2981 = dma.done.wait (%p45_p1), [#allocation7], 2048  }
  0x37   : > { %2983 = vsyncadd (%p45_p1), [#allocation7], 4294965248 }
  0x38   : > { %2985 = dma.done.wait (%p45_p1), [#allocation10], 2048  }
  0x39   : > { %2987 = vsyncadd (%p45_p1), [#allocation10], 4294965248  ;;  %v352_v0 = vld [vmem:[#allocation6 + $0x38] sm:$0xff]  ;;  %v351_v2 = vld [vmem:[#allocation6 + $0x30] sm:$0xff]  ;;  %vm353_vm0 = vcmask 523264   ;;  %s3014_s27 = smov 120  }
  0x3a   : > { %v402_v1 = vld [vmem:[#allocation8 + $0x38] sm:$0xff]  ;;  %374 = vmatpush.msra.mxu0 %v352_v0  ;;  %v401_v3 = vld [vmem:[#allocation8 + $0x30] sm:$0xff]  ;;  %v350_v4 = vld [vmem:[#allocation6 + $0x28] sm:$0xff]  ;;  %s3015_s8 = smov 104   ;;  %vm469_vm1 = vcmask 64512   ;;  %s3016_s12 = smov 96  }
  0x3b   : > { %411 = vmatpush.msra.mxu1 %v402_v1  ;;  %v400_v5 = vld [vmem:[#allocation8 + $0x28] sm:$0xff]  ;;  %2471 = vmatpush.msra.mxu2 %v402_v1  ;;  %v349_v6 = vld [vmem:[#allocation6 + $0x20] sm:$0xff]  ;;  %v348_v8 = vld [vmem:[#allocation6 + $0x18] sm:$0xff]  ;;  %s3017_s13 = smov 112   ;;  %s3018_s18 = smov 88   ;;  %vm540_vm2 = vcmask 130048  }
  0x3c   : > { %375 = vmatpush.msra.mxu0 %v351_v2  ;;  %v399_v7 = vld [vmem:[#allocation8 + $0x20] sm:$0xff]  ;;  %v398_v9 = vld [vmem:[#allocation8 + $0x18] sm:$0xff]  ;;  %v347_v10 = vld [vmem:[#allocation6 + $0x10] sm:$0xff]  ;;  %s3019_s17 = smov 80   ;;  %s3020_s30 = smov 72   ;;  %vm859_vm3 = vcmask 130112  }
  0x3d   : > { %412 = vmatpush.msra.mxu1 %v401_v3  ;;  %2472 = vmatpush.msra.mxu2 %v401_v3  ;;  %v397_v11 = vld [vmem:[#allocation8 + $0x10] sm:$0xff]  ;;  %v346_v12 = vld [vmem:[#allocation6 + $0x8] sm:$0xff]  ;;  %v345_v14 = vld [vmem:[#allocation6] sm:$0xff]  ;;  %s3021_s7 = smov 16   ;;  %s3022_s9 = smov 32   ;;  %vm1072_vm4 = vcmask 195712  }
  0x3e   : > { %376 = vmatpush.msra.mxu0 %v350_v4  ;;  %v396_v13 = vld [vmem:[#allocation8 + $0x8] sm:$0xff]  ;;  %v395_v15 = vld [vmem:[#allocation8] sm:$0xff]  ;;  %v343_v17 = vld [vmem:[%s3199_s26 + $0x10] sm:$0xff]  ;;  %s3023_s11 = smov 8   ;;  %s3024_s10 = smov 40   ;;  %vm1285_vm5 = vcmask 261312  }
  0x3f   : > { %413 = vmatpush.msra.mxu1 %v400_v5  ;;  %2473 = vmatpush.msra.mxu2 %v400_v5  ;;  %v341_v16 = vld [vmem:[%s3199_s26] sm:$0xff]  ;;  %v439_v18 = vld [vmem:[#allocation9 + $0x38] sm:$0xff]  ;;  %v438_v19 = vld [vmem:[#allocation9 + $0x30] sm:$0xff]  ;;  %s3025_s16 = smov 24   ;;  %vm1498_vm6 = vcmask 326912   ;;  %vm1711_vm7 = vcmask 392512  }
  0x40   : > { %377 = vmatpush.msra.mxu0 %v349_v6  ;;  %v437_v20 = vld [vmem:[#allocation9 + $0x28] sm:$0xff]  ;;  %v436_v22 = vld [vmem:[#allocation9 + $0x20] sm:$0xff]  ;;  %v344_v23 = vld [vmem:[%s3199_s26 + $0x18] sm:$0xff]  ;;  %vm1924_vm8 = vcmask 458112   ;;  %vm2137_vm9 = vcmask 523712  }
  0x41   : > { %414 = vmatpush.msra.mxu1 %v399_v7  ;;  %2474 = vmatpush.msra.mxu2 %v399_v7  ;;  %v342_v21 = vld [vmem:[%s3199_s26 + $0x8] sm:$0xff]  ;;  %v435_v24 = vld [vmem:[#allocation9 + $0x18] sm:$0xff]  ;;  %v434_v25 = vld [vmem:[#allocation9 + $0x10] sm:$0xff]  ;;  %s3026_s26 = smov 56  }
  0x42   : > { %378 = vmatpush.msra.mxu0 %v348_v8  ;;  %v433_v26 = vld [vmem:[#allocation9 + $0x8] sm:$0xff]  ;;  %v432_v27 = vld [vmem:[#allocation9] sm:$0xff] }
  0x43   : > { %415 = vmatpush.msra.mxu1 %v398_v9  ;;  %2475 = vmatpush.msra.mxu2 %v398_v9 }
  0x44   : > { %379 = vmatpush.msra.mxu0 %v347_v10 }
  0x45   : > { %416 = vmatpush.msra.mxu1 %v397_v11  ;;  %2476 = vmatpush.msra.mxu2 %v397_v11 }
  0x46   : > { %380 = vmatpush.msra.mxu0 %v346_v12 }
  0x47   : > { %417 = vmatpush.msra.mxu1 %v396_v13  ;;  %2477 = vmatpush.msra.mxu2 %v396_v13 }
  0x48   : > { %381 = vmatpush.msra.mxu0 %v345_v14 }
  0x49   : > { %418 = vmatpush.msra.mxu1 %v395_v15  ;;  %2349 = vmatmul.msk.f32.vlgmr.msra.gmra.mxu0 %vm353_vm0, %v341_v16 }
  0x4a   : > { %2353 = vmatmul.msk.f32.vlgmr.msra.gmra.mxu1 %vm353_vm0, %v341_v16  ;;  %2478 = vmatpush.msra.mxu2 %v395_v15 }
  0x4b   : > { %2355 = vmatmul.msk.f32.vlgmr.msra.gmra.mxu2 %vm353_vm0, %v343_v17 }
  0x4c   : > { %448 = vmatpush.msrb.mxu2 %v439_v18 }
  0x4e   : > { %449 = vmatpush.msrb.mxu2 %v438_v19 }
  0x50   : > { %450 = vmatpush.msrb.mxu2 %v437_v20 }
  0x51   : > { %2350 = vmatmul.msk.f32.gmra.mxu0 %vm353_vm0, %v342_v21 }
  0x52   : > { %2354 = vmatmul.msk.f32.gmra.mxu1 %vm353_vm0, %v342_v21  ;;  %451 = vmatpush.msrb.mxu2 %v436_v22 }
  0x53   : > { %2356 = vmatmul.msk.f32.gmra.mxu2 %vm353_vm0, %v344_v23 }
  0x54   : > { %452 = vmatpush.msrb.mxu2 %v435_v24 }
  0x56   : > { %453 = vmatpush.msrb.mxu2 %v434_v25 }
  0x58   : > { %454 = vmatpush.msrb.mxu2 %v433_v26 }
  0x59   : > { %2351 = vmatmul.msk.f32.gmra.mxu0 %vm353_vm0, %v343_v17 }
  0x5a   : > { %455 = vmatpush.msrb.mxu2 %v432_v27 }
  0x5b   : > { %2357 = vmatmul.msk.f32.vlgmr.msrb.gmra.mxu2 %vm353_vm0, %v341_v16 }
  0x61   : > { %2352 = vmatmul.msk.f32.gmra.mxu0 %vm353_vm0, %v344_v23 }
  0x63   : > { %2358 = vmatmul.msk.f32.gmra.mxu2 %vm353_vm0, %v342_v21 }
  0x6b   : > { %2359 = vmatmul.msk.f32.gmra.mxu2 %vm353_vm0, %v343_v17 }
  0x73   : > { %2360 = vmatmul.msk.f32.gmra.mxu2 %vm353_vm0, %v344_v23 }
  0xc6   : > { %v3229_v28 = vpop.f32.mrf.mxu0 }
  0xc7   : > { %v3231_v29 = vpop.f32.mrf.mxu1  ;;  %1077 = vrot.lane.b32.xlu2 %v3229_v28, %s3015_s8  ;;  %647 = vrot.lane.b32.xlu1 %v3229_v28, %s3014_s27 }
  0xc8   : > { %651 = vrot.lane.b32.xlu0 %v3231_v29, %s3014_s27 }
  0xce   : > { %v3241_v31 = vpop.f32.mrf.mxu2  ;;  %v3267_v33 = vpop.f32.mrf.mxu0 }
  0xcf   : > { %v3239_v30 = vpop.f32.mrf.mxu1  ;;  %1294 = vrot.lane.b32.xlu2 %v3231_v29, %s3016_s12  ;;  %868 = vrot.lane.b32.xlu1 %v3231_v29, %s3017_s13 }
  0xd0   : > { %2361 = vmatpush.xpose.msk.msra.mxu3 %vm469_vm1, %v3239_v30  ;;  %864 = vrot.lane.b32.xlu0 %v3229_v28, %s3017_s13 }
  0xd4   : > { %2362 = vmatpush.xpose.msk.msra.mxu3 %vm469_vm1, %v3231_v29 }
  0xd6   : > { %v3255_v32 = vpop.f32.mrf.mxu2  ;;  %v3277_v34 = vpop.f32.mrf.mxu0 }
  0xd7   : > { %2363 = vmatmul.msk.f32.vlgmr.msra.gmra.mxu3 %vm469_vm1, %v3229_v28  ;;  %907 = vrot.lane.b32.xlu2 %v3241_v31, %s3017_s13 }
  0xd8   : > { %2365 = vmatpush.xpose.msk.msrb.mxu3 %vm469_vm1, %v3255_v32  ;;  %1081 = vrot.lane.b32.xlu0 %v3231_v29, %s3015_s8 }
  0xd9   : > { %1290 = vrot.lane.b32.xlu1 %v3229_v28, %s3016_s12 }
  0xdc   : > { %2366 = vmatpush.xpose.msk.msrb.mxu3 %vm469_vm1, %v3241_v31 }
  0xde   : > { %v3293_v35 = vpop.f32.mrf.mxu0  ;;  %v457_v36 = vpop.f32.mrf.mxu2 }
  0xdf   : > { %2364 = vmatmul.msk.f32.gmra.mxu3 %vm469_vm1, %v3267_v33  ;;  %870 = vrot.lane.b32.xlu2 %v3239_v30, %s3017_s13 }
  0xe0   : > { %690 = vrot.lane.b32.xlu0 %v3241_v31, %s3014_s27 }
  0xe1   : > { %1120 = vrot.lane.b32.xlu1 %v3241_v31, %s3015_s8 }
  0xe6   : > { %v460_v38 = vpop.f32.mrf.mxu2 }
  0xe7   : > { %2367 = vmatmul.msk.f32.vlgmr.msrb.gmra.mxu3 %vm469_vm1, %v3277_v34  ;;  %866 = vrot.lane.b32.xlu2 %v3267_v33, %s3017_s13  ;;  %v3388_v59 = vpack.i.bf16 %v457_v36, %v460_v38 }
  0xe8   : > { %653 = vrot.lane.b32.xlu0 %v3239_v30, %s3014_s27  ;;  %597 = vmatpush.msra.mxu3 %v460_v38 }
  0xe9   : > { %1507 = vrot.lane.b32.xlu1 %v3231_v29, %s3018_s18 }
  0xea   : > { %598 = vmatpush.msra.mxu3 %v457_v36 }
  0xee   : > { %v463_v40 = vpop.f32.mrf.mxu2 }
  0xef   : > { %1509 = vrot.lane.b32.xlu2 %v3239_v30, %s3018_s18  ;;  %2368 = vmatmul.msk.f32.gmra.mxu3 %vm469_vm1, %v3293_v35 }
  0xf0   : > { %1333 = vrot.lane.b32.xlu0 %v3241_v31, %s3016_s12 }
  0xf1   : > { %649 = vrot.lane.b32.xlu1 %v3267_v33, %s3014_s27 }
  0xf6   : > { %v466_v42 = vpop.f32.mrf.mxu2 }
  0xf7   : > { %692 = vrot.lane.b32.xlu2 %v3255_v32, %s3014_s27  ;;  %626 = vmatpush.msrb.mxu0 %v466_v42  ;;  %v3378_v55 = vpack.i.bf16 %v463_v40, %v466_v42 }
  0xf8   : > { %1296 = vrot.lane.b32.xlu0 %v3239_v30, %s3016_s12 }
  0xf9   : > { %1083 = vrot.lane.b32.xlu1 %v3239_v30, %s3015_s8  ;;  %627 = vmatpush.msrb.mxu0 %v463_v40 }
  0xff   : > { %1122 = vrot.lane.b32.xlu2 %v3255_v32, %s3015_s8 }
 0x100   : > { %1292 = vrot.lane.b32.xlu0 %v3267_v33, %s3016_s12 }
 0x101   : > { %1079 = vrot.lane.b32.xlu1 %v3267_v33, %s3015_s8 }
 0x107   : > { %686 = vrot.lane.b32.xlu2 %v3277_v34, %s3014_s27 }
 0x108   : > { %909 = vrot.lane.b32.xlu0 %v3255_v32, %s3017_s13 }
 0x109   : > { %1335 = vrot.lane.b32.xlu1 %v3255_v32, %s3016_s12 }
 0x10f   : > { %1329 = vrot.lane.b32.xlu2 %v3277_v34, %s3016_s12 }
 0x110   : > { %1116 = vrot.lane.b32.xlu0 %v3277_v34, %s3015_s8 }
 0x111   : > { %903 = vrot.lane.b32.xlu1 %v3277_v34, %s3017_s13 }
 0x117   : > { %1505 = vrot.lane.b32.xlu2 %v3267_v33, %s3018_s18 }
 0x118   : > { %905 = vrot.lane.b32.xlu0 %v3293_v35, %s3017_s13 }
 0x119   : > { %688 = vrot.lane.b32.xlu1 %v3293_v35, %s3014_s27 }
 0x11f   : > { %1546 = vrot.lane.b32.xlu2 %v3241_v31, %s3018_s18 }
 0x120   : > { %1503 = vrot.lane.b32.xlu0 %v3229_v28, %s3018_s18 }
 0x121   : > { %1722 = vrot.lane.b32.xlu1 %v3239_v30, %s3019_s17  ;;  %v3333_v37 = vpop.permute.xlu2 %1077 }
 0x127   : > { %1716 = vrot.lane.b32.xlu2 %v3229_v28, %s3019_s17 }
 0x128   : > { %1548 = vrot.lane.b32.xlu0 %v3255_v32, %s3018_s18 }
 0x129   : > { %1542 = vrot.lane.b32.xlu1 %v3277_v34, %s3018_s18  ;;  %v3341_v39 = vpop.permute.xlu2 %1294 }
 0x12f   : > { %1761 = vrot.lane.b32.xlu2 %v3255_v32, %s3019_s17 }
 0x130   : > { %1720 = vrot.lane.b32.xlu0 %v3231_v29, %s3019_s17 }
 0x131   : > { %1718 = vrot.lane.b32.xlu1 %v3267_v33, %s3019_s17  ;;  %v3349_v41 = vpop.permute.xlu2 %907 }
 0x137   : > { %1933 = vrot.lane.b32.xlu2 %v3231_v29, %s3020_s30 }
 0x138   : > { %1935 = vrot.lane.b32.xlu0 %v3239_v30, %s3020_s30 }
 0x139   : > { %1759 = vrot.lane.b32.xlu1 %v3241_v31, %s3019_s17  ;;  %v871_v44 = vpop.permute.xlu2 %870  ;;  %v648_v45 = vpop.permute.xlu1 %647 }
 0x13a   : > { %v652_v43 = vpop.permute.xlu0 %651 }
 0x13f   : > { %1118 = vrot.lane.b32.xlu2 %v3293_v35, %s3015_s8 }
 0x140   : > { %1755 = vrot.lane.b32.xlu0 %v3277_v34, %s3019_s17 }
 0x141   : > { %1929 = vrot.lane.b32.xlu1 %v3229_v28, %s3020_s30  ;;  %v867_v46 = vpop.permute.xlu2 %866  ;;  %v869_v48 = vpop.permute.xlu1 %868 }
 0x142   : > { %v865_v47 = vpop.permute.xlu0 %864 }
 0x147   : > { %1972 = vrot.lane.b32.xlu2 %v3241_v31, %s3020_s30 }
 0x148   : > { %1544 = vrot.lane.b32.xlu0 %v3293_v35, %s3018_s18 }
 0x149   : > { %1331 = vrot.lane.b32.xlu1 %v3293_v35, %s3016_s12  ;;  %v1510_v49 = vpop.permute.xlu2 %1509 }
 0x14a   : > { %v1082_v50 = vpop.permute.xlu0 %1081 }
 0x14b   : > { %v3369_v51 = vpop.permute.xlu1 %1290 }
 0x14f   : > { %1757 = vrot.lane.b32.xlu2 %v3293_v35, %s3019_s17 }
 0x150   : > { %1931 = vrot.lane.b32.xlu0 %v3267_v33, %s3020_s30 }
 0x151   : > { %1974 = vrot.lane.b32.xlu1 %v3255_v32, %s3020_s30  ;;  %v693_v52 = vpop.permute.xlu2 %692 }
 0x152   : > { %v691_v53 = vpop.permute.xlu0 %690  ;;  %2377 = vmatpush.xpose.msk.msra.mxu2 %vm469_vm1, %v693_v52 }
 0x153   : > { %v1121_v54 = vpop.permute.xlu1 %1120 }
 0x156   : > { %2378 = vmatpush.xpose.msk.msra.mxu2 %vm469_vm1, %v691_v53 }
 0x157   : > { %2604 = vrot.lane.b32.xlu2 %v3378_v55, %s3014_s27 }
 0x158   : > { %1968 = vrot.lane.b32.xlu0 %v3277_v34, %s3020_s30 }
 0x159   : > { %1970 = vrot.lane.b32.xlu1 %v3293_v35, %s3020_s30  ;;  %v1123_v56 = vpop.permute.xlu2 %1122 }
 0x15a   : > { %v654_v57 = vpop.permute.xlu0 %653  ;;  %v3436_v14 = vpop.f32.mrf.mxu3 }
 0x15b   : > { %v1508_v58 = vpop.permute.xlu1 %1507  ;;  %2373 = vmatpush.xpose.msk.msrb.mxu1 %vm469_vm1, %v654_v57  ;;  %v541_v15 = vsel %vm540_vm2, %v3436_v14, -inf }
 0x15f   : > { %2374 = vmatpush.xpose.msk.msrb.mxu1 %vm469_vm1, %v652_v43  ;;  %2609 = vrot.lane.b32.xlu2 %v3378_v55, %s3017_s13 }
 0x160   : > { %2584 = vrot.lane.b32.xlu0 %v3388_v59, %s3014_s27  ;;  %s3027_s27 = smov 48  }
 0x161   : > { %2589 = vrot.lane.b32.xlu1 %v3388_v59, %s3017_s13  ;;  %v687_v60 = vpop.permute.xlu2 %686  ;;  %s338_s13 = scalar_lea.vmem [#allocation12], %s2343_s15  ;;  %s2204_s15 = scalar_lea.sflag [#allocation5], %s3193_s29 }
 0x162   : > { %v1334_v61 = vpop.permute.xlu0 %1333  ;;  %2375 = vmatmul.msk.f32.vlgmr.msrb.gmra.mxu1 %vm469_vm1, %v648_v45  ;;  %2379 = vmatmul.msk.f32.vlgmr.msra.gmra.mxu2 %vm469_vm1, %v687_v60  ;;  %v3445_v19 = vpop.f32.mrf.mxu3 }
 0x163   : > { %2385 = vmatpush.xpose.msk.msra.mxu1 %vm469_vm1, %v871_v44  ;;  %v650_v62 = vpop.permute.xlu1 %649  ;;  %v544_v21 = vsel %vm540_vm2, %v3445_v19, -inf }
 0x167   : > { %2386 = vmatpush.xpose.msk.msra.mxu1 %vm469_vm1, %v869_v48  ;;  %2619 = vrot.lane.b32.xlu2 %v3388_v59, %s3018_s18 }
 0x168   : > { %2594 = vrot.lane.b32.xlu0 %v3388_v59, %s3015_s8 }
 0x169   : > { %2599 = vrot.lane.b32.xlu1 %v3388_v59, %s3016_s12  ;;  %v3407_v63 = vpop.permute.xlu2 %1329 }
 0x16a   : > { %v1297_v0 = vpop.permute.xlu0 %1296  ;;  %2376 = vmatmul.msk.f32.gmra.mxu1 %vm469_vm1, %v650_v62  ;;  %v3452_v24 = vpop.f32.mrf.mxu3 }
 0x16b   : > { %v1084_v1 = vpop.permute.xlu1 %1083  ;;  %v547_v43 = vsel %vm540_vm2, %v3452_v24, -inf }
 0x16c   : > { %2397 = vmatpush.xpose.msk.msrb.mxu1 %vm469_vm1, %v1084_v1 }
 0x170   : > { %2398 = vmatpush.xpose.msk.msrb.mxu1 %vm469_vm1, %v1082_v50  ;;  %2614 = vrot.lane.b32.xlu0 %v3378_v55, %s3015_s8  ;;  %s2952_s8 = scalar_lea.hbm %s3948_s6, 64 }
 0x171   : > { %2624 = vrot.lane.b32.xlu1 %v3378_v55, %s3016_s12  ;;  %v1506_v2 = vpop.permute.xlu2 %1505 }
 0x172   : > { %v1293_v3 = vpop.permute.xlu0 %1292  ;;  %2387 = vmatmul.msk.f32.vlgmr.msra.gmra.mxu1 %vm469_vm1, %v865_v47  ;;  %v3458_v28 = vpop.f32.mrf.mxu3 }
 0x173   : > { %v1080_v4 = vpop.permute.xlu1 %1079  ;;  %v550_v32 = vsel %vm540_vm2, %v3458_v28, -inf }
 0x174   : > { %2409 = vmatpush.xpose.msk.msra.mxu1 %vm469_vm1, %v1297_v0 }
 0x178   : > { %2410 = vmatpush.xpose.msk.msra.mxu1 %vm469_vm1, %v3341_v39 }
 0x179   : > { %2629 = vrot.lane.b32.xlu1 %v3388_v59, %s3019_s17  ;;  %v1547_v5 = vpop.permute.xlu2 %1546 }
 0x17a   : > { %v910_v6 = vpop.permute.xlu0 %909  ;;  %2388 = vmatmul.msk.f32.gmra.mxu1 %vm469_vm1, %v867_v46 }
 0x17b   : > { %v1336_v7 = vpop.permute.xlu1 %1335  ;;  %2389 = vmatpush.xpose.msk.msrb.mxu2 %vm469_vm1, %v910_v6 }
 0x17f   : > { %2390 = vmatpush.xpose.msk.msrb.mxu2 %vm469_vm1, %v3349_v41 }
 0x181   : > { %2634 = vrot.lane.b32.xlu1 %v3378_v55, %s3018_s18  ;;  %v1717_v8 = vpop.permute.xlu2 %1716  ;;  %s2470_s18 = sshll.u32 %s3085_s25, 5 }
 0x182   : > { %2399 = vmatmul.msk.f32.vlgmr.msrb.gmra.mxu1 %vm469_vm1, %v3333_v37  ;;  %v1117_v9 = vpop.permute.xlu0 %1116 }
 0x183   : > { %2401 = vmatpush.xpose.msk.msra.mxu2 %vm469_vm1, %v1123_v56  ;;  %v904_v10 = vpop.permute.xlu1 %903  ;;  %2421 = vmatpush.xpose.msk.msrb.mxu1 %vm469_vm1, %v1510_v49 }
 0x187   : > { %2402 = vmatpush.xpose.msk.msra.mxu2 %vm469_vm1, %v1121_v54  ;;  %2422 = vmatpush.xpose.msk.msrb.mxu1 %vm469_vm1, %v1508_v58 }
 0x189   : > { %v1762_v11 = vpop.permute.xlu2 %1761 }
 0x18a   : > { %2400 = vmatmul.msk.f32.gmra.mxu1 %vm469_vm1, %v1080_v4  ;;  %v906_v12 = vpop.permute.xlu0 %905 }
 0x18b   : > { %v689_v13 = vpop.permute.xlu1 %688 }
 0x18c   : > { %2380 = vmatmul.msk.f32.gmra.mxu2 %vm469_vm1, %v689_v13 }
 0x190   : > { %542 = vmax.xlane.f32.xlu2 %v541_v15 }
 0x191   : > { %v1934_v16 = vpop.permute.xlu2 %1933 }
 0x192   : > { %2411 = vmatmul.msk.f32.vlgmr.msra.gmra.mxu1 %vm469_vm1, %v3369_v51  ;;  %v1504_v17 = vpop.permute.xlu0 %1503 }
 0x193   : > { %v1723_v18 = vpop.permute.xlu1 %1722 }
 0x194   : > { %2391 = vmatmul.msk.f32.vlgmr.msrb.gmra.mxu2 %vm469_vm1, %v904_v10  ;;  %2433 = vmatpush.xpose.msk.msra.mxu1 %vm469_vm1, %v1723_v18 }
 0x195   : > { %2413 = vmatpush.xpose.msk.msrb.mxu2 %vm469_vm1, %v1336_v7 }
 0x199   : > { %2414 = vmatpush.xpose.msk.msrb.mxu2 %vm469_vm1, %v1334_v61  ;;  %v1119_v20 = vpop.permute.xlu2 %1118 }
 0x19a   : > { %2412 = vmatmul.msk.f32.gmra.mxu1 %vm469_vm1, %v1293_v3  ;;  %545 = vmax.xlane.f32.xlu0 %v544_v21  ;;  %v1549_v22 = vpop.permute.xlu0 %1548 }
 0x19b   : > { %v1543_v23 = vpop.permute.xlu1 %1542 }
 0x19c   : > { %2392 = vmatmul.msk.f32.gmra.mxu2 %vm469_vm1, %v906_v12 }
 0x1a1   : > { %v1973_v25 = vpop.permute.xlu2 %1972 }
 0x1a2   : > { %2423 = vmatmul.msk.f32.vlgmr.msrb.gmra.mxu1 %vm469_vm1, %v1504_v17  ;;  %v1721_v26 = vpop.permute.xlu0 %1720 }
 0x1a3   : > { %v1719_v27 = vpop.permute.xlu1 %1718  ;;  %2434 = vmatpush.xpose.msk.msra.mxu1 %vm469_vm1, %v1721_v26 }
 0x1a4   : > { %2403 = vmatmul.msk.f32.vlgmr.msra.gmra.mxu2 %vm469_vm1, %v1117_v9 }
 0x1a5   : > { %2425 = vmatpush.xpose.msk.msra.mxu2 %vm469_vm1, %v1549_v22 }
 0x1a8   : > { %2639 = vrot.lane.b32.xlu2 %v3388_v59, %s3020_s30 }
 0x1a9   : > { %2426 = vmatpush.xpose.msk.msra.mxu2 %vm469_vm1, %v1547_v5  ;;  %v1758_v29 = vpop.permute.xlu2 %1757 }
 0x1aa   : > { %2424 = vmatmul.msk.f32.gmra.mxu1 %vm469_vm1, %v1506_v2  ;;  %v1936_v30 = vpop.permute.xlu0 %1935 }
 0x1ab   : > { %v1760_v31 = vpop.permute.xlu1 %1759  ;;  %551 = vmax.xlane.f32.xlu1 %v550_v32  ;;  %2445 = vmatpush.xpose.msk.msrb.mxu1 %vm469_vm1, %v1936_v30 }
 0x1ac   : > { %2404 = vmatmul.msk.f32.gmra.mxu2 %vm469_vm1, %v1119_v20 }
 0x1af   : > { %2446 = vmatpush.xpose.msk.msrb.mxu1 %vm469_vm1, %v1934_v16 }
 0x1b1   : > { %v2605_v33 = vpop.permute.xlu2 %2604 }
 0x1b2   : > { %v1756_v34 = vpop.permute.xlu0 %1755  ;;  %2435 = vmatmul.msk.f32.vlgmr.msra.gmra.mxu1 %vm469_vm1, %v1717_v8  ;;  %v2607_v36 = vunpack.i.h.bf16 %v2605_v33  ;;  %v2606_v37 = vunpack.i.l.bf16 %v2605_v33 }
 0x1b3   : > { %v1930_v35 = vpop.permute.xlu1 %1929 }
 0x1b4   : > { %2415 = vmatmul.msk.f32.vlgmr.msrb.gmra.mxu2 %vm469_vm1, %v3407_v63  ;;  %826 = vmatpush.msra.mxu0 %v2606_v37 }
 0x1b5   : > { %2437 = vmatpush.xpose.msk.msrb.mxu2 %vm469_vm1, %v1762_v11 }
 0x1b6   : > { %827 = vmatpush.msra.mxu0 %v2607_v36 }
 0x1b9   : > { %2438 = vmatpush.xpose.msk.msrb.mxu2 %vm469_vm1, %v1760_v31  ;;  %v3504_v57 = vpop.permute.xlu2 %2609 }
 0x1ba   : > { %v1545_v38 = vpop.permute.xlu0 %1544  ;;  %2436 = vmatmul.msk.f32.gmra.mxu1 %vm469_vm1, %v1719_v27 }
 0x1bb   : > { %v1332_v39 = vpop.permute.xlu1 %1331 }
 0x1bc   : > { %2416 = vmatmul.msk.f32.gmra.mxu2 %vm469_vm1, %v1332_v39 }
 0x1c1   : > { %v3510_v60 = vpop.permute.xlu2 %2619 }
 0x1c2   : > { %v1932_v40 = vpop.permute.xlu0 %1931  ;;  %2447 = vmatmul.msk.f32.vlgmr.msrb.gmra.mxu1 %vm469_vm1, %v1930_v35 }
 0x1c3   : > { %v1975_v41 = vpop.permute.xlu1 %1974 }
 0x1c4   : > { %2427 = vmatmul.msk.f32.vlgmr.msra.gmra.mxu2 %vm469_vm1, %v1543_v23 }
 0x1c5   : > { %2449 = vmatpush.xpose.msk.msra.mxu2 %vm469_vm1, %v1975_v41 }
 0x1c9   : > { %2450 = vmatpush.xpose.msk.msra.mxu2 %vm469_vm1, %v1973_v25 }
 0x1ca   : > { %v1969_v42 = vpop.permute.xlu0 %1968  ;;  %2448 = vmatmul.msk.f32.gmra.mxu1 %vm469_vm1, %v1932_v40 }
 0x1cb   : > { %v1971_v53 = vpop.permute.xlu1 %1970 }
 0x1cc   : > { %2428 = vmatmul.msk.f32.gmra.mxu2 %vm469_vm1, %v1545_v38 }
 0x1d1   : > { %548 = vmax.xlane.f32.xlu2 %v547_v43 }
 0x1d2   : > { %v2585_v44 = vpop.permute.xlu0 %2584 }
 0x1d3   : > { %v2587_v45 = vunpack.i.h.bf16 %v2585_v44  ;;  %v2586_v46 = vunpack.i.l.bf16 %v2585_v44  ;;  %v2590_v5 = vpop.permute.xlu1 %2589 }
 0x1d4   : > { %2439 = vmatmul.msk.f32.vlgmr.msrb.gmra.mxu2 %vm469_vm1, %v1756_v34  ;;  %v2591_v8 = vunpack.i.l.bf16 %v2590_v5  ;;  %v2592_v12 = vunpack.i.h.bf16 %v2590_v5  ;;  %v2612_v5 = vunpack.i.h.bf16 %v3504_v57 }
 0x1d5   : > { %789 = vmatpush.msrb.mxu3 %v2586_v46 }
 0x1d7   : > { %790 = vmatpush.msrb.mxu3 %v2587_v45 }
 0x1da   : > { %v3512_v61 = vpop.permute.xlu0 %2594 }
 0x1db   : > { %v3549_v23 = vpop.permute.xlu1 %2599 }
 0x1dc   : > { %2440 = vmatmul.msk.f32.gmra.mxu2 %vm469_vm1, %v1758_v29 }
 0x1df   : > { %v3486_v47 = vpop.f32.mrf.mxu1 }
 0x1e0   : > { %v725_v48 = vsel %vm540_vm2, %v3486_v47, -inf }
 0x1e1   : > { %726 = vmax.xlane.f32.xlu1 %v725_v48 }
 0x1e2   : > { %v3518_v1 = vpop.permute.xlu0 %2614 }
 0x1e3   : > { %v3557_v29 = vpop.permute.xlu1 %2624 }
 0x1e4   : > { %2451 = vmatmul.msk.f32.vlgmr.msra.gmra.mxu2 %vm469_vm1, %v1969_v42 }
 0x1e5   : > { %v3491_v49 = vpop.f32.mrf.mxu2 }
 0x1e6   : > { %v731_v50 = vsel %vm540_vm2, %v3491_v49, -inf }
 0x1e7   : > { %v3495_v51 = vpop.f32.mrf.mxu1 }
 0x1e8   : > { %v728_v52 = vsel %vm540_vm2, %v3495_v51, -inf }
 0x1e9   : > { %729 = vmax.xlane.f32.xlu2 %v728_v52  ;;  %732 = vmax.xlane.f32.xlu1 %v731_v50 }
 0x1eb   : > { %v3569_v35 = vpop.permute.xlu1 %2629 }
 0x1ec   : > { %2452 = vmatmul.msk.f32.gmra.mxu2 %vm469_vm1, %v1971_v53 }
 0x1ef   : > { %v3500_v54 = vpop.f32.mrf.mxu1 }
 0x1f0   : > { %v942_v56 = vsel %vm540_vm2, %v3500_v54, -inf }
 0x1f1   : > { %943 = vmax.xlane.f32.xlu2 %v942_v56 }
 0x1f3   : > { %v3583_v42 = vpop.permute.xlu1 %2634 }
 0x1f7   : > { %v3506_v58 = vpop.f32.mrf.mxu1 }
 0x1f8   : > { %v945_v59 = vsel %vm540_vm2, %v3506_v58, -inf }
 0x1f9   : > { %946 = vmax.xlane.f32.xlu2 %v945_v59 }
 0x1ff   : > { %v3514_v62 = vpop.f32.mrf.mxu1 }
 0x200   : > { %v1155_v63 = vsel %vm540_vm2, %v3514_v62, -inf }
 0x201   : > { %1156 = vmax.xlane.f32.xlu1 %v1155_v63 }
 0x203   : > { %v543_v0 = vpop.xlane.xlu2 %542 }
 0x204   : > { %v553_v2 = vsub.f32 %v3436_v14, %v543_v0 }
 0x206   : > { %v557_v3 = vmul.f32 1.442695, %v553_v2 }
 0x207   : > { %v3521_v4 = vpop.f32.mrf.mxu1 }
 0x208   : > { %2654 = vpow2.f32 %v557_v3  ;;  %v1158_v17 = vsel %vm540_vm2, %v3521_v4, -inf }
 0x20b   : > { %v3577_v39 = vpop.permute.xlu2 %2639 }
 0x20d   : > { %v546_v6 = vpop.xlane.xlu0 %545 }
 0x20e   : > { %v2655_v7 = vpop.eup %2654  ;;  %v554_v9 = vsub.f32 %v3445_v19, %v546_v6 }
 0x20f   : > { %v3524_v10 = vpop.f32.mrf.mxu2  ;;  %2369 = vmatmul.msk.f32.vlgmr.msra.gmra.mxu3 %vm540_vm2, %v2655_v7  ;;  %v3529_v14 = vpop.f32.mrf.mxu1  ;;  %v565_v53 = vsel %vm540_vm2, %v2655_v7, 0.0 }
 0x210   : > { %v734_v11 = vsel %vm540_vm2, %v3524_v10, -inf  ;;  %v559_v13 = vmul.f32 1.442695, %v554_v9  ;;  %1004 = vmatpush.msra.mxu3 %v2591_v8  ;;  %v1368_v21 = vsel %vm540_vm2, %v3529_v14, -inf }
 0x211   : > { %735 = vmax.xlane.f32.xlu0 %v734_v11 }
 0x212   : > { %2656 = vpow2.f32 %v559_v13  ;;  %1005 = vmatpush.msra.mxu3 %v2592_v12 }
 0x217   : > { %v3531_v15 = vpop.f32.mrf.mxu2  ;;  %v3541_v19 = vpop.f32.mrf.mxu1 }
 0x218   : > { %v948_v16 = vsel %vm540_vm2, %v3531_v15, -inf  ;;  %v3537_v18 = vpop.eup %2656  ;;  %v1371_v32 = vsel %vm540_vm2, %v3541_v19, -inf }
 0x219   : > { %949 = vmax.xlane.f32.xlu2 %v948_v16  ;;  %1159 = vmax.xlane.f32.xlu0 %v1158_v17 }
 0x21a   : > { %2370 = vmatmul.msk.f32.gmra.mxu3 %vm540_vm2, %v3537_v18 }
 0x21e   : > { %v552_v50 = vpop.xlane.xlu1 %551 }
 0x21f   : > { %v3543_v20 = vpop.f32.mrf.mxu2  ;;  %v3555_v27 = vpop.f32.mrf.mxu1  ;;  %v556_v59 = vsub.f32 %v3458_v28, %v552_v50 }
 0x220   : > { %v951_v22 = vsel %vm540_vm2, %v3543_v20, -inf  ;;  %v1581_v38 = vsel %vm540_vm2, %v3555_v27, -inf }
 0x221   : > { %1369 = vmax.xlane.f32.xlu0 %v1368_v21  ;;  %952 = vmax.xlane.f32.xlu1 %v951_v22  ;;  %v563_v63 = vmul.f32 1.442695, %v556_v59 }
 0x227   : > { %v3551_v25 = vpop.f32.mrf.mxu2  ;;  %v3565_v33 = vpop.f32.mrf.mxu1 }
 0x228   : > { %v1161_v26 = vsel %vm540_vm2, %v3551_v25, -inf  ;;  %v1584_v36 = vsel %vm540_vm2, %v3565_v33, -inf }
 0x229   : > { %1162 = vmax.xlane.f32.xlu1 %v1161_v26 }
 0x22f   : > { %v3559_v30 = vpop.f32.mrf.mxu2  ;;  %v3579_v40 = vpop.f32.mrf.mxu1 }
 0x230   : > { %v1164_v31 = vsel %vm540_vm2, %v3559_v30, -inf  ;;  %v1794_v43 = vsel %vm540_vm2, %v3579_v40, -inf }
 0x231   : > { %1165 = vmax.xlane.f32.xlu2 %v1164_v31  ;;  %1372 = vmax.xlane.f32.xlu1 %v1371_v32  ;;  %v2596_v31 = vunpack.i.l.bf16 %v3512_v61 }
 0x237   : > { %v3567_v34 = vpop.f32.mrf.mxu2  ;;  %v3606_v6 = vpop.f32.mrf.mxu1 }
 0x238   : > { %v1374_v37 = vsel %vm540_vm2, %v3567_v34, -inf  ;;  %v1797_v11 = vsel %vm540_vm2, %v3606_v6, -inf }
 0x239   : > { %1585 = vmax.xlane.f32.xlu2 %v1584_v36  ;;  %1375 = vmax.xlane.f32.xlu0 %v1374_v37 }
 0x23a   : > { %1582 = vmax.xlane.f32.xlu1 %v1581_v38  ;;  %v2597_v38 = vunpack.i.h.bf16 %v3512_v61  ;;  %v2616_v61 = vunpack.i.l.bf16 %v3518_v1 }
 0x23f   : > { %v3581_v41 = vpop.f32.mrf.mxu2 }
 0x240   : > { %v1377_v44 = vsel %vm540_vm2, %v3581_v41, -inf }
 0x241   : > { %1795 = vmax.xlane.f32.xlu2 %v1794_v43 }
 0x242   : > { %1378 = vmax.xlane.f32.xlu1 %v1377_v44 }
 0x244   : > { %v549_v45 = vpop.xlane.xlu2 %548 }
 0x245   : > { %v555_v46 = vsub.f32 %v3452_v24, %v549_v45  ;;  %v2611_v24 = vunpack.i.l.bf16 %v3504_v57  ;;  %v3619_v57 = vpop.f32.mrf.mxu1 }
 0x246   : > { %v2007_v37 = vsel %vm540_vm2, %v3619_v57, -inf }
 0x247   : > { %v3590_v48 = vpop.f32.mrf.mxu2  ;;  %v561_v52 = vmul.f32 1.442695, %v555_v46 }
 0x248   : > { %v1587_v56 = vsel %vm540_vm2, %v3590_v48, -inf }
 0x249   : > { %566 = vadd.xlane.f32.xlu2 %v565_v53  ;;  %1588 = vmax.xlane.f32.xlu0 %v1587_v56  ;;  %2658 = vpow2.f32 %v561_v52 }
 0x24a   : > { %2660 = vpow2.f32 %v563_v63 }
 0x24d   : > { %v3650_v53 = vpop.f32.mrf.mxu1 }
 0x24f   : > { %v3596_v0 = vpop.f32.mrf.mxu2  ;;  %v3598_v2 = vpop.eup %2658 }
 0x250   : > { %v1590_v3 = vsel %vm540_vm2, %v3596_v0, -inf  ;;  %2371 = vmatmul.msk.f32.vlgmr.msrb.gmra.mxu0 %vm540_vm2, %v3598_v2  ;;  %v3615_v13 = vpop.eup %2660 }
 0x251   : > { %1591 = vmax.xlane.f32.xlu0 %v1590_v3  ;;  %1039 = vmatpush.msrb.mxu0 %v2611_v24  ;;  %v2010_v3 = vsel %vm540_vm2, %v3650_v53, -inf }
 0x253   : > { %1040 = vmatpush.msrb.mxu0 %v2612_v5  ;;  %v2601_v5 = vunpack.i.l.bf16 %v3549_v23 }
 0x254   : > { %v727_v28 = vpop.xlane.xlu1 %726 }
 0x255   : > { %v737_v7 = vsub.f32 %v3486_v47, %v727_v28 }
 0x257   : > { %v3609_v8 = vpop.f32.mrf.mxu2  ;;  %v741_v9 = vmul.f32 1.442695, %v737_v7 }
 0x258   : > { %v1800_v12 = vsel %vm540_vm2, %v3609_v8, -inf  ;;  %2372 = vmatmul.msk.f32.gmra.mxu0 %vm540_vm2, %v3615_v13 }
 0x259   : > { %1798 = vmax.xlane.f32.xlu0 %v1797_v11  ;;  %1801 = vmax.xlane.f32.xlu1 %v1800_v12  ;;  %2662 = vpow2.f32 %v741_v9 }
 0x25c   : > { %v730_v47 = vpop.xlane.xlu2 %729  ;;  %v733_v16 = vpop.xlane.xlu1 %732 }
 0x25d   : > { %v738_v17 = vsub.f32 %v3495_v51, %v730_v47  ;;  %v739_v21 = vsub.f32 %v3491_v49, %v733_v16  ;;  %v2621_v16 = vunpack.i.l.bf16 %v3510_v60 }
 0x25f   : > { %v3623_v22 = vpop.f32.mrf.mxu2  ;;  %v3625_v26 = vpop.eup %2662  ;;  %v743_v32 = vmul.f32 1.442695, %v738_v17  ;;  %v745_v36 = vmul.f32 1.442695, %v739_v21  ;;  %v2622_v17 = vunpack.i.h.bf16 %v3510_v60 }
 0x260   : > { %2381 = vmatmul.msk.f32.vlgmr.msrb.gmra.mxu3 %vm540_vm2, %v3625_v26  ;;  %v1803_v46 = vsel %vm540_vm2, %v3623_v22, -inf }
 0x261   : > { %2008 = vmax.xlane.f32.xlu0 %v2007_v37  ;;  %2664 = vpow2.f32 %v743_v32  ;;  %1217 = vmatpush.msrb.mxu3 %v2596_v31 }
 0x262   : > { %2666 = vpow2.f32 %v745_v36 }
 0x263   : > { %1218 = vmatpush.msrb.mxu3 %v2597_v38 }
 0x264   : > { %v944_v49 = vpop.xlane.xlu2 %943 }
 0x265   : > { %v954_v51 = vsub.f32 %v3500_v54, %v944_v49  ;;  %v2617_v54 = vunpack.i.h.bf16 %v3518_v1  ;;  %v2602_v1 = vunpack.i.h.bf16 %v3549_v23 }
 0x267   : > { %v3634_v43 = vpop.f32.mrf.mxu2  ;;  %v3636_v44 = vpop.eup %2664  ;;  %v958_v45 = vmul.f32 1.442695, %v954_v51 }
 0x268   : > { %v2013_v50 = vsel %vm540_vm2, %v3634_v43, -inf  ;;  %v3642_v52 = vpop.eup %2666  ;;  %2382 = vmatmul.msk.f32.gmra.mxu3 %vm540_vm2, %v3636_v44 }
 0x269   : > { %1804 = vmax.xlane.f32.xlu0 %v1803_v46  ;;  %2014 = vmax.xlane.f32.xlu2 %v2013_v50  ;;  %2668 = vpow2.f32 %v958_v45 }
 0x26a   : > { %2383 = vmatmul.msk.f32.vlgmr.msra.gmra.mxu0 %vm540_vm2, %v3642_v52 }
 0x26b   : > { %1252 = vmatpush.msra.mxu0 %v2616_v61 }
 0x26c   : > { %v947_v56 = vpop.xlane.xlu2 %946 }
 0x26d   : > { %1253 = vmatpush.msra.mxu0 %v2617_v54  ;;  %v955_v59 = vsub.f32 %v3506_v58, %v947_v56  ;;  %v2627_v56 = vunpack.i.h.bf16 %v3557_v29 }
 0x26f   : > { %v2669_v63 = vpop.eup %2668  ;;  %v960_v24 = vmul.f32 1.442695, %v955_v59 }
 0x270   : > { %v966_v28 = vsel %vm540_vm2, %v2669_v63, 0.0  ;;  %2393 = vmatmul.msk.f32.vlgmr.msra.gmra.mxu3 %vm540_vm2, %v2669_v63 }
 0x271   : > { %2011 = vmax.xlane.f32.xlu0 %v2010_v3  ;;  %2670 = vpow2.f32 %v960_v24  ;;  %967 = vadd.xlane.f32.xlu2 %v966_v28  ;;  %v749_v28 = vsel %vm540_vm2, %v3625_v26, 0.0  ;;  %v3708_v26 = vpop.f32.mrf.mxu2 }
 0x272   : > { %1430 = vmatpush.msra.mxu3 %v2601_v5  ;;  %2649 = vrot.lane.b32.xlu1 %v3378_v55, %s3020_s30 }
 0x274   : > { %1431 = vmatpush.msra.mxu3 %v2602_v1  ;;  %v1157_v58 = vpop.xlane.xlu1 %1156 }
 0x275   : > { %v1167_v7 = vsub.f32 %v3514_v62, %v1157_v58 }
 0x277   : > { %v2671_v9 = vpop.eup %2670  ;;  %v1171_v11 = vmul.f32 1.442695, %v1167_v7 }
 0x278   : > { %v969_v12 = vsel %vm540_vm2, %v2671_v9, 0.0  ;;  %2394 = vmatmul.msk.f32.gmra.mxu3 %vm540_vm2, %v2671_v9 }
 0x279   : > { %2672 = vpow2.f32 %v1171_v11  ;;  %970 = vadd.xlane.f32.xlu2 %v969_v12 }
 0x27f   : > { %v2673_v47 = vpop.eup %2672 }
 0x280   : > { %v1179_v23 = vsel %vm540_vm2, %v2673_v47, 0.0  ;;  %2405 = vmatmul.msk.f32.vlgmr.msrb.gmra.mxu3 %vm540_vm2, %v2673_v47  ;;  %v2636_v47 = vunpack.i.l.bf16 %v3583_v42 }
 0x281   : > { %1180 = vadd.xlane.f32.xlu2 %v1179_v23  ;;  %1643 = vmatpush.msrb.mxu3 %v2621_v16  ;;  %v2637_v16 = vunpack.i.h.bf16 %v3583_v42  ;;  %v755_v23 = vsel %vm540_vm2, %v3642_v52, 0.0  ;;  %v2016_v42 = vsel %vm540_vm2, %v3708_v26, -inf }
 0x283   : > { %1644 = vmatpush.msrb.mxu3 %v2622_v17 }
 0x284   : > { %v736_v62 = vpop.xlane.xlu0 %735 }
 0x285   : > { %v740_v21 = vsub.f32 %v3524_v10, %v736_v62  ;;  %2644 = vrot.lane.b32.xlu0 %v3378_v55, %s3019_s17 }
 0x287   : > { %v747_v31 = vmul.f32 1.442695, %v740_v21 }
 0x289   : > { %2674 = vpow2.f32 %v747_v31 }
 0x28c   : > { %v950_v32 = vpop.xlane.xlu2 %949  ;;  %v1160_v36 = vpop.xlane.xlu0 %1159 }
 0x28d   : > { %v956_v37 = vsub.f32 %v3531_v15, %v950_v32  ;;  %v1168_v38 = vsub.f32 %v3521_v4, %v1160_v36  ;;  %v2626_v15 = vunpack.i.l.bf16 %v3557_v29  ;;  %v2631_v29 = vunpack.i.l.bf16 %v3569_v35 }
 0x28f   : > { %v3673_v49 = vpop.eup %2674  ;;  %v962_v51 = vmul.f32 1.442695, %v956_v37  ;;  %v1173_v60 = vmul.f32 1.442695, %v1168_v38 }
 0x290   : > { %2384 = vmatmul.msk.f32.gmra.mxu0 %vm540_vm2, %v3673_v49 }
 0x291   : > { %2676 = vpow2.f32 %v962_v51 }
 0x292   : > { %2678 = vpow2.f32 %v1173_v60 }
 0x294   : > { %v1370_v10 = vpop.xlane.xlu0 %1369  ;;  %v953_v45 = vpop.xlane.xlu1 %952 }
 0x295   : > { %v1380_v55 = vsub.f32 %v3529_v14, %v1370_v10  ;;  %v957_v46 = vsub.f32 %v3543_v20, %v953_v45  ;;  %v568_v14 = vsel %vm540_vm2, %v3537_v18, 0.0  ;;  %v2632_v18 = vunpack.i.h.bf16 %v3569_v35 }
 0x296   : > { %v571_v10 = vsel %vm540_vm2, %v3598_v2, 0.0 }
 0x297   : > { %v3679_v50 = vpop.eup %2676  ;;  %v1384_v4 = vmul.f32 1.442695, %v1380_v55  ;;  %v964_v61 = vmul.f32 1.442695, %v957_v46 }
 0x298   : > { %v3682_v54 = vpop.eup %2678  ;;  %2395 = vmatmul.msk.f32.vlgmr.msrb.gmra.mxu0 %vm540_vm2, %v3679_v50 }
 0x299   : > { %2680 = vpow2.f32 %v1384_v4  ;;  %2406 = vmatmul.msk.f32.gmra.mxu3 %vm540_vm2, %v3682_v54  ;;  %1465 = vmatpush.msrb.mxu0 %v2626_v15  ;;  %v2641_v4 = vunpack.i.l.bf16 %v3577_v39 }
 0x29a   : > { %2682 = vpow2.f32 %v964_v61  ;;  %v2642_v61 = vunpack.i.h.bf16 %v3577_v39 }
 0x29b   : > { %1466 = vmatpush.msrb.mxu0 %v2627_v56 }
 0x29c   : > { %v1163_v20 = vpop.xlane.xlu1 %1162  ;;  %569 = vadd.xlane.f32.xlu1 %v568_v14 }
 0x29d   : > { %v1169_v59 = vsub.f32 %v3551_v25, %v1163_v20 }
 0x29f   : > { %v3692_v63 = vpop.eup %2680  ;;  %v1175_v24 = vmul.f32 1.442695, %v1169_v59  ;;  %v752_v59 = vsel %vm540_vm2, %v3636_v44, 0.0 }
 0x2a0   : > { %v2683_v3 = vpop.eup %2682 }
 0x2a1   : > { %2684 = vpow2.f32 %v1175_v24  ;;  %2396 = vmatmul.msk.f32.gmra.mxu0 %vm540_vm2, %v2683_v3  ;;  %2417 = vmatmul.msk.f32.vlgmr.msra.gmra.mxu3 %vm540_vm2, %v3692_v63  ;;  %v975_v5 = vsel %vm540_vm2, %v2683_v3, 0.0 }
 0x2a2   : > { %1856 = vmatpush.msra.mxu3 %v2631_v29  ;;  %976 = vadd.xlane.f32.xlu2 %v975_v5  ;;  %v600_v5 = vpop.f32.mrf.mxu3 }
 0x2a4   : > { %1857 = vmatpush.msra.mxu3 %v2632_v18  ;;  %v1166_v25 = vpop.xlane.xlu2 %1165  ;;  %v1373_v1 = vpop.xlane.xlu1 %1372  ;;  %750 = vadd.xlane.f32.xlu1 %v749_v28  ;;  %v758_v28 = vsel %vm540_vm2, %v3673_v49, 0.0  ;;  %v972_v49 = vsel %vm540_vm2, %v3679_v50, 0.0 }
 0x2a5   : > { %v1170_v58 = vsub.f32 %v3559_v30, %v1166_v25  ;;  %v1381_v7 = vsub.f32 %v3541_v19, %v1373_v1 }
 0x2a7   : > { %v2685_v9 = vpop.eup %2684  ;;  %v1177_v11 = vmul.f32 1.442695, %v1170_v58  ;;  %v1386_v12 = vmul.f32 1.442695, %v1381_v7 }
 0x2a8   : > { %v1185_v35 = vsel %vm540_vm2, %v2685_v9, 0.0 }
 0x2a9   : > { %2686 = vpow2.f32 %v1177_v11  ;;  %2407 = vmatmul.msk.f32.vlgmr.msra.gmra.mxu0 %vm540_vm2, %v2685_v9 }
 0x2aa   : > { %2688 = vpow2.f32 %v1386_v12  ;;  %1678 = vmatpush.msra.mxu0 %v2636_v47  ;;  %1186 = vadd.xlane.f32.xlu2 %v1185_v35 }
 0x2ac   : > { %1679 = vmatpush.msra.mxu0 %v2637_v16  ;;  %v1586_v30 = vpop.xlane.xlu2 %1585  ;;  %v1376_v19 = vpop.xlane.xlu0 %1375  ;;  %756 = vadd.xlane.f32.xlu1 %v755_v23 }
 0x2ad   : > { %v1382_v17 = vsub.f32 %v3567_v34, %v1376_v19  ;;  %v1583_v62 = vpop.xlane.xlu1 %1582  ;;  %v1594_v34 = vsub.f32 %v3565_v33, %v1586_v30 }
 0x2ae   : > { %v1593_v21 = vsub.f32 %v3555_v27, %v1583_v62 }
 0x2af   : > { %v2687_v31 = vpop.eup %2686  ;;  %v1388_v32 = vmul.f32 1.442695, %v1382_v17  ;;  %2017 = vmax.xlane.f32.xlu0 %v2016_v42  ;;  %v1599_v45 = vmul.f32 1.442695, %v1594_v34 }
 0x2b0   : > { %v2689_v36 = vpop.eup %2688  ;;  %v1597_v37 = vmul.f32 1.442695, %v1593_v21  ;;  %v1188_v38 = vsel %vm540_vm2, %v2687_v31, 0.0 }
 0x2b1   : > { %2408 = vmatmul.msk.f32.gmra.mxu0 %vm540_vm2, %v2687_v31  ;;  %2418 = vmatmul.msk.f32.gmra.mxu3 %vm540_vm2, %v2689_v36  ;;  %v1395_v52 = vsel %vm540_vm2, %v2689_v36, 0.0  ;;  %2690 = vpow2.f32 %v1388_v32 }
 0x2b2   : > { %1396 = vadd.xlane.f32.xlu2 %v1395_v52  ;;  %2692 = vpow2.f32 %v1597_v37 }
 0x2b4   : > { %v1796_v27 = vpop.xlane.xlu2 %1795  ;;  %1189 = vadd.xlane.f32.xlu1 %v1188_v38  ;;  %v603_v38 = vpop.f32.mrf.mxu3 }
 0x2b5   : > { %v1379_v51 = vpop.xlane.xlu1 %1378 }
 0x2b6   : > { %v1383_v60 = vsub.f32 %v3581_v41, %v1379_v51  ;;  %v1806_v41 = vsub.f32 %v3579_v40, %v1796_v27 }
 0x2b7   : > { %572 = vadd.xlane.f32.xlu0 %v571_v10  ;;  %v2691_v55 = vpop.eup %2690 }
 0x2b8   : > { %v1390_v46 = vmul.f32 1.442695, %v1383_v60  ;;  %v2693_v15 = vpop.eup %2692  ;;  %v1398_v14 = vsel %vm540_vm2, %v2691_v55, 0.0  ;;  %v1810_v24 = vmul.f32 1.442695, %v1806_v41 }
 0x2b9   : > { %2419 = vmatmul.msk.f32.vlgmr.msrb.gmra.mxu0 %vm540_vm2, %v2691_v55  ;;  %2429 = vmatmul.msk.f32.vlgmr.msrb.gmra.mxu3 %vm540_vm2, %v2693_v15  ;;  %v1605_v33 = vsel %vm540_vm2, %v2693_v15, 0.0 }
 0x2ba   : > { %2694 = vpow2.f32 %v1390_v46  ;;  %2069 = vmatpush.msrb.mxu3 %v2641_v4  ;;  %1606 = vadd.xlane.f32.xlu2 %v1605_v33 }
 0x2bb   : > { %2696 = vpow2.f32 %v1599_v45 }
 0x2bc   : > { %v567_v2 = vpop.xlane.xlu2 %566  ;;  %v1589_v56 = vpop.xlane.xlu0 %1588  ;;  %2070 = vmatpush.msrb.mxu3 %v2642_v61  ;;  %1399 = vadd.xlane.f32.xlu1 %v1398_v14 }
 0x2bd   : > { %2698 = vrcp.f32 %v567_v2  ;;  %v1595_v20 = vsub.f32 %v3590_v48, %v1589_v56 }
 0x2bf   : > { %v1601_v3 = vmul.f32 1.442695, %v1595_v20  ;;  %753 = vadd.xlane.f32.xlu0 %v752_v59 }
 0x2c0   : > { %v3734_v39 = vpop.eup %2694 }
 0x2c1   : > { %v2697_v40 = vpop.eup %2696  ;;  %2700 = vpow2.f32 %v1601_v3  ;;  %2420 = vmatmul.msk.f32.gmra.mxu0 %vm540_vm2, %v3734_v39 }
 0x2c2   : > { %2430 = vmatmul.msk.f32.gmra.mxu3 %vm540_vm2, %v2697_v40  ;;  %2702 = vpow2.f32 %v1810_v24  ;;  %v1608_v25 = vsel %vm540_vm2, %v2697_v40, 0.0 }
 0x2c3   : > { %v2699_v29 = vpop.eup %2698 }
 0x2c4   : > { %v639_v48 = vmul.f32 %v2699_v29, %v600_v5  ;;  %v1592_v18 = vpop.xlane.xlu0 %1591  ;;  %1609 = vadd.xlane.f32.xlu1 %v1608_v25 }
 0x2c5   : > { %v1596_v44 = vsub.f32 %v3596_v0, %v1592_v18 }
 0x2c6   : > { %643 = vst.msk [vmem:[#allocation2] sm:$0xff] %vm469_vm1, %v639_v48 }
 0x2c7   : > { %v2701_v1 = vpop.eup %2700  ;;  %v1603_v58 = vmul.f32 1.442695, %v1596_v44  ;;  %759 = vadd.xlane.f32.xlu0 %v758_v28 }
 0x2c8   : > { %v3744_v7 = vpop.eup %2702  ;;  %v1611_v45 = vsel %vm540_vm2, %v2701_v1, 0.0 }
 0x2c9   : > { %2704 = vpow2.f32 %v1603_v58  ;;  %2431 = vmatmul.msk.f32.vlgmr.msra.gmra.mxu0 %vm540_vm2, %v2701_v1  ;;  %v1818_v4 = vsel %vm540_vm2, %v3744_v7, 0.0 }
 0x2ca   : > { %2441 = vmatmul.msk.f32.vlgmr.msra.gmra.mxu3 %vm540_vm2, %v3744_v7 }
 0x2cc   : > { %v1799_v9 = vpop.xlane.xlu0 %1798  ;;  %v1802_v11 = vpop.xlane.xlu1 %1801 }
 0x2cd   : > { %v1807_v0 = vsub.f32 %v3606_v6, %v1799_v9  ;;  %v1808_v12 = vsub.f32 %v3609_v8, %v1802_v11  ;;  %v1182_v6 = vsel %vm540_vm2, %v3682_v54, 0.0  ;;  %v3776_v15 = vpop.f32.mrf.mxu0 }
 0x2cf   : > { %v2705_v47 = vpop.eup %2704  ;;  %v1812_v35 = vmul.f32 1.442695, %v1807_v0  ;;  %v1814_v16 = vmul.f32 1.442695, %v1808_v12  ;;  %973 = vadd.xlane.f32.xlu0 %v972_v49 }
 0x2d0   : > { %v1614_v30 = vsel %vm540_vm2, %v2705_v47, 0.0 }
 0x2d1   : > { %2706 = vpow2.f32 %v1812_v35  ;;  %2432 = vmatmul.msk.f32.gmra.mxu0 %vm540_vm2, %v2705_v47  ;;  %1615 = vadd.xlane.f32.xlu2 %v1614_v30 }
 0x2d2   : > { %2708 = vpow2.f32 %v1814_v16 }
 0x2d4   : > { %v2009_v19 = vpop.xlane.xlu0 %2008 }
 0x2d5   : > { %v2019_v23 = vsub.f32 %v3619_v57, %v2009_v19  ;;  %v1392_v57 = vsel %vm540_vm2, %v3692_v63, 0.0  ;;  %v3782_v59 = vpop.f32.mrf.mxu0 }
 0x2d7   : > { %v2707_v8 = vpop.eup %2706  ;;  %v2023_v17 = vmul.f32 1.442695, %v2019_v23  ;;  %1183 = vadd.xlane.f32.xlu0 %v1182_v6 }
 0x2d8   : > { %v2709_v50 = vpop.eup %2708  ;;  %2442 = vmatmul.msk.f32.gmra.mxu3 %vm540_vm2, %v2707_v8  ;;  %v1821_v3 = vsel %vm540_vm2, %v2707_v8, 0.0 }
 0x2d9   : > { %2710 = vpow2.f32 %v2023_v17  ;;  %v1824_v62 = vsel %vm540_vm2, %v2709_v50, 0.0 }
 0x2da   : > { %1825 = vadd.xlane.f32.xlu2 %v1824_v62 }
 0x2dc   : > { %v1805_v21 = vpop.xlane.xlu0 %1804  ;;  %v2015_v42 = vpop.xlane.xlu2 %2014 }
 0x2dd   : > { %v1809_v31 = vsub.f32 %v3623_v22, %v1805_v21  ;;  %v2021_v54 = vsub.f32 %v3634_v43, %v2015_v42  ;;  %v1401_v22 = vsel %vm540_vm2, %v3734_v39, 0.0 }
 0x2df   : > { %v2711_v32 = vpop.eup %2710  ;;  %v1816_v36 = vmul.f32 1.442695, %v1809_v31  ;;  %1393 = vadd.xlane.f32.xlu0 %v1392_v57  ;;  %v2027_v52 = vmul.f32 1.442695, %v2021_v54 }
 0x2e0   : > { %2453 = vmatmul.msk.f32.vlgmr.msrb.gmra.mxu3 %vm540_vm2, %v2711_v32  ;;  %v2031_v37 = vsel %vm540_vm2, %v2711_v32, 0.0 }
 0x2e1   : > { %2712 = vpow2.f32 %v1816_v36 }
 0x2e2   : > { %2032 = vadd.xlane.f32.xlu2 %v2031_v37  ;;  %2714 = vpow2.f32 %v2027_v52 }
 0x2e3   : > { %v3770_v10 = vpop.f32.mrf.mxu3 }
 0x2e4   : > { %v2012_v34 = vpop.xlane.xlu0 %2011  ;;  %v2650_v2 = vpop.permute.xlu1 %2649 }
 0x2e5   : > { %v2020_v27 = vsub.f32 %v3650_v53, %v2012_v34  ;;  %v968_v56 = vpop.xlane.xlu2 %967  ;;  %v2651_v20 = vunpack.i.l.bf16 %v2650_v2  ;;  %v2652_v24 = vunpack.i.h.bf16 %v2650_v2 }
 0x2e7   : > { %v2713_v63 = vpop.eup %2712  ;;  %v2025_v51 = vmul.f32 1.442695, %v2020_v27  ;;  %1402 = vadd.xlane.f32.xlu0 %v1401_v22  ;;  %v3786_v29 = vpop.f32.mrf.mxu0 }
 0x2e8   : > { %v1827_v43 = vsel %vm540_vm2, %v2713_v63, 0.0  ;;  %v2715_v60 = vpop.eup %2714 }
 0x2e9   : > { %2716 = vpow2.f32 %v2025_v51  ;;  %1828 = vadd.xlane.f32.xlu1 %v1827_v43  ;;  %v2037_v53 = vsel %vm540_vm2, %v2715_v60, 0.0 }
 0x2ea   : > { %2718 = vrcp.f32 %v968_v56 }
 0x2eb   : > { %v3780_v61 = vpop.f32.mrf.mxu3 }
 0x2ed   : > { %v971_v40 = vpop.xlane.xlu2 %970 }
 0x2ee   : > { %2720 = vrcp.f32 %v971_v40 }
 0x2ef   : > { %v2717_v55 = vpop.eup %2716  ;;  %1612 = vadd.xlane.f32.xlu0 %v1611_v45 }
 0x2f0   : > { %2454 = vmatmul.msk.f32.gmra.mxu3 %vm540_vm2, %v2717_v55  ;;  %v2034_v46 = vsel %vm540_vm2, %v2717_v55, 0.0  ;;  %v2719_v5 = vpop.eup %2718 }
 0x2f1   : > { %2038 = vadd.xlane.f32.xlu1 %v2037_v53  ;;  %2035 = vadd.xlane.f32.xlu2 %v2034_v46 }
 0x2f3   : > { %v1007_v39 = vpop.f32.mrf.mxu3 }
 0x2f4   : > { %v1052_v48 = vmul.f32 %v2719_v5, %v1007_v39  ;;  %v2721_v28 = vpop.eup %2720 }
 0x2f5   : > { %v1181_v25 = vpop.xlane.xlu2 %1180 }
 0x2f7   : > { %v2645_v33 = vpop.permute.xlu0 %2644  ;;  %1819 = vadd.xlane.f32.xlu0 %v1818_v4 }
 0x2f8   : > { %v2646_v41 = vunpack.i.l.bf16 %v2645_v33  ;;  %v2647_v14 = vunpack.i.h.bf16 %v2645_v33 }
 0x2fa   : > { %1891 = vmatpush.msrb.mxu0 %v2646_v41 }
 0x2fb   : > { %v1010_v18 = vpop.f32.mrf.mxu3 }
 0x2fc   : > { %1892 = vmatpush.msrb.mxu0 %v2647_v14  ;;  %v1053_v1 = vmul.f32 %v2721_v28, %v1010_v18 }
 0x2fd   : > { %2443 = vmatmul.msk.f32.vlgmr.msrb.gmra.mxu0 %vm540_vm2, %v2709_v50 }
 0x2fe   : > { %2104 = vmatpush.msra.mxu0 %v2651_v20 }
 0x2ff   : > { %1822 = vadd.xlane.f32.xlu0 %v1821_v3 }
 0x300   : > { %2105 = vmatpush.msra.mxu0 %v2652_v24 }
 0x303   : > { %v1220_v49 = vpop.f32.mrf.mxu3 }
 0x305   : > { %2444 = vmatmul.msk.f32.gmra.mxu0 %vm540_vm2, %v2713_v63 }
 0x309   : > { %1060 = vrot.lane.b32.xlu2 %v1052_v48, %s3021_s7 }
 0x30d   : > { %v3790_v44 = vpop.f32.mrf.mxu0  ;;  %2455 = vmatmul.msk.f32.vlgmr.msra.gmra.mxu0 %vm540_vm2, %v2715_v60 }
 0x30f   : > { %v570_v58 = vpop.xlane.xlu1 %569 }
 0x310   : > { %2722 = vrcp.f32 %v570_v58 }
 0x311   : > { %1062 = vrot.lane.b32.xlu2 %v1053_v1, %s3021_s7 }
 0x315   : > { %v977_v7 = vpop.xlane.xlu2 %976  ;;  %v3794_v9 = vpop.f32.mrf.mxu0 }
 0x316   : > { %v2723_v11 = vpop.eup %2722  ;;  %2724 = vrcp.f32 %v977_v7 }
 0x317   : > { %v640_v0 = vmul.f32 %v2723_v11, %v603_v38  ;;  %v751_v12 = vpop.xlane.xlu1 %750 }
 0x319   : > { %644 = vst.msk [vmem:[#allocation2 + $0x8] sm:$0xff] %vm469_vm1, %v640_v0 }
 0x31c   : > { %v2725_v47 = vpop.eup %2724  ;;  %v3803_v23 = vpop.f32.mrf.mxu3 }
 0x31d   : > { %v3799_v30 = vpop.xlane.xlu2 %1186 }
 0x31e   : > { %v1045_v35 = vpop.f32.mrf.mxu0 }
 0x31f   : > { %v3797_v16 = vmul.f32 %v2725_v47, %v1045_v35  ;;  %v3801_v19 = vpop.xlane.xlu1 %756 }
 0x322   : > { %v2018_v6 = vpop.xlane.xlu0 %2017 }
 0x323   : > { %v2022_v8 = vsub.f32 %v3708_v26, %v2018_v6 }
 0x324   : > { %v3808_v31 = vpop.f32.mrf.mxu3 }
 0x325   : > { %v2029_v17 = vmul.f32 1.442695, %v2022_v8  ;;  %v1397_v21 = vpop.xlane.xlu2 %1396 }
 0x326   : > { %v3806_v50 = vpop.f32.mrf.mxu0 }
 0x327   : > { %2726 = vpow2.f32 %v2029_v17  ;;  %v1190_v62 = vpop.xlane.xlu1 %1189 }
 0x328   : > { %2728 = vrcp.f32 %v1190_v62 }
 0x32a   : > { %v573_v42 = vpop.xlane.xlu0 %572 }
 0x32b   : > { %2730 = vrcp.f32 %v573_v42 }
 0x32c   : > { %2732 = vrcp.f32 %v1397_v21 }
 0x32d   : > { %v2727_v57 = vpop.eup %2726  ;;  %v1607_v38 = vpop.xlane.xlu2 %1606 }
 0x32e   : > { %v1258_v32 = vpop.f32.mrf.mxu0  ;;  %2456 = vmatmul.msk.f32.gmra.mxu0 %vm540_vm2, %v2727_v57  ;;  %v2040_v36 = vsel %vm540_vm2, %v2727_v57, 0.0  ;;  %v2729_v54 = vpop.eup %2728 }
 0x32f   : > { %2041 = vadd.xlane.f32.xlu0 %v2040_v36  ;;  %v3812_v26 = vmul.f32 %v2729_v54, %v1258_v32 }
 0x331   : > { %v2731_v37 = vpop.eup %2730 }
 0x332   : > { %v641_v52 = vmul.f32 %v2731_v37, %v3776_v15  ;;  %v754_v34 = vpop.xlane.xlu0 %753  ;;  %v2733_v27 = vpop.eup %2732 }
 0x333   : > { %2734 = vrcp.f32 %v754_v34 }
 0x334   : > { %645 = vst.msk [vmem:[#allocation2 + $0x10] sm:$0xff] %vm469_vm1, %v641_v52  ;;  %v1436_v22 = vpop.f32.mrf.mxu3  ;;  %2736 = vrcp.f32 %v1607_v38 }
 0x335   : > { %v1479_v63 = vmul.f32 %v2733_v27, %v1436_v22  ;;  %2738 = vrcp.f32 %v751_v12 }
 0x336   : > { %2740 = vrcp.f32 %v1181_v25  ;;  %v1468_v18 = vpop.f32.mrf.mxu0 }
 0x337   : > { %1488 = vrot.lane.b32.xlu2 %v1479_v63, %s3022_s9 }
 0x339   : > { %v2735_v51 = vpop.eup %2734 }
 0x33a   : > { %v760_v43 = vpop.xlane.xlu0 %759  ;;  %v840_v60 = vmul.f32 %v2735_v51, %v3780_v61  ;;  %v2737_v45 = vpop.eup %2736 }
 0x33b   : > { %2742 = vrcp.f32 %v760_v43  ;;  %v2739_v53 = vpop.eup %2738  ;;  %v1400_v61 = vpop.xlane.xlu1 %1399 }
 0x33c   : > { %849 = vrot.lane.b32.xlu1 %v840_v60, %s3023_s11  ;;  %v1646_v55 = vpop.f32.mrf.mxu3  ;;  %v2741_v15 = vpop.eup %2740  ;;  %v839_v33 = vmul.f32 %v2739_v53, %v3770_v10 }
 0x33d   : > { %v1691_v46 = vmul.f32 %v2737_v45, %v1646_v55  ;;  %v1265_v41 = vmul.f32 %v2741_v15, %v1220_v49 }
 0x33e   : > { %v1471_v0 = vpop.f32.mrf.mxu0 }
 0x33f   : > { %1699 = vrot.lane.b32.xlu2 %v1691_v46, %s3024_s10 }
 0x341   : > { %v2743_v4 = vpop.eup %2742 }
 0x342   : > { %v974_v2 = vpop.xlane.xlu0 %973  ;;  %v3822_v56 = vmul.f32 %v2743_v4, %v3790_v44 }
 0x343   : > { %847 = vrot.lane.b32.xlu0 %v839_v33, %s3023_s11  ;;  %v1610_v3 = vpop.xlane.xlu1 %1609 }
 0x344   : > { %1273 = vrot.lane.b32.xlu1 %v1265_v41, %s3025_s16  ;;  %v3826_v14 = vpop.xlane.xlu2 %1615 }
 0x345   : > { %v1649_v20 = vpop.f32.mrf.mxu3 }
 0x346   : > { %v1681_v8 = vpop.f32.mrf.mxu0 }
 0x34a   : > { %v1184_v24 = vpop.xlane.xlu0 %1183 }
 0x34b   : > { %2744 = vrcp.f32 %v1184_v24 }
 0x34c   : > { %2746 = vrcp.f32 %v1610_v3 }
 0x34d   : > { %v1826_v39 = vpop.xlane.xlu2 %1825  ;;  %v1859_v48 = vpop.f32.mrf.mxu3 }
 0x34e   : > { %v3838_v42 = vpop.f32.mrf.mxu0 }
 0x351   : > { %v2745_v40 = vpop.eup %2744 }
 0x352   : > { %v1394_v10 = vpop.xlane.xlu0 %1393  ;;  %v1266_v5 = vmul.f32 %v2745_v40, %v3803_v23  ;;  %v2747_v25 = vpop.eup %2746 }
 0x353   : > { %2748 = vrcp.f32 %v1394_v10  ;;  %v1692_v28 = vmul.f32 %v2747_v25, %v1649_v20  ;;  %v2153_v10 = vld [vmem:[#allocation11 + $0x38] sm:$0xff] }
 0x354   : > { %1275 = vrot.lane.b32.xlu1 %v1266_v5, %s3025_s16  ;;  %2750 = vrcp.f32 %v3801_v19  ;;  %v2152_v5 = vld [vmem:[#allocation11 + $0x30] sm:$0xff]  ;;  %2178 = vmatpush.msra.mxu1 %v2153_v10 }
 0x355   : > { %v2033_v1 = vpop.xlane.xlu2 %2032 }
 0x356   : > { %2752 = vrcp.f32 %v2033_v1  ;;  %2179 = vmatpush.msra.mxu1 %v2152_v5  ;;  %v2148_v1 = vld [vmem:[#allocation11 + $0x10] sm:$0xff] }
 0x357   : > { %2754 = vrcp.f32 %v1400_v61 }
 0x359   : > { %v2749_v44 = vpop.eup %2748 }
 0x35a   : > { %v1403_v58 = vpop.xlane.xlu0 %1402  ;;  %v1478_v7 = vmul.f32 %v2749_v44, %v3808_v31  ;;  %v2751_v12 = vpop.eup %2750  ;;  %v2150_v44 = vld [vmem:[#allocation11 + $0x20] sm:$0xff] }
 0x35b   : > { %v1862_v11 = vpop.f32.mrf.mxu3  ;;  %v841_v47 = vmul.f32 %v2751_v12, %v3786_v29 }
 0x35c   : > { %1486 = vrot.lane.b32.xlu0 %v1478_v7, %s3022_s9  ;;  %1701 = vrot.lane.b32.xlu1 %v1692_v28, %s3024_s10  ;;  %v2753_v35 = vpop.eup %2752  ;;  %v1829_v22 = vpop.xlane.xlu1 %1828  ;;  %v2149_v28 = vld [vmem:[#allocation11 + $0x18] sm:$0xff] }
 0x35d   : > { %v2755_v6 = vpop.eup %2754 }
 0x35e   : > { %v1480_v17 = vmul.f32 %v2755_v6, %v1468_v18 }
 0x362   : > { %v1613_v49 = vpop.xlane.xlu0 %1612 }
 0x363   : > { %v2072_v23 = vpop.f32.mrf.mxu3 }
 0x364   : > { %v2117_v19 = vmul.f32 %v2753_v35, %v2072_v23  ;;  %851 = vrot.lane.b32.xlu0 %v841_v47, %s3023_s11  ;;  %v2039_v55 = vpop.xlane.xlu1 %2038 }
 0x366   : > { %2125 = vrot.lane.b32.xlu2 %v2117_v19, %s3026_s26 }
 0x36a   : > { %v1820_v62 = vpop.xlane.xlu0 %1819 }
 0x36b   : > { %2756 = vrcp.f32 %v1820_v62 }
 0x36c   : > { %1490 = vrot.lane.b32.xlu0 %v1480_v17, %s3022_s9 }
 0x371   : > { %v2757_v21 = vpop.eup %2756 }
 0x372   : > { %v1823_v31 = vpop.xlane.xlu0 %1822  ;;  %v1904_v29 = vmul.f32 %v2757_v21, %v1859_v48  ;;  %v2151_v48 = vld [vmem:[#allocation11 + $0x28] sm:$0xff] }
 0x373   : > { %2758 = vrcp.f32 %v1823_v31  ;;  %v2075_v53 = vpop.f32.mrf.mxu3  ;;  %2180 = vmatpush.msra.mxu1 %v2151_v48 }
 0x374   : > { %2760 = vrcp.f32 %v1826_v39  ;;  %1912 = vrot.lane.b32.xlu1 %v1904_v29, %s3027_s27 }
 0x375   : > { %2762 = vrcp.f32 %v974_v2  ;;  %2181 = vmatpush.msra.mxu1 %v2150_v44 }
 0x376   : > { %2764 = vrcp.f32 %v1403_v58  ;;  %v2147_v58 = vld [vmem:[#allocation11 + $0x8] sm:$0xff] }
 0x377   : > { %2766 = vrcp.f32 %v3799_v30  ;;  %2182 = vmatpush.msra.mxu1 %v2149_v28 }
 0x378   : > { %2768 = vrcp.f32 %v1613_v49 }
 0x379   : > { %v2759_v57 = vpop.eup %2758  ;;  %2770 = vrcp.f32 %v1829_v22  ;;  %2183 = vmatpush.msra.mxu1 %v2148_v1 }
 0x37a   : > { %v2761_v32 = vpop.eup %2760  ;;  %v1894_v36 = vpop.f32.mrf.mxu0  ;;  %v1905_v54 = vmul.f32 %v2759_v57, %v1862_v11 }
 0x37b   : > { %v1906_v37 = vmul.f32 %v2761_v32, %v1894_v36  ;;  %v2763_v52 = vpop.eup %2762  ;;  %2184 = vmatpush.msra.mxu1 %v2147_v58 }
 0x37c   : > { %1914 = vrot.lane.b32.xlu1 %v1905_v54, %s3027_s27  ;;  %v1054_v34 = vmul.f32 %v2763_v52, %v3794_v9  ;;  %v2765_v27 = vpop.eup %2764  ;;  %v574_v9 = vsel %vm540_vm2, %v3615_v13, 0.0 }
 0x37d   : > { %1916 = vrot.lane.b32.xlu0 %v1906_v37, %s3027_s27  ;;  %v2767_v38 = vpop.eup %2766  ;;  %v1481_v51 = vmul.f32 %v2765_v27, %v1471_v0  ;;  %v2146_v0 = vld [vmem:[#allocation11] sm:$0xff] }
 0x37e   : > { %v1267_v63 = vmul.f32 %v2767_v38, %v3806_v50  ;;  %v2769_v30 = vpop.eup %2768  ;;  %v2036_v50 = vpop.xlane.xlu2 %2035  ;;  %2185 = vmatpush.msra.mxu1 %v2146_v0 }
 0x37f   : > { %v2771_v60 = vpop.eup %2770  ;;  %2772 = vrcp.f32 %v2036_v50 }
 0x380   : > { %2774 = vrcp.f32 %v2039_v55 }
 0x382   : > { %v1897_v43 = vpop.f32.mrf.mxu0 }
 0x383   : > { %v1907_v45 = vmul.f32 %v2771_v60, %v1897_v43 }
 0x384   : > { %1064 = vrot.lane.b32.xlu1 %v1054_v34, %s3021_s7 }
 0x385   : > { %1066 = vrot.lane.b32.xlu0 %v3797_v16, %s3021_s7  ;;  %v1693_v16 = vmul.f32 %v2769_v30, %v1681_v8  ;;  %v2773_v46 = vpop.eup %2772  ;;  %s2216_s7 = scalar_lea.hbm %s3948_s6, %s2470_s18 }
 0x386   : > { %v2118_v13 = vmul.f32 %v2773_v46, %v2075_v53  ;;  %v2775_v33 = vpop.eup %2774  ;;  %v1061_v41 = vpop.permute.xlu2 %1060 }
 0x38a   : > { %v2107_v15 = vpop.f32.mrf.mxu0 }
 0x38b   : > { %v2119_v2 = vmul.f32 %v2775_v33, %v2107_v15 }
 0x38c   : > { %1277 = vrot.lane.b32.xlu1 %v1267_v63, %s3025_s16 }
 0x38d   : > { %1492 = vrot.lane.b32.xlu0 %v1481_v51, %s3022_s9  ;;  %v2653_v51 = vld [vmem:[%s3947_s5] ss:$0 sm:$0xff]  ;;  %s2217_s9 = sshll.u32 %s338_s13, 4  ;;  %s2218_s9 = int_to_ptr.vmem [resolvable:$true] %s2217_s9 }
 0x38e   : > { %v1063_v3 = vpop.permute.xlu2 %1062 }
 0x38f   : > { %575 = vadd.xlane.f32.xlu2 %v574_v9 }
 0x394   : > { %1703 = vrot.lane.b32.xlu1 %v1693_v16, %s3024_s10 }
 0x395   : > { %1918 = vrot.lane.b32.xlu0 %v1907_v45, %s3027_s27 }
 0x396   : > { %v1489_v18 = vpop.permute.xlu2 %1488 }
 0x39c   : > { %853 = vrot.lane.b32.xlu1 %v3822_v56, %s3023_s11 }
 0x39e   : > { %v1700_v12 = vpop.permute.xlu2 %1699 }
 0x3a2   : > { %v2042_v4 = vpop.xlane.xlu0 %2041 }
 0x3a3   : > { %2776 = vrcp.f32 %v2042_v4 }
 0x3a4   : > { %2127 = vrot.lane.b32.xlu1 %v2118_v13, %s3026_s26  ;;  %2778 = vrcp.f32 %v3826_v14 }
 0x3a7   : > { %2129 = vrot.lane.b32.xlu2 %v2119_v2, %s3026_s26 }
 0x3a9   : > { %v2777_v61 = vpop.eup %2776 }
 0x3aa   : > { %v2779_v39 = vpop.eup %2778 }
 0x3ab   : > { %v2110_v20 = vpop.f32.mrf.mxu0  ;;  %v1694_v40 = vmul.f32 %v2779_v39, %v3838_v42 }
 0x3ac   : > { %v2120_v24 = vmul.f32 %v2777_v61, %v2110_v20  ;;  %1279 = vrot.lane.b32.xlu1 %v3812_v26, %s3025_s16 }
 0x3ae   : > { %v850_v56 = vpop.permute.xlu1 %849 }
 0x3af   : > { %861 = vst.msk [vmem:[#allocation2 + $0x8] sm:$0xff] %vm859_vm3, %v850_v56  ;;  %2131 = vrot.lane.b32.xlu2 %v2120_v24, %s3026_s26 }
 0x3b0   : > { %1074 = vst.msk [vmem:[#allocation2 + $0x8] sm:$0xff] %vm1072_vm4, %v1063_v3 }
 0x3b4   : > { %1705 = vrot.lane.b32.xlu1 %v1694_v40, %s3024_s10  ;;  %s2219_s10 = sshll.u32 %s2216_s7, 4  ;;  %s2220_s10 = int_to_ptr.hbm [resolvable:$true] %s2219_s10 }
 0x3b5   : > { %v848_v14 = vpop.permute.xlu0 %847  ;;  %s2946_s16 = sshra.s32 %s2220_s10, 4  ;;  %s2947_s16 = int_to_ptr.hbm [resolvable:$true] %s2946_s16 }
 0x3b6   : > { %860 = vst.msk [vmem:[#allocation2] sm:$0xff] %vm859_vm3, %v848_v14  ;;  %v1274_v26 = vpop.permute.xlu1 %1273  ;;  %s2948_s26 = scalar_lea.hbm %s2947_s16, 32  ;;  %p2953_p11 = scmp.lt.s32.totalorder %s2947_s16, %s3948_s6 }
 0x3b7   : > { %1073 = vst.msk [vmem:[#allocation2] sm:$0xff] %vm1072_vm4, %v1061_v41  ;;  %p2949_p1 = scmp.ne.s32.totalorder %s2947_s16, %s2948_s26  ;;  %p2954_p2 = scmp.lt.s32.totalorder %s2952_s8, %s2948_s26 }
 0x3b8   : > { %1286 = vst.msk [vmem:[#allocation2] sm:$0xff] %vm1285_vm5, %v1274_v26 }
 0x3b9   : > { %p2950_p4 = pnand %p2949_p1, %p3160_p3  ;;  %p2955_p9 = por %p2954_p2, %p2953_p11 }
 0x3bb   : > { %p2951_p8 = pneg %p2950_p4 }
 0x3bd   : > { %p2956_p10 = pnand %p2955_p9, %p2951_p8 }
 0x3c0   : > { %v2126_v35 = vpop.permute.xlu2 %2125 }
 0x3c6   : > { %v1276_v25 = vpop.permute.xlu1 %1275 }
 0x3c7   : > { %1287 = vst.msk [vmem:[#allocation2 + $0x8] sm:$0xff] %vm1285_vm5, %v1276_v25 }
 0x3c8   : > { %1500 = vst.msk [vmem:[#allocation2 + $0x8] sm:$0xff] %vm1498_vm6, %v1489_v18 }
 0x3ce   : > { %v1487_v7 = vpop.permute.xlu0 %1486  ;;  %v1702_v11 = vpop.permute.xlu1 %1701 }
 0x3cf   : > { %1499 = vst.msk [vmem:[#allocation2] sm:$0xff] %vm1498_vm6, %v1487_v7 }
 0x3d0   : > { %1713 = vst.msk [vmem:[#allocation2 + $0x8] sm:$0xff] %vm1711_vm7, %v1702_v11 }
 0x3d1   : > { %1712 = vst.msk [vmem:[#allocation2] sm:$0xff] %vm1711_vm7, %v1700_v12 }
 0x3d6   : > { %v852_v49 = vpop.permute.xlu0 %851 }
 0x3d7   : > { %862 = vst.msk [vmem:[#allocation2 + $0x10] sm:$0xff] %vm859_vm3, %v852_v49 }
 0x3de   : > { %v1491_v8 = vpop.permute.xlu0 %1490 }
 0x3e6   : > { %v1913_v47 = vpop.permute.xlu1 %1912 }
 0x3e7   : > { %1925 = vst.msk [vmem:[#allocation2] sm:$0xff] %vm1924_vm8, %v1913_v47 }
 0x3e8   : > { %2138 = vst.msk [vmem:[#allocation2] sm:$0xff] %vm2137_vm9, %v2126_v35 }
 0x3ee   : > { %v1915_v23 = vpop.permute.xlu1 %1914 }
 0x3ef   : > { %1926 = vst.msk [vmem:[#allocation2 + $0x8] sm:$0xff] %vm1924_vm8, %v1915_v23  ;;  %v2142_v19 = vld [vmem:[#allocation2] sm:$0xff]  ;;  %v1917_v21 = vpop.permute.xlu0 %1916 }
 0x3f0   : > { %2457 = vmatmul.msk.f32.vlgmr.msra.gmra.mxu1 %vm353_vm0, %v2142_v19 }
 0x3f6   : > { %v1065_v6 = vpop.permute.xlu1 %1064 }
 0x3f7   : > { %1075 = vst.msk [vmem:[#allocation2 + $0x10] sm:$0xff] %vm1072_vm4, %v1065_v6  ;;  %v1067_v36 = vpop.permute.xlu0 %1066 }
 0x3fe   : > { %v1278_v17 = vpop.permute.xlu1 %1277 }
 0x3ff   : > { %1288 = vst.msk [vmem:[#allocation2 + $0x10] sm:$0xff] %vm1285_vm5, %v1278_v17  ;;  %v1493_v37 = vpop.permute.xlu0 %1492 }
 0x400   : > { %1501 = vst.msk [vmem:[#allocation2 + $0x10] sm:$0xff] %vm1498_vm6, %v1491_v8 }
 0x402   : > { %v576_v62 = vpop.xlane.xlu2 %575 }
 0x403   : > { %2780 = vrcp.f32 %v576_v62 }
 0x406   : > { %v1704_v42 = vpop.permute.xlu1 %1703 }
 0x407   : > { %1714 = vst.msk [vmem:[#allocation2 + $0x10] sm:$0xff] %vm1711_vm7, %v1704_v42  ;;  %v1919_v38 = vpop.permute.xlu0 %1918 }
 0x408   : > { %1927 = vst.msk [vmem:[#allocation2 + $0x10] sm:$0xff] %vm1924_vm8, %v1917_v21 }
 0x409   : > { %v2781_v31 = vpop.eup %2780 }
 0x40a   : > { %v642_v29 = vmul.f32 %v2781_v31, %v3782_v59  ;;  %v2130_v57 = vpop.permute.xlu2 %2129 }
 0x40b   : > { %2140 = vst.msk [vmem:[#allocation2 + $0x10] sm:$0xff] %vm2137_vm9, %v2130_v57 }
 0x40c   : > { %646 = vst.msk [vmem:[#allocation2 + $0x18] sm:$0xff] %vm469_vm1, %v642_v29 }
 0x40e   : > { %v854_v32 = vpop.permute.xlu1 %853 }
 0x40f   : > { %863 = vst.msk [vmem:[#allocation2 + $0x18] sm:$0xff] %vm859_vm3, %v854_v32 }
 0x410   : > { %1076 = vst.msk [vmem:[#allocation2 + $0x18] sm:$0xff] %vm1072_vm4, %v1067_v36 }
 0x412   : > { %v2144_v27 = vld [vmem:[#allocation2 + $0x10] sm:$0xff]  ;;  %v2132_v22 = vpop.permute.xlu2 %2131 }
 0x416   : > { %v2128_v54 = vpop.permute.xlu1 %2127 }
 0x417   : > { %2139 = vst.msk [vmem:[#allocation2 + $0x8] sm:$0xff] %vm2137_vm9, %v2128_v54 }
 0x41e   : > { %v1280_v52 = vpop.permute.xlu1 %1279  ;;  %v2143_v34 = vld [vmem:[#allocation2 + $0x8] sm:$0xff] }
 0x41f   : > { %1289 = vst.msk [vmem:[#allocation2 + $0x18] sm:$0xff] %vm1285_vm5, %v1280_v52  ;;  %2458 = vmatmul.msk.f32.gmra.mxu1 %vm353_vm0, %v2143_v34 }
 0x420   : > { %1502 = vst.msk [vmem:[#allocation2 + $0x18] sm:$0xff] %vm1498_vm6, %v1493_v37 }
 0x426   : > { %v1706_v59 = vpop.permute.xlu1 %1705 }
 0x427   : > { %1715 = vst.msk [vmem:[#allocation2 + $0x18] sm:$0xff] %vm1711_vm7, %v1706_v59  ;;  %2459 = vmatmul.msk.f32.gmra.mxu1 %vm353_vm0, %v2144_v27 }
 0x428   : > { %1928 = vst.msk [vmem:[#allocation2 + $0x18] sm:$0xff] %vm1924_vm8, %v1919_v38 }
 0x429   : > { %2141 = vst.msk [vmem:[#allocation2 + $0x18] sm:$0xff] %vm2137_vm9, %v2132_v22 }
 0x430   : > { %v2145_v63 = vld [vmem:[#allocation2 + $0x18] sm:$0xff] }
 0x431   : > { %2460 = vmatmul.msk.f32.gmra.mxu1 %vm353_vm0, %v2145_v63 }
 0x46d   : > { %v2187_v9 = vpop.f32.mrf.mxu1 }
 0x46e   : > { %v2188_v30 = vadd.f32 %v2653_v51, %v2187_v9 }
 0x470   : > { %2199 = vst.msk [vmem:[%s338_s13] sm:$0xff] %vm353_vm0, %v2188_v30 }
 0x49c   : > { %v2190_v43 = vpop.f32.mrf.mxu1 }
 0x49d   : > { %v2191_v60 = vadd.f32 %v2653_v51, %v2190_v43 }
 0x49f   : > { %2200 = vst.msk [vmem:[%s338_s13 + $0x8] sm:$0xff] %vm353_vm0, %v2191_v60 }
 0x4a4   : > { %v2193_v16 = vpop.f32.mrf.mxu1 }
 0x4a5   : > { %v2194_v45 = vadd.f32 %v2653_v51, %v2193_v16 }
 0x4a7   : > { %2201 = vst.msk [vmem:[%s338_s13 + $0x10] sm:$0xff] %vm353_vm0, %v2194_v45 }
 0x4ae   : > { %v2196_v50 = vpop.f32.mrf.mxu1 }
 0x4af   : > { %v2197_v55 = vadd.f32 %v2653_v51, %v2196_v50 }
 0x4b1   : > { %2202 = vst.msk [vmem:[%s338_s13 + $0x18] sm:$0xff] %vm353_vm0, %v2197_v55 }
 0x4b2   : > { %2959 = shalt.err (!%p2956_p10)
}
 0x4b3   : > { %s3028_s29 = smov 128  }
 0x4b4   : > { %2497 = dma.vmem_to_hbm [thread:$0]  (%p3160_p3), %s2218_s9, 512, %s2220_s10, %s2204_s15, %s3028_s29, %s3028_s29, %s3023_s11  }
 0x4b5 PF: > { %s2234_s13 = sand.u32 1, %s2994_s21   ;;  %p3959_p12 = scmp.ge.s32.totalorder %s3006_s24, 2 }
 0x4b6   : > { %s2235_s17 = scalar_lea.sflag [#allocation5], %s2234_s13 }
 0x4b7   : > { %p2517_p13 = pnand %p3959_p12, %p3099_p6 }
 0x4b9   : > { %p2518_p0 = pneg %p2517_p13 }
 0x4bb   : > { %2989 = dma.done.wait (%p2518_p0), %s2235_s17, 512  }
 0x4bc   : > { %2991 = vsyncadd (%p2518_p0), %s2235_s17, 4294966784  ;;  %p21_p5 = scmp.ge.s32.totalorder %s3150_s14, 4   ;;  %s3960_s21 = smov %s2998_s22 }
 0x4bd   : > { %s3961_s22 = smov %s3002_s23  ;;  %s3962_s23 = smov %s3166_s20 }
 0x4be   : > { %s3963_s24 = smov %s3150_s14  ;;  %23 = sbr.rel (!%p21_p5) target bundleno = 7 (0x7), region = 105 }
 0x4c3   :  { %2241 = vsyncpa [#allocation4], 1 }
 0x4c4   :  { %2243 = vsyncpa [#allocation4 + $0x1], 1 }
 0x4c5   :  { %2244 = vsyncpa [#allocation7], 1 }
 0x4c6   :  { %2245 = vsyncpa [#allocation10], 1 }
 0x4c7   :  { %2246 = vsyncpa [#allocation5], 1 }
 0x4c8   :  { %2248 = vsyncpa [#allocation5 + $0x1], 1 }

// kernel: tpu_custom_call.1
= control target key start
LH: loop header
LB: loop body
LE: loop exit
PB: predicated region body
PF: predicated region fallthrough
CT: control target
= control target key end

     0   :  { %11 = vsyncpa [#allocation4], 0  ;;  %s3942_s0 = inlined_call_operand.hbm [shape: f32[4,16,64], index: 0, kind: input, shape index: {}]   ;;  %s3943_s1 = inlined_call_operand.hbm [shape: f32[64,64], index: 1, kind: input, shape index: {}]   ;;  %s3944_s2 = inlined_call_operand.hbm [shape: f32[64,64], index: 2, kind: input, shape index: {}]   ;;  %s3945_s3 = inlined_call_operand.hbm [shape: f32[64,64], index: 3, kind: input, shape index: {}]   ;;  %s3946_s4 = inlined_call_operand.hbm [shape: f32[64,64], index: 4, kind: input, shape index: {}]   ;;  %s3947_s5 = inlined_call_operand.vmem [shape: f32[1,64], index: 5, kind: input, shape index: {}]   ;;  %s3948_s6 = inlined_call_operand.hbm [shape: f32[4,16,64], index: 6, kind: output, shape index: {}]  }
   0x1   :  { %13 = vsyncpa [#allocation4 + $0x1], 0 }
   0x2   :  { %14 = vsyncpa [#allocation7], 0 }
   0x3   :  { %15 = vsyncpa [#allocation10], 0 }
   0x4   :  { %16 = vsyncpa [#allocation5], 0 }
   0x5   :  { %18 = vsyncpa [#allocation5 + $0x1], 0  ;;  %s3064_s21 = smov 0   ;;  %s3066_s22 = smov 0  }
   0x6   :  { %s3068_s23 = smov 0   ;;  %s3070_s24 = smov 0  }
   0x7 LB: > { %s3085_s25 = sadd.s32 4294967295, %s3006_s24   ;;  %s2331_s26 = sadd.s32 4294967294, %s3006_s24   ;;  %s3006_s24 = sphi %s3070_s24, %s3963_s24   ;;  %s3002_s23 = sphi %s3068_s23, %s3962_s23   ;;  %s2998_s22 = sphi %s3066_s22, %s3961_s22   ;;  %s2994_s21 = sphi %s3064_s21, %s3960_s21  }
   0x8   : > { %p44_p0 = scmp.ne.s32.totalorder %s2998_s22, %s2994_s21  ;;  %p45_p1 = scmp.eq.s32.totalorder %s3085_s25, 0 }
   0x9   : > { %p173_p2 = scmp.eq.s32.totalorder %s3085_s25, 1  ;;  %p179_p3 = scmp.eq.s32.totalorder %s2331_s26, 1 }
   0xa   : > { %p3094_p4 = por %p45_p1, %p44_p0  ;;  %p2332_p5 = scmp.ge.s32.totalorder %s3006_s24, 1 }
   0xb   : > { %p3099_p6 = por %p179_p3, %p44_p0  ;;  %p186_p7 = scmp.lt.s32.totalorder %s3006_s24, 3 }
   0xc   : > { %s197_s7 = sshll.u32 %s3943_s1, 4  ;;  %s3008_s9 = smov [#allocation6]   ;;  %s198_s7 = int_to_ptr.hbm [resolvable:$true] %s197_s7 }
   0xd   : > { %p3107_p8 = pnand %p2332_p5, %p186_p7  ;;  %s199_s10 = sshll.u32 %s3008_s9, 4  ;;  %s200_s10 = int_to_ptr.vmem [resolvable:$true] %s199_s10 }
   0xe   : > { %s225_s14 = sshll.u32 %s3945_s3, 4  ;;  %s3949_s15 = smov 128   ;;  %s226_s14 = int_to_ptr.hbm [resolvable:$true] %s225_s14 }
   0xf   : > { %p2499_p9 = pneg %p3107_p8  ;;  %s3950_s16 = smov 8  }
  0x10   : > { %s3011_s17 = smov [#allocation9]   ;;  %s211_s26 = sshll.u32 %s3944_s2, 4  ;;  %s212_s26 = int_to_ptr.hbm [resolvable:$true] %s211_s26 }
  0x11   : > { %p3115_p10 = pnand %p2499_p9, %p45_p1  ;;  %s227_s18 = sshll.u32 %s3011_s17, 4  ;;  %s228_s18 = int_to_ptr.vmem [resolvable:$true] %s227_s18 }
  0x12   : > { %s3012_s9 = smov [#allocation8]   ;;  %s3013_s12 = smov [#allocation11]  }
  0x13   : > { %2502 = dma.hbm_to_vmem [thread:$0]  (!%p3115_p10), %s198_s7, 1024, %s200_s10, [#allocation7], %s3949_s15, %s3949_s15, %s3950_s16  }
  0x14   : > { %2508 = dma.hbm_to_vmem [thread:$0]  (!%p3115_p10), %s226_s14, 1024, %s228_s18, [#allocation10], %s3949_s15, %s3949_s15, %s3950_s16  }
  0x15   : > { %s239_s7 = sshll.u32 %s3946_s4, 4  ;;  %s213_s10 = sshll.u32 %s3012_s9, 4  ;;  %s240_s7 = int_to_ptr.hbm [resolvable:$true] %s239_s7  ;;  %s214_s10 = int_to_ptr.vmem [resolvable:$true] %s213_s10 }
  0x16   : > { %2505 = dma.hbm_to_vmem [thread:$0]  (!%p3115_p10), %s212_s26, 1024, %s214_s10, [#allocation7], %s3949_s15, %s3949_s15, %s3950_s16  }
  0x17   : > { %s241_s13 = sshll.u32 %s3013_s12, 4  ;;  %s3150_s14 = sadd.s32 1, %s3006_s24   ;;  %s242_s13 = int_to_ptr.vmem [resolvable:$true] %s241_s13 }
  0x18   : > { %2511 = dma.hbm_to_vmem [thread:$0]  (!%p3115_p10), %s240_s7, 1024, %s242_s13, [#allocation10], %s3949_s15, %s3949_s15, %s3950_s16  }
  0x19   : > { %s31_s17 = sadd.s32 1, %s3002_s23  ;;  %s28_s18 = ssub.s32 %s3006_s24, %s3150_s14 }
  0x1a   : > { %p38_p12 = scmp.ne.s32.totalorder %s3002_s23, %s2998_s22  ;;  %p29_p13 = scmp.eq.s32.totalorder %s28_s18, 0 }
  0x1b   : > { %p39_p0 = scmp.eq.s32.totalorder %s3006_s24, 0  ;;  %p2524_p5 = scmp.lt.s32.totalorder %s3006_s24, 2 }
  0x1c   : > { %p3160_p3 = por %p173_p2, %p38_p12  ;;  %s258_s11 = sand.u32 1, %s3002_s23  }
  0x1d   : > { %s3166_s20 = scalar_select %p29_p13, %s3002_s23, %s31_s17  }
  0x1e   : > { %p40_p7 = por %p39_p0, %p38_p12  ;;  %s2338_s26 = sshll.u32 %s258_s11, 5 }
  0x1f   : > { %s2468_s29 = sshll.u32 %s3006_s24, 5  ;;  %s262_s10 = scalar_lea.vmem [#allocation3], %s2338_s26 }
  0x20   : > { %s268_s9 = scalar_lea.hbm %s3942_s0, %s2468_s29  ;;  %s271_s12 = sshll.u32 %s262_s10, 4  ;;  %s272_s12 = int_to_ptr.vmem [resolvable:$true] %s271_s12 }
  0x21   : > { %s269_s13 = sshll.u32 %s268_s9, 4  ;;  %p3173_p2 = pnand %p2524_p5, %p40_p7  ;;  %s270_s13 = int_to_ptr.hbm [resolvable:$true] %s269_s13 }
  0x22   : > { %s259_s17 = scalar_lea.sflag [#allocation4], %s258_s11  ;;  %s2902_s15 = sshra.s32 %s270_s13, 4  ;;  %s2903_s15 = int_to_ptr.hbm [resolvable:$true] %s2902_s15 }
  0x23   : > { %s2904_s16 = scalar_lea.hbm %s2903_s15, 32  ;;  %p2906_p10 = pneg %p3173_p2 }
  0x24   : > { %p2905_p9 = scmp.ne.s32.totalorder %s2903_s15, %s2904_s16  ;;  %s2909_s30 = scalar_lea.hbm %s3942_s0, 64 }
  0x25   : > { %p2910_p0 = scmp.lt.s32.totalorder %s2903_s15, %s3942_s0  ;;  %p2911_p5 = scmp.lt.s32.totalorder %s2909_s30, %s2904_s16 }
  0x26   : > { %p2907_p12 = pnand %p2906_p10, %p2905_p9 }
  0x27   : > { %p2912_p7 = por %p2911_p5, %p2910_p0 }
  0x28   : > { %p2908_p13 = pneg %p2907_p12 }
  0x2a   : > { %p2913_p11 = pnand %p2912_p7, %p2908_p13 }
  0x2c   : > { %2916 = shalt.err (!%p2913_p11)
}
  0x2d   : > { %s3957_s11 = smov 8   ;;  %s3958_s10 = smov 128  }
  0x2e   : > { %2515 = dma.hbm_to_vmem [thread:$0]  (!%p3173_p2), %s270_s13, 512, %s272_s12, %s259_s17, %s3958_s10, %s3958_s10, %s3957_s11  }
  0x2f   : > { %283 = sbr.rel (%p3107_p8) target bundleno = 1205 (0x4b5), region = 44  ;;  %s3193_s29 = sand.u32 (!%p3107_p8), 1, %s2998_s22  }
  0x30   : > { %s2343_s15 = sshll.u32 (!%p3107_p8), %s3193_s29, 5  ;;  %s286_s16 = scalar_lea.sflag (!%p3107_p8), [#allocation4], %s3193_s29 }
  0x31   : > { %s3199_s26 = scalar_lea.vmem (!%p3107_p8), [#allocation3], %s2343_s15 }
  0x34   : > { %2977 = dma.done.wait (%p3094_p4), %s286_s16, 512  }
  0x35   : > { %2979 = vsyncadd (%p3094_p4), %s286_s16, 4294966784 }
  0x36   : > { %2981 = dma.done.wait (%p45_p1), [#allocation7], 2048  }
  0x37   : > { %2983 = vsyncadd (%p45_p1), [#allocation7], 4294965248 }
  0x38   : > { %2985 = dma.done.wait (%p45_p1), [#allocation10], 2048  }
  0x39   : > { %2987 = vsyncadd (%p45_p1), [#allocation10], 4294965248  ;;  %v352_v0 = vld [vmem:[#allocation6 + $0x38] sm:$0xff]  ;;  %v351_v2 = vld [vmem:[#allocation6 + $0x30] sm:$0xff]  ;;  %vm353_vm0 = vcmask 523264   ;;  %s3014_s27 = smov 120  }
  0x3a   : > { %v402_v1 = vld [vmem:[#allocation8 + $0x38] sm:$0xff]  ;;  %374 = vmatpush.msra.mxu0 %v352_v0  ;;  %v401_v3 = vld [vmem:[#allocation8 + $0x30] sm:$0xff]  ;;  %v350_v4 = vld [vmem:[#allocation6 + $0x28] sm:$0xff]  ;;  %s3015_s8 = smov 104   ;;  %vm469_vm1 = vcmask 64512   ;;  %s3016_s12 = smov 96  }
  0x3b   : > { %411 = vmatpush.msra.mxu1 %v402_v1  ;;  %v400_v5 = vld [vmem:[#allocation8 + $0x28] sm:$0xff]  ;;  %2471 = vmatpush.msra.mxu2 %v402_v1  ;;  %v349_v6 = vld [vmem:[#allocation6 + $0x20] sm:$0xff]  ;;  %v348_v8 = vld [vmem:[#allocation6 + $0x18] sm:$0xff]  ;;  %s3017_s13 = smov 112   ;;  %s3018_s18 = smov 88   ;;  %vm540_vm2 = vcmask 130048  }
  0x3c   : > { %375 = vmatpush.msra.mxu0 %v351_v2  ;;  %v399_v7 = vld [vmem:[#allocation8 + $0x20] sm:$0xff]  ;;  %v398_v9 = vld [vmem:[#allocation8 + $0x18] sm:$0xff]  ;;  %v347_v10 = vld [vmem:[#allocation6 + $0x10] sm:$0xff]  ;;  %s3019_s17 = smov 80   ;;  %s3020_s30 = smov 72   ;;  %vm859_vm3 = vcmask 130112  }
  0x3d   : > { %412 = vmatpush.msra.mxu1 %v401_v3  ;;  %2472 = vmatpush.msra.mxu2 %v401_v3  ;;  %v397_v11 = vld [vmem:[#allocation8 + $0x10] sm:$0xff]  ;;  %v346_v12 = vld [vmem:[#allocation6 + $0x8] sm:$0xff]  ;;  %v345_v14 = vld [vmem:[#allocation6] sm:$0xff]  ;;  %s3021_s7 = smov 16   ;;  %s3022_s9 = smov 32   ;;  %vm1072_vm4 = vcmask 195712  }
  0x3e   : > { %376 = vmatpush.msra.mxu0 %v350_v4  ;;  %v396_v13 = vld [vmem:[#allocation8 + $0x8] sm:$0xff]  ;;  %v395_v15 = vld [vmem:[#allocation8] sm:$0xff]  ;;  %v343_v17 = vld [vmem:[%s3199_s26 + $0x10] sm:$0xff]  ;;  %s3023_s11 = smov 8   ;;  %s3024_s10 = smov 40   ;;  %vm1285_vm5 = vcmask 261312  }
  0x3f   : > { %413 = vmatpush.msra.mxu1 %v400_v5  ;;  %2473 = vmatpush.msra.mxu2 %v400_v5  ;;  %v341_v16 = vld [vmem:[%s3199_s26] sm:$0xff]  ;;  %v439_v18 = vld [vmem:[#allocation9 + $0x38] sm:$0xff]  ;;  %v438_v19 = vld [vmem:[#allocation9 + $0x30] sm:$0xff]  ;;  %s3025_s16 = smov 24   ;;  %vm1498_vm6 = vcmask 326912   ;;  %vm1711_vm7 = vcmask 392512  }
  0x40   : > { %377 = vmatpush.msra.mxu0 %v349_v6  ;;  %v437_v20 = vld [vmem:[#allocation9 + $0x28] sm:$0xff]  ;;  %v436_v22 = vld [vmem:[#allocation9 + $0x20] sm:$0xff]  ;;  %v344_v23 = vld [vmem:[%s3199_s26 + $0x18] sm:$0xff]  ;;  %vm1924_vm8 = vcmask 458112   ;;  %vm2137_vm9 = vcmask 523712  }
  0x41   : > { %414 = vmatpush.msra.mxu1 %v399_v7  ;;  %2474 = vmatpush.msra.mxu2 %v399_v7  ;;  %v342_v21 = vld [vmem:[%s3199_s26 + $0x8] sm:$0xff]  ;;  %v435_v24 = vld [vmem:[#allocation9 + $0x18] sm:$0xff]  ;;  %v434_v25 = vld [vmem:[#allocation9 + $0x10] sm:$0xff]  ;;  %s3026_s26 = smov 56  }
  0x42   : > { %378 = vmatpush.msra.mxu0 %v348_v8  ;;  %v433_v26 = vld [vmem:[#allocation9 + $0x8] sm:$0xff]  ;;  %v432_v27 = vld [vmem:[#allocation9] sm:$0xff] }
  0x43   : > { %415 = vmatpush.msra.mxu1 %v398_v9  ;;  %2475 = vmatpush.msra.mxu2 %v398_v9 }
  0x44   : > { %379 = vmatpush.msra.mxu0 %v347_v10 }
  0x45   : > { %416 = vmatpush.msra.mxu1 %v397_v11  ;;  %2476 = vmatpush.msra.mxu2 %v397_v11 }
  0x46   : > { %380 = vmatpush.msra.mxu0 %v346_v12 }
  0x47   : > { %417 = vmatpush.msra.mxu1 %v396_v13  ;;  %2477 = vmatpush.msra.mxu2 %v396_v13 }
  0x48   : > { %381 = vmatpush.msra.mxu0 %v345_v14 }
  0x49   : > { %418 = vmatpush.msra.mxu1 %v395_v15  ;;  %2349 = vmatmul.msk.f32.vlgmr.msra.gmra.mxu0 %vm353_vm0, %v341_v16 }
  0x4a   : > { %2353 = vmatmul.msk.f32.vlgmr.msra.gmra.mxu1 %vm353_vm0, %v341_v16  ;;  %2478 = vmatpush.msra.mxu2 %v395_v15 }
  0x4b   : > { %2355 = vmatmul.msk.f32.vlgmr.msra.gmra.mxu2 %vm353_vm0, %v343_v17 }
  0x4c   : > { %448 = vmatpush.msrb.mxu2 %v439_v18 }
  0x4e   : > { %449 = vmatpush.msrb.mxu2 %v438_v19 }
  0x50   : > { %450 = vmatpush.msrb.mxu2 %v437_v20 }
  0x51   : > { %2350 = vmatmul.msk.f32.gmra.mxu0 %vm353_vm0, %v342_v21 }
  0x52   : > { %2354 = vmatmul.msk.f32.gmra.mxu1 %vm353_vm0, %v342_v21  ;;  %451 = vmatpush.msrb.mxu2 %v436_v22 }
  0x53   : > { %2356 = vmatmul.msk.f32.gmra.mxu2 %vm353_vm0, %v344_v23 }
  0x54   : > { %452 = vmatpush.msrb.mxu2 %v435_v24 }
  0x56   : > { %453 = vmatpush.msrb.mxu2 %v434_v25 }
  0x58   : > { %454 = vmatpush.msrb.mxu2 %v433_v26 }
  0x59   : > { %2351 = vmatmul.msk.f32.gmra.mxu0 %vm353_vm0, %v343_v17 }
  0x5a   : > { %455 = vmatpush.msrb.mxu2 %v432_v27 }
  0x5b   : > { %2357 = vmatmul.msk.f32.vlgmr.msrb.gmra.mxu2 %vm353_vm0, %v341_v16 }
  0x61   : > { %2352 = vmatmul.msk.f32.gmra.mxu0 %vm353_vm0, %v344_v23 }
  0x63   : > { %2358 = vmatmul.msk.f32.gmra.mxu2 %vm353_vm0, %v342_v21 }
  0x6b   : > { %2359 = vmatmul.msk.f32.gmra.mxu2 %vm353_vm0, %v343_v17 }
  0x73   : > { %2360 = vmatmul.msk.f32.gmra.mxu2 %vm353_vm0, %v344_v23 }
  0xc6   : > { %v3229_v28 = vpop.f32.mrf.mxu0 }
  0xc7   : > { %v3231_v29 = vpop.f32.mrf.mxu1  ;;  %1077 = vrot.lane.b32.xlu2 %v3229_v28, %s3015_s8  ;;  %647 = vrot.lane.b32.xlu1 %v3229_v28, %s3014_s27 }
  0xc8   : > { %651 = vrot.lane.b32.xlu0 %v3231_v29, %s3014_s27 }
  0xce   : > { %v3241_v31 = vpop.f32.mrf.mxu2  ;;  %v3267_v33 = vpop.f32.mrf.mxu0 }
  0xcf   : > { %v3239_v30 = vpop.f32.mrf.mxu1  ;;  %1294 = vrot.lane.b32.xlu2 %v3231_v29, %s3016_s12  ;;  %868 = vrot.lane.b32.xlu1 %v3231_v29, %s3017_s13 }
  0xd0   : > { %2361 = vmatpush.xpose.msk.msra.mxu3 %vm469_vm1, %v3239_v30  ;;  %864 = vrot.lane.b32.xlu0 %v3229_v28, %s3017_s13 }
  0xd4   : > { %2362 = vmatpush.xpose.msk.msra.mxu3 %vm469_vm1, %v3231_v29 }
  0xd6   : > { %v3255_v32 = vpop.f32.mrf.mxu2  ;;  %v3277_v34 = vpop.f32.mrf.mxu0 }
  0xd7   : > { %2363 = vmatmul.msk.f32.vlgmr.msra.gmra.mxu3 %vm469_vm1, %v3229_v28  ;;  %907 = vrot.lane.b32.xlu2 %v3241_v31, %s3017_s13 }
  0xd8   : > { %2365 = vmatpush.xpose.msk.msrb.mxu3 %vm469_vm1, %v3255_v32  ;;  %1081 = vrot.lane.b32.xlu0 %v3231_v29, %s3015_s8 }
  0xd9   : > { %1290 = vrot.lane.b32.xlu1 %v3229_v28, %s3016_s12 }
  0xdc   : > { %2366 = vmatpush.xpose.msk.msrb.mxu3 %vm469_vm1, %v3241_v31 }
  0xde   : > { %v3293_v35 = vpop.f32.mrf.mxu0  ;;  %v457_v36 = vpop.f32.mrf.mxu2 }
  0xdf   : > { %2364 = vmatmul.msk.f32.gmra.mxu3 %vm469_vm1, %v3267_v33  ;;  %870 = vrot.lane.b32.xlu2 %v3239_v30, %s3017_s13 }
  0xe0   : > { %690 = vrot.lane.b32.xlu0 %v3241_v31, %s3014_s27 }
  0xe1   : > { %1120 = vrot.lane.b32.xlu1 %v3241_v31, %s3015_s8 }
  0xe6   : > { %v460_v38 = vpop.f32.mrf.mxu2 }
  0xe7   : > { %2367 = vmatmul.msk.f32.vlgmr.msrb.gmra.mxu3 %vm469_vm1, %v3277_v34  ;;  %866 = vrot.lane.b32.xlu2 %v3267_v33, %s3017_s13  ;;  %v3388_v59 = vpack.i.bf16 %v457_v36, %v460_v38 }
  0xe8   : > { %653 = vrot.lane.b32.xlu0 %v3239_v30, %s3014_s27  ;;  %597 = vmatpush.msra.mxu3 %v460_v38 }
  0xe9   : > { %1507 = vrot.lane.b32.xlu1 %v3231_v29, %s3018_s18 }
  0xea   : > { %598 = vmatpush.msra.mxu3 %v457_v36 }
  0xee   : > { %v463_v40 = vpop.f32.mrf.mxu2 }
  0xef   : > { %1509 = vrot.lane.b32.xlu2 %v3239_v30, %s3018_s18  ;;  %2368 = vmatmul.msk.f32.gmra.mxu3 %vm469_vm1, %v3293_v35 }
  0xf0   : > { %1333 = vrot.lane.b32.xlu0 %v3241_v31, %s3016_s12 }
  0xf1   : > { %649 = vrot.lane.b32.xlu1 %v3267_v33, %s3014_s27 }
  0xf6   : > { %v466_v42 = vpop.f32.mrf.mxu2 }
  0xf7   : > { %692 = vrot.lane.b32.xlu2 %v3255_v32, %s3014_s27  ;;  %626 = vmatpush.msrb.mxu0 %v466_v42  ;;  %v3378_v55 = vpack.i.bf16 %v463_v40, %v466_v42 }
  0xf8   : > { %1296 = vrot.lane.b32.xlu0 %v3239_v30, %s3016_s12 }
  0xf9   : > { %1083 = vrot.lane.b32.xlu1 %v3239_v30, %s3015_s8  ;;  %627 = vmatpush.msrb.mxu0 %v463_v40 }
  0xff   : > { %1122 = vrot.lane.b32.xlu2 %v3255_v32, %s3015_s8 }
 0x100   : > { %1292 = vrot.lane.b32.xlu0 %v3267_v33, %s3016_s12 }
 0x101   : > { %1079 = vrot.lane.b32.xlu1 %v3267_v33, %s3015_s8 }
 0x107   : > { %686 = vrot.lane.b32.xlu2 %v3277_v34, %s3014_s27 }
 0x108   : > { %909 = vrot.lane.b32.xlu0 %v3255_v32, %s3017_s13 }
 0x109   : > { %1335 = vrot.lane.b32.xlu1 %v3255_v32, %s3016_s12 }
 0x10f   : > { %1329 = vrot.lane.b32.xlu2 %v3277_v34, %s3016_s12 }
 0x110   : > { %1116 = vrot.lane.b32.xlu0 %v3277_v34, %s3015_s8 }
 0x111   : > { %903 = vrot.lane.b32.xlu1 %v3277_v34, %s3017_s13 }
 0x117   : > { %1505 = vrot.lane.b32.xlu2 %v3267_v33, %s3018_s18 }
 0x118   : > { %905 = vrot.lane.b32.xlu0 %v3293_v35, %s3017_s13 }
 0x119   : > { %688 = vrot.lane.b32.xlu1 %v3293_v35, %s3014_s27 }
 0x11f   : > { %1546 = vrot.lane.b32.xlu2 %v3241_v31, %s3018_s18 }
 0x120   : > { %1503 = vrot.lane.b32.xlu0 %v3229_v28, %s3018_s18 }
 0x121   : > { %1722 = vrot.lane.b32.xlu1 %v3239_v30, %s3019_s17  ;;  %v3333_v37 = vpop.permute.xlu2 %1077 }
 0x127   : > { %1716 = vrot.lane.b32.xlu2 %v3229_v28, %s3019_s17 }
 0x128   : > { %1548 = vrot.lane.b32.xlu0 %v3255_v32, %s3018_s18 }
 0x129   : > { %1542 = vrot.lane.b32.xlu1 %v3277_v34, %s3018_s18  ;;  %v3341_v39 = vpop.permute.xlu2 %1294 }
 0x12f   : > { %1761 = vrot.lane.b32.xlu2 %v3255_v32, %s3019_s17 }
 0x130   : > { %1720 = vrot.lane.b32.xlu0 %v3231_v29, %s3019_s17 }
 0x131   : > { %1718 = vrot.lane.b32.xlu1 %v3267_v33, %s3019_s17  ;;  %v3349_v41 = vpop.permute.xlu2 %907 }
 0x137   : > { %1933 = vrot.lane.b32.xlu2 %v3231_v29, %s3020_s30 }
 0x138   : > { %1935 = vrot.lane.b32.xlu0 %v3239_v30, %s3020_s30 }
 0x139   : > { %1759 = vrot.lane.b32.xlu1 %v3241_v31, %s3019_s17  ;;  %v871_v44 = vpop.permute.xlu2 %870  ;;  %v648_v45 = vpop.permute.xlu1 %647 }
 0x13a   : > { %v652_v43 = vpop.permute.xlu0 %651 }
 0x13f   : > { %1118 = vrot.lane.b32.xlu2 %v3293_v35, %s3015_s8 }
 0x140   : > { %1755 = vrot.lane.b32.xlu0 %v3277_v34, %s3019_s17 }
 0x141   : > { %1929 = vrot.lane.b32.xlu1 %v3229_v28, %s3020_s30  ;;  %v867_v46 = vpop.permute.xlu2 %866  ;;  %v869_v48 = vpop.permute.xlu1 %868 }
 0x142   : > { %v865_v47 = vpop.permute.xlu0 %864 }
 0x147   : > { %1972 = vrot.lane.b32.xlu2 %v3241_v31, %s3020_s30 }
 0x148   : > { %1544 = vrot.lane.b32.xlu0 %v3293_v35, %s3018_s18 }
 0x149   : > { %1331 = vrot.lane.b32.xlu1 %v3293_v35, %s3016_s12  ;;  %v1510_v49 = vpop.permute.xlu2 %1509 }
 0x14a   : > { %v1082_v50 = vpop.permute.xlu0 %1081 }
 0x14b   : > { %v3369_v51 = vpop.permute.xlu1 %1290 }
 0x14f   : > { %1757 = vrot.lane.b32.xlu2 %v3293_v35, %s3019_s17 }
 0x150   : > { %1931 = vrot.lane.b32.xlu0 %v3267_v33, %s3020_s30 }
 0x151   : > { %1974 = vrot.lane.b32.xlu1 %v3255_v32, %s3020_s30  ;;  %v693_v52 = vpop.permute.xlu2 %692 }
 0x152   : > { %v691_v53 = vpop.permute.xlu0 %690  ;;  %2377 = vmatpush.xpose.msk.msra.mxu2 %vm469_vm1, %v693_v52 }
 0x153   : > { %v1121_v54 = vpop.permute.xlu1 %1120 }
 0x156   : > { %2378 = vmatpush.xpose.msk.msra.mxu2 %vm469_vm1, %v691_v53 }
 0x157   : > { %2604 = vrot.lane.b32.xlu2 %v3378_v55, %s3014_s27 }
 0x158   : > { %1968 = vrot.lane.b32.xlu0 %v3277_v34, %s3020_s30 }
 0x159   : > { %1970 = vrot.lane.b32.xlu1 %v3293_v35, %s3020_s30  ;;  %v1123_v56 = vpop.permute.xlu2 %1122 }
 0x15a   : > { %v654_v57 = vpop.permute.xlu0 %653  ;;  %v3436_v14 = vpop.f32.mrf.mxu3 }
 0x15b   : > { %v1508_v58 = vpop.permute.xlu1 %1507  ;;  %2373 = vmatpush.xpose.msk.msrb.mxu1 %vm469_vm1, %v654_v57  ;;  %v541_v15 = vsel %vm540_vm2, %v3436_v14, -inf }
 0x15f   : > { %2374 = vmatpush.xpose.msk.msrb.mxu1 %vm469_vm1, %v652_v43  ;;  %2609 = vrot.lane.b32.xlu2 %v3378_v55, %s3017_s13 }
 0x160   : > { %2584 = vrot.lane.b32.xlu0 %v3388_v59, %s3014_s27  ;;  %s3027_s27 = smov 48  }
 0x161   : > { %2589 = vrot.lane.b32.xlu1 %v3388_v59, %s3017_s13  ;;  %v687_v60 = vpop.permute.xlu2 %686  ;;  %s338_s13 = scalar_lea.vmem [#allocation12], %s2343_s15  ;;  %s2204_s15 = scalar_lea.sflag [#allocation5], %s3193_s29 }
 0x162   : > { %v1334_v61 = vpop.permute.xlu0 %1333  ;;  %2375 = vmatmul.msk.f32.vlgmr.msrb.gmra.mxu1 %vm469_vm1, %v648_v45  ;;  %2379 = vmatmul.msk.f32.vlgmr.msra.gmra.mxu2 %vm469_vm1, %v687_v60  ;;  %v3445_v19 = vpop.f32.mrf.mxu3 }
 0x163   : > { %2385 = vmatpush.xpose.msk.msra.mxu1 %vm469_vm1, %v871_v44  ;;  %v650_v62 = vpop.permute.xlu1 %649  ;;  %v544_v21 = vsel %vm540_vm2, %v3445_v19, -inf }
 0x167   : > { %2386 = vmatpush.xpose.msk.msra.mxu1 %vm469_vm1, %v869_v48  ;;  %2619 = vrot.lane.b32.xlu2 %v3388_v59, %s3018_s18 }
 0x168   : > { %2594 = vrot.lane.b32.xlu0 %v3388_v59, %s3015_s8 }
 0x169   : > { %2599 = vrot.lane.b32.xlu1 %v3388_v59, %s3016_s12  ;;  %v3407_v63 = vpop.permute.xlu2 %1329 }
 0x16a   : > { %v1297_v0 = vpop.permute.xlu0 %1296  ;;  %2376 = vmatmul.msk.f32.gmra.mxu1 %vm469_vm1, %v650_v62  ;;  %v3452_v24 = vpop.f32.mrf.mxu3 }
 0x16b   : > { %v1084_v1 = vpop.permute.xlu1 %1083  ;;  %v547_v43 = vsel %vm540_vm2, %v3452_v24, -inf }
 0x16c   : > { %2397 = vmatpush.xpose.msk.msrb.mxu1 %vm469_vm1, %v1084_v1 }
 0x170   : > { %2398 = vmatpush.xpose.msk.msrb.mxu1 %vm469_vm1, %v1082_v50  ;;  %2614 = vrot.lane.b32.xlu0 %v3378_v55, %s3015_s8  ;;  %s2952_s8 = scalar_lea.hbm %s3948_s6, 64 }
 0x171   : > { %2624 = vrot.lane.b32.xlu1 %v3378_v55, %s3016_s12  ;;  %v1506_v2 = vpop.permute.xlu2 %1505 }
 0x172   : > { %v1293_v3 = vpop.permute.xlu0 %1292  ;;  %2387 = vmatmul.msk.f32.vlgmr.msra.gmra.mxu1 %vm469_vm1, %v865_v47  ;;  %v3458_v28 = vpop.f32.mrf.mxu3 }
 0x173   : > { %v1080_v4 = vpop.permute.xlu1 %1079  ;;  %v550_v32 = vsel %vm540_vm2, %v3458_v28, -inf }
 0x174   : > { %2409 = vmatpush.xpose.msk.msra.mxu1 %vm469_vm1, %v1297_v0 }
 0x178   : > { %2410 = vmatpush.xpose.msk.msra.mxu1 %vm469_vm1, %v3341_v39 }
 0x179   : > { %2629 = vrot.lane.b32.xlu1 %v3388_v59, %s3019_s17  ;;  %v1547_v5 = vpop.permute.xlu2 %1546 }
 0x17a   : > { %v910_v6 = vpop.permute.xlu0 %909  ;;  %2388 = vmatmul.msk.f32.gmra.mxu1 %vm469_vm1, %v867_v46 }
 0x17b   : > { %v1336_v7 = vpop.permute.xlu1 %1335  ;;  %2389 = vmatpush.xpose.msk.msrb.mxu2 %vm469_vm1, %v910_v6 }
 0x17f   : > { %2390 = vmatpush.xpose.msk.msrb.mxu2 %vm469_vm1, %v3349_v41 }
 0x181   : > { %2634 = vrot.lane.b32.xlu1 %v3378_v55, %s3018_s18  ;;  %v1717_v8 = vpop.permute.xlu2 %1716  ;;  %s2470_s18 = sshll.u32 %s3085_s25, 5 }
 0x182   : > { %2399 = vmatmul.msk.f32.vlgmr.msrb.gmra.mxu1 %vm469_vm1, %v3333_v37  ;;  %v1117_v9 = vpop.permute.xlu0 %1116 }
 0x183   : > { %2401 = vmatpush.xpose.msk.msra.mxu2 %vm469_vm1, %v1123_v56  ;;  %v904_v10 = vpop.permute.xlu1 %903  ;;  %2421 = vmatpush.xpose.msk.msrb.mxu1 %vm469_vm1, %v1510_v49 }
 0x187   : > { %2402 = vmatpush.xpose.msk.msra.mxu2 %vm469_vm1, %v1121_v54  ;;  %2422 = vmatpush.xpose.msk.msrb.mxu1 %vm469_vm1, %v1508_v58 }
 0x189   : > { %v1762_v11 = vpop.permute.xlu2 %1761 }
 0x18a   : > { %2400 = vmatmul.msk.f32.gmra.mxu1 %vm469_vm1, %v1080_v4  ;;  %v906_v12 = vpop.permute.xlu0 %905 }
 0x18b   : > { %v689_v13 = vpop.permute.xlu1 %688 }
 0x18c   : > { %2380 = vmatmul.msk.f32.gmra.mxu2 %vm469_vm1, %v689_v13 }
 0x190   : > { %542 = vmax.xlane.f32.xlu2 %v541_v15 }
 0x191   : > { %v1934_v16 = vpop.permute.xlu2 %1933 }
 0x192   : > { %2411 = vmatmul.msk.f32.vlgmr.msra.gmra.mxu1 %vm469_vm1, %v3369_v51  ;;  %v1504_v17 = vpop.permute.xlu0 %1503 }
 0x193   : > { %v1723_v18 = vpop.permute.xlu1 %1722 }
 0x194   : > { %2391 = vmatmul.msk.f32.vlgmr.msrb.gmra.mxu2 %vm469_vm1, %v904_v10  ;;  %2433 = vmatpush.xpose.msk.msra.mxu1 %vm469_vm1, %v1723_v18 }
 0x195   : > { %2413 = vmatpush.xpose.msk.msrb.mxu2 %vm469_vm1, %v1336_v7 }
 0x199   : > { %2414 = vmatpush.xpose.msk.msrb.mxu2 %vm469_vm1, %v1334_v61  ;;  %v1119_v20 = vpop.permute.xlu2 %1118 }
 0x19a   : > { %2412 = vmatmul.msk.f32.gmra.mxu1 %vm469_vm1, %v1293_v3  ;;  %545 = vmax.xlane.f32.xlu0 %v544_v21  ;;  %v1549_v22 = vpop.permute.xlu0 %1548 }
 0x19b   : > { %v1543_v23 = vpop.permute.xlu1 %1542 }
 0x19c   : > { %2392 = vmatmul.msk.f32.gmra.mxu2 %vm469_vm1, %v906_v12 }
 0x1a1   : > { %v1973_v25 = vpop.permute.xlu2 %1972 }
 0x1a2   : > { %2423 = vmatmul.msk.f32.vlgmr.msrb.gmra.mxu1 %vm469_vm1, %v1504_v17  ;;  %v1721_v26 = vpop.permute.xlu0 %1720 }
 0x1a3   : > { %v1719_v27 = vpop.permute.xlu1 %1718  ;;  %2434 = vmatpush.xpose.msk.msra.mxu1 %vm469_vm1, %v1721_v26 }
 0x1a4   : > { %2403 = vmatmul.msk.f32.vlgmr.msra.gmra.mxu2 %vm469_vm1, %v1117_v9 }
 0x1a5   : > { %2425 = vmatpush.xpose.msk.msra.mxu2 %vm469_vm1, %v1549_v22 }
 0x1a8   : > { %2639 = vrot.lane.b32.xlu2 %v3388_v59, %s3020_s30 }
 0x1a9   : > { %2426 = vmatpush.xpose.msk.msra.mxu2 %vm469_vm1, %v1547_v5  ;;  %v1758_v29 = vpop.permute.xlu2 %1757 }
 0x1aa   : > { %2424 = vmatmul.msk.f32.gmra.mxu1 %vm469_vm1, %v1506_v2  ;;  %v1936_v30 = vpop.permute.xlu0 %1935 }
 0x1ab   : > { %v1760_v31 = vpop.permute.xlu1 %1759  ;;  %551 = vmax.xlane.f32.xlu1 %v550_v32  ;;  %2445 = vmatpush.xpose.msk.msrb.mxu1 %vm469_vm1, %v1936_v30 }
 0x1ac   : > { %2404 = vmatmul.msk.f32.gmra.mxu2 %vm469_vm1, %v1119_v20 }
 0x1af   : > { %2446 = vmatpush.xpose.msk.msrb.mxu1 %vm469_vm1, %v1934_v16 }
 0x1b1   : > { %v2605_v33 = vpop.permute.xlu2 %2604 }
 0x1b2   : > { %v1756_v34 = vpop.permute.xlu0 %1755  ;;  %2435 = vmatmul.msk.f32.vlgmr.msra.gmra.mxu1 %vm469_vm1, %v1717_v8  ;;  %v2607_v36 = vunpack.i.h.bf16 %v2605_v33  ;;  %v2606_v37 = vunpack.i.l.bf16 %v2605_v33 }
 0x1b3   : > { %v1930_v35 = vpop.permute.xlu1 %1929 }
 0x1b4   : > { %2415 = vmatmul.msk.f32.vlgmr.msrb.gmra.mxu2 %vm469_vm1, %v3407_v63  ;;  %826 = vmatpush.msra.mxu0 %v2606_v37 }
 0x1b5   : > { %2437 = vmatpush.xpose.msk.msrb.mxu2 %vm469_vm1, %v1762_v11 }
 0x1b6   : > { %827 = vmatpush.msra.mxu0 %v2607_v36 }
 0x1b9   : > { %2438 = vmatpush.xpose.msk.msrb.mxu2 %vm469_vm1, %v1760_v31  ;;  %v3504_v57 = vpop.permute.xlu2 %2609 }
 0x1ba   : > { %v1545_v38 = vpop.permute.xlu0 %1544  ;;  %2436 = vmatmul.msk.f32.gmra.mxu1 %vm469_vm1, %v1719_v27 }
 0x1bb   : > { %v1332_v39 = vpop.permute.xlu1 %1331 }
 0x1bc   : > { %2416 = vmatmul.msk.f32.gmra.mxu2 %vm469_vm1, %v1332_v39 }
 0x1c1   : > { %v3510_v60 = vpop.permute.xlu2 %2619 }
 0x1c2   : > { %v1932_v40 = vpop.permute.xlu0 %1931  ;;  %2447 = vmatmul.msk.f32.vlgmr.msrb.gmra.mxu1 %vm469_vm1, %v1930_v35 }
 0x1c3   : > { %v1975_v41 = vpop.permute.xlu1 %1974 }
 0x1c4   : > { %2427 = vmatmul.msk.f32.vlgmr.msra.gmra.mxu2 %vm469_vm1, %v1543_v23 }
 0x1c5   : > { %2449 = vmatpush.xpose.msk.msra.mxu2 %vm469_vm1, %v1975_v41 }
 0x1c9   : > { %2450 = vmatpush.xpose.msk.msra.mxu2 %vm469_vm1, %v1973_v25 }
 0x1ca   : > { %v1969_v42 = vpop.permute.xlu0 %1968  ;;  %2448 = vmatmul.msk.f32.gmra.mxu1 %vm469_vm1, %v1932_v40 }
 0x1cb   : > { %v1971_v53 = vpop.permute.xlu1 %1970 }
 0x1cc   : > { %2428 = vmatmul.msk.f32.gmra.mxu2 %vm469_vm1, %v1545_v38 }
 0x1d1   : > { %548 = vmax.xlane.f32.xlu2 %v547_v43 }
 0x1d2   : > { %v2585_v44 = vpop.permute.xlu0 %2584 }
 0x1d3   : > { %v2587_v45 = vunpack.i.h.bf16 %v2585_v44  ;;  %v2586_v46 = vunpack.i.l.bf16 %v2585_v44  ;;  %v2590_v5 = vpop.permute.xlu1 %2589 }
 0x1d4   : > { %2439 = vmatmul.msk.f32.vlgmr.msrb.gmra.mxu2 %vm469_vm1, %v1756_v34  ;;  %v2591_v8 = vunpack.i.l.bf16 %v2590_v5  ;;  %v2592_v12 = vunpack.i.h.bf16 %v2590_v5  ;;  %v2612_v5 = vunpack.i.h.bf16 %v3504_v57 }
 0x1d5   : > { %789 = vmatpush.msrb.mxu3 %v2586_v46 }
 0x1d7   : > { %790 = vmatpush.msrb.mxu3 %v2587_v45 }
 0x1da   : > { %v3512_v61 = vpop.permute.xlu0 %2594 }
 0x1db   : > { %v3549_v23 = vpop.permute.xlu1 %2599 }
 0x1dc   : > { %2440 = vmatmul.msk.f32.gmra.mxu2 %vm469_vm1, %v1758_v29 }
 0x1df   : > { %v3486_v47 = vpop.f32.mrf.mxu1 }
 0x1e0   : > { %v725_v48 = vsel %vm540_vm2, %v3486_v47, -inf }
 0x1e1   : > { %726 = vmax.xlane.f32.xlu1 %v725_v48 }
 0x1e2   : > { %v3518_v1 = vpop.permute.xlu0 %2614 }
 0x1e3   : > { %v3557_v29 = vpop.permute.xlu1 %2624 }
 0x1e4   : > { %2451 = vmatmul.msk.f32.vlgmr.msra.gmra.mxu2 %vm469_vm1, %v1969_v42 }
 0x1e5   : > { %v3491_v49 = vpop.f32.mrf.mxu2 }
 0x1e6   : > { %v731_v50 = vsel %vm540_vm2, %v3491_v49, -inf }
 0x1e7   : > { %v3495_v51 = vpop.f32.mrf.mxu1 }
 0x1e8   : > { %v728_v52 = vsel %vm540_vm2, %v3495_v51, -inf }
 0x1e9   : > { %729 = vmax.xlane.f32.xlu2 %v728_v52  ;;  %732 = vmax.xlane.f32.xlu1 %v731_v50 }
 0x1eb   : > { %v3569_v35 = vpop.permute.xlu1 %2629 }
 0x1ec   : > { %2452 = vmatmul.msk.f32.gmra.mxu2 %vm469_vm1, %v1971_v53 }
 0x1ef   : > { %v3500_v54 = vpop.f32.mrf.mxu1 }
 0x1f0   : > { %v942_v56 = vsel %vm540_vm2, %v3500_v54, -inf }
 0x1f1   : > { %943 = vmax.xlane.f32.xlu2 %v942_v56 }
 0x1f3   : > { %v3583_v42 = vpop.permute.xlu1 %2634 }
 0x1f7   : > { %v3506_v58 = vpop.f32.mrf.mxu1 }
 0x1f8   : > { %v945_v59 = vsel %vm540_vm2, %v3506_v58, -inf }
 0x1f9   : > { %946 = vmax.xlane.f32.xlu2 %v945_v59 }
 0x1ff   : > { %v3514_v62 = vpop.f32.mrf.mxu1 }
 0x200   : > { %v1155_v63 = vsel %vm540_vm2, %v3514_v62, -inf }
 0x201   : > { %1156 = vmax.xlane.f32.xlu1 %v1155_v63 }
 0x203   : > { %v543_v0 = vpop.xlane.xlu2 %542 }
 0x204   : > { %v553_v2 = vsub.f32 %v3436_v14, %v543_v0 }
 0x206   : > { %v557_v3 = vmul.f32 1.442695, %v553_v2 }
 0x207   : > { %v3521_v4 = vpop.f32.mrf.mxu1 }
 0x208   : > { %2654 = vpow2.f32 %v557_v3  ;;  %v1158_v17 = vsel %vm540_vm2, %v3521_v4, -inf }
 0x20b   : > { %v3577_v39 = vpop.permute.xlu2 %2639 }
 0x20d   : > { %v546_v6 = vpop.xlane.xlu0 %545 }
 0x20e   : > { %v2655_v7 = vpop.eup %2654  ;;  %v554_v9 = vsub.f32 %v3445_v19, %v546_v6 }
 0x20f   : > { %v3524_v10 = vpop.f32.mrf.mxu2  ;;  %2369 = vmatmul.msk.f32.vlgmr.msra.gmra.mxu3 %vm540_vm2, %v2655_v7  ;;  %v3529_v14 = vpop.f32.mrf.mxu1  ;;  %v565_v53 = vsel %vm540_vm2, %v2655_v7, 0.0 }
 0x210   : > { %v734_v11 = vsel %vm540_vm2, %v3524_v10, -inf  ;;  %v559_v13 = vmul.f32 1.442695, %v554_v9  ;;  %1004 = vmatpush.msra.mxu3 %v2591_v8  ;;  %v1368_v21 = vsel %vm540_vm2, %v3529_v14, -inf }
 0x211   : > { %735 = vmax.xlane.f32.xlu0 %v734_v11 }
 0x212   : > { %2656 = vpow2.f32 %v559_v13  ;;  %1005 = vmatpush.msra.mxu3 %v2592_v12 }
 0x217   : > { %v3531_v15 = vpop.f32.mrf.mxu2  ;;  %v3541_v19 = vpop.f32.mrf.mxu1 }
 0x218   : > { %v948_v16 = vsel %vm540_vm2, %v3531_v15, -inf  ;;  %v3537_v18 = vpop.eup %2656  ;;  %v1371_v32 = vsel %vm540_vm2, %v3541_v19, -inf }
 0x219   : > { %949 = vmax.xlane.f32.xlu2 %v948_v16  ;;  %1159 = vmax.xlane.f32.xlu0 %v1158_v17 }
 0x21a   : > { %2370 = vmatmul.msk.f32.gmra.mxu3 %vm540_vm2, %v3537_v18 }
 0x21e   : > { %v552_v50 = vpop.xlane.xlu1 %551 }
 0x21f   : > { %v3543_v20 = vpop.f32.mrf.mxu2  ;;  %v3555_v27 = vpop.f32.mrf.mxu1  ;;  %v556_v59 = vsub.f32 %v3458_v28, %v552_v50 }
 0x220   : > { %v951_v22 = vsel %vm540_vm2, %v3543_v20, -inf  ;;  %v1581_v38 = vsel %vm540_vm2, %v3555_v27, -inf }
 0x221   : > { %1369 = vmax.xlane.f32.xlu0 %v1368_v21  ;;  %952 = vmax.xlane.f32.xlu1 %v951_v22  ;;  %v563_v63 = vmul.f32 1.442695, %v556_v59 }
 0x227   : > { %v3551_v25 = vpop.f32.mrf.mxu2  ;;  %v3565_v33 = vpop.f32.mrf.mxu1 }
 0x228   : > { %v1161_v26 = vsel %vm540_vm2, %v3551_v25, -inf  ;;  %v1584_v36 = vsel %vm540_vm2, %v3565_v33, -inf }
 0x229   : > { %1162 = vmax.xlane.f32.xlu1 %v1161_v26 }
 0x22f   : > { %v3559_v30 = vpop.f32.mrf.mxu2  ;;  %v3579_v40 = vpop.f32.mrf.mxu1 }
 0x230   : > { %v1164_v31 = vsel %vm540_vm2, %v3559_v30, -inf  ;;  %v1794_v43 = vsel %vm540_vm2, %v3579_v40, -inf }
 0x231   : > { %1165 = vmax.xlane.f32.xlu2 %v1164_v31  ;;  %1372 = vmax.xlane.f32.xlu1 %v1371_v32  ;;  %v2596_v31 = vunpack.i.l.bf16 %v3512_v61 }
 0x237   : > { %v3567_v34 = vpop.f32.mrf.mxu2  ;;  %v3606_v6 = vpop.f32.mrf.mxu1 }
 0x238   : > { %v1374_v37 = vsel %vm540_vm2, %v3567_v34, -inf  ;;  %v1797_v11 = vsel %vm540_vm2, %v3606_v6, -inf }
 0x239   : > { %1585 = vmax.xlane.f32.xlu2 %v1584_v36  ;;  %1375 = vmax.xlane.f32.xlu0 %v1374_v37 }
 0x23a   : > { %1582 = vmax.xlane.f32.xlu1 %v1581_v38  ;;  %v2597_v38 = vunpack.i.h.bf16 %v3512_v61  ;;  %v2616_v61 = vunpack.i.l.bf16 %v3518_v1 }
 0x23f   : > { %v3581_v41 = vpop.f32.mrf.mxu2 }
 0x240   : > { %v1377_v44 = vsel %vm540_vm2, %v3581_v41, -inf }
 0x241   : > { %1795 = vmax.xlane.f32.xlu2 %v1794_v43 }
 0x242   : > { %1378 = vmax.xlane.f32.xlu1 %v1377_v44 }
 0x244   : > { %v549_v45 = vpop.xlane.xlu2 %548 }
 0x245   : > { %v555_v46 = vsub.f32 %v3452_v24, %v549_v45  ;;  %v2611_v24 = vunpack.i.l.bf16 %v3504_v57  ;;  %v3619_v57 = vpop.f32.mrf.mxu1 }
 0x246   : > { %v2007_v37 = vsel %vm540_vm2, %v3619_v57, -inf }
 0x247   : > { %v3590_v48 = vpop.f32.mrf.mxu2  ;;  %v561_v52 = vmul.f32 1.442695, %v555_v46 }
 0x248   : > { %v1587_v56 = vsel %vm540_vm2, %v3590_v48, -inf }
 0x249   : > { %566 = vadd.xlane.f32.xlu2 %v565_v53  ;;  %1588 = vmax.xlane.f32.xlu0 %v1587_v56  ;;  %2658 = vpow2.f32 %v561_v52 }
 0x24a   : > { %2660 = vpow2.f32 %v563_v63 }
 0x24d   : > { %v3650_v53 = vpop.f32.mrf.mxu1 }
 0x24f   : > { %v3596_v0 = vpop.f32.mrf.mxu2  ;;  %v3598_v2 = vpop.eup %2658 }
 0x250   : > { %v1590_v3 = vsel %vm540_vm2, %v3596_v0, -inf  ;;  %2371 = vmatmul.msk.f32.vlgmr.msrb.gmra.mxu0 %vm540_vm2, %v3598_v2  ;;  %v3615_v13 = vpop.eup %2660 }
 0x251   : > { %1591 = vmax.xlane.f32.xlu0 %v1590_v3  ;;  %1039 = vmatpush.msrb.mxu0 %v2611_v24  ;;  %v2010_v3 = vsel %vm540_vm2, %v3650_v53, -inf }
 0x253   : > { %1040 = vmatpush.msrb.mxu0 %v2612_v5  ;;  %v2601_v5 = vunpack.i.l.bf16 %v3549_v23 }
 0x254   : > { %v727_v28 = vpop.xlane.xlu1 %726 }
 0x255   : > { %v737_v7 = vsub.f32 %v3486_v47, %v727_v28 }
 0x257   : > { %v3609_v8 = vpop.f32.mrf.mxu2  ;;  %v741_v9 = vmul.f32 1.442695, %v737_v7 }
 0x258   : > { %v1800_v12 = vsel %vm540_vm2, %v3609_v8, -inf  ;;  %2372 = vmatmul.msk.f32.gmra.mxu0 %vm540_vm2, %v3615_v13 }
 0x259   : > { %1798 = vmax.xlane.f32.xlu0 %v1797_v11  ;;  %1801 = vmax.xlane.f32.xlu1 %v1800_v12  ;;  %2662 = vpow2.f32 %v741_v9 }
 0x25c   : > { %v730_v47 = vpop.xlane.xlu2 %729  ;;  %v733_v16 = vpop.xlane.xlu1 %732 }
 0x25d   : > { %v738_v17 = vsub.f32 %v3495_v51, %v730_v47  ;;  %v739_v21 = vsub.f32 %v3491_v49, %v733_v16  ;;  %v2621_v16 = vunpack.i.l.bf16 %v3510_v60 }
 0x25f   : > { %v3623_v22 = vpop.f32.mrf.mxu2  ;;  %v3625_v26 = vpop.eup %2662  ;;  %v743_v32 = vmul.f32 1.442695, %v738_v17  ;;  %v745_v36 = vmul.f32 1.442695, %v739_v21  ;;  %v2622_v17 = vunpack.i.h.bf16 %v3510_v60 }
 0x260   : > { %2381 = vmatmul.msk.f32.vlgmr.msrb.gmra.mxu3 %vm540_vm2, %v3625_v26  ;;  %v1803_v46 = vsel %vm540_vm2, %v3623_v22, -inf }
 0x261   : > { %2008 = vmax.xlane.f32.xlu0 %v2007_v37  ;;  %2664 = vpow2.f32 %v743_v32  ;;  %1217 = vmatpush.msrb.mxu3 %v2596_v31 }
 0x262   : > { %2666 = vpow2.f32 %v745_v36 }
 0x263   : > { %1218 = vmatpush.msrb.mxu3 %v2597_v38 }
 0x264   : > { %v944_v49 = vpop.xlane.xlu2 %943 }
 0x265   : > { %v954_v51 = vsub.f32 %v3500_v54, %v944_v49  ;;  %v2617_v54 = vunpack.i.h.bf16 %v3518_v1  ;;  %v2602_v1 = vunpack.i.h.bf16 %v3549_v23 }
 0x267   : > { %v3634_v43 = vpop.f32.mrf.mxu2  ;;  %v3636_v44 = vpop.eup %2664  ;;  %v958_v45 = vmul.f32 1.442695, %v954_v51 }
 0x268   : > { %v2013_v50 = vsel %vm540_vm2, %v3634_v43, -inf  ;;  %v3642_v52 = vpop.eup %2666  ;;  %2382 = vmatmul.msk.f32.gmra.mxu3 %vm540_vm2, %v3636_v44 }
 0x269   : > { %1804 = vmax.xlane.f32.xlu0 %v1803_v46  ;;  %2014 = vmax.xlane.f32.xlu2 %v2013_v50  ;;  %2668 = vpow2.f32 %v958_v45 }
 0x26a   : > { %2383 = vmatmul.msk.f32.vlgmr.msra.gmra.mxu0 %vm540_vm2, %v3642_v52 }
 0x26b   : > { %1252 = vmatpush.msra.mxu0 %v2616_v61 }
 0x26c   : > { %v947_v56 = vpop.xlane.xlu2 %946 }
 0x26d   : > { %1253 = vmatpush.msra.mxu0 %v2617_v54  ;;  %v955_v59 = vsub.f32 %v3506_v58, %v947_v56  ;;  %v2627_v56 = vunpack.i.h.bf16 %v3557_v29 }
 0x26f   : > { %v2669_v63 = vpop.eup %2668  ;;  %v960_v24 = vmul.f32 1.442695, %v955_v59 }
 0x270   : > { %v966_v28 = vsel %vm540_vm2, %v2669_v63, 0.0  ;;  %2393 = vmatmul.msk.f32.vlgmr.msra.gmra.mxu3 %vm540_vm2, %v2669_v63 }
 0x271   : > { %2011 = vmax.xlane.f32.xlu0 %v2010_v3  ;;  %2670 = vpow2.f32 %v960_v24  ;;  %967 = vadd.xlane.f32.xlu2 %v966_v28  ;;  %v749_v28 = vsel %vm540_vm2, %v3625_v26, 0.0  ;;  %v3708_v26 = vpop.f32.mrf.mxu2 }
 0x272   : > { %1430 = vmatpush.msra.mxu3 %v2601_v5  ;;  %2649 = vrot.lane.b32.xlu1 %v3378_v55, %s3020_s30 }
 0x274   : > { %1431 = vmatpush.msra.mxu3 %v2602_v1  ;;  %v1157_v58 = vpop.xlane.xlu1 %1156 }
 0x275   : > { %v1167_v7 = vsub.f32 %v3514_v62, %v1157_v58 }
 0x277   : > { %v2671_v9 = vpop.eup %2670  ;;  %v1171_v11 = vmul.f32 1.442695, %v1167_v7 }
 0x278   : > { %v969_v12 = vsel %vm540_vm2, %v2671_v9, 0.0  ;;  %2394 = vmatmul.msk.f32.gmra.mxu3 %vm540_vm2, %v2671_v9 }
 0x279   : > { %2672 = vpow2.f32 %v1171_v11  ;;  %970 = vadd.xlane.f32.xlu2 %v969_v12 }
 0x27f   : > { %v2673_v47 = vpop.eup %2672 }
 0x280   : > { %v1179_v23 = vsel %vm540_vm2, %v2673_v47, 0.0  ;;  %2405 = vmatmul.msk.f32.vlgmr.msrb.gmra.mxu3 %vm540_vm2, %v2673_v47  ;;  %v2636_v47 = vunpack.i.l.bf16 %v3583_v42 }
 0x281   : > { %1180 = vadd.xlane.f32.xlu2 %v1179_v23  ;;  %1643 = vmatpush.msrb.mxu3 %v2621_v16  ;;  %v2637_v16 = vunpack.i.h.bf16 %v3583_v42  ;;  %v755_v23 = vsel %vm540_vm2, %v3642_v52, 0.0  ;;  %v2016_v42 = vsel %vm540_vm2, %v3708_v26, -inf }
 0x283   : > { %1644 = vmatpush.msrb.mxu3 %v2622_v17 }
 0x284   : > { %v736_v62 = vpop.xlane.xlu0 %735 }
 0x285   : > { %v740_v21 = vsub.f32 %v3524_v10, %v736_v62  ;;  %2644 = vrot.lane.b32.xlu0 %v3378_v55, %s3019_s17 }
 0x287   : > { %v747_v31 = vmul.f32 1.442695, %v740_v21 }
 0x289   : > { %2674 = vpow2.f32 %v747_v31 }
 0x28c   : > { %v950_v32 = vpop.xlane.xlu2 %949  ;;  %v1160_v36 = vpop.xlane.xlu0 %1159 }
 0x28d   : > { %v956_v37 = vsub.f32 %v3531_v15, %v950_v32  ;;  %v1168_v38 = vsub.f32 %v3521_v4, %v1160_v36  ;;  %v2626_v15 = vunpack.i.l.bf16 %v3557_v29  ;;  %v2631_v29 = vunpack.i.l.bf16 %v3569_v35 }
 0x28f   : > { %v3673_v49 = vpop.eup %2674  ;;  %v962_v51 = vmul.f32 1.442695, %v956_v37  ;;  %v1173_v60 = vmul.f32 1.442695, %v1168_v38 }
 0x290   : > { %2384 = vmatmul.msk.f32.gmra.mxu0 %vm540_vm2, %v3673_v49 }
 0x291   : > { %2676 = vpow2.f32 %v962_v51 }
 0x292   : > { %2678 = vpow2.f32 %v1173_v60 }
 0x294   : > { %v1370_v10 = vpop.xlane.xlu0 %1369  ;;  %v953_v45 = vpop.xlane.xlu1 %952 }
 0x295   : > { %v1380_v55 = vsub.f32 %v3529_v14, %v1370_v10  ;;  %v957_v46 = vsub.f32 %v3543_v20, %v953_v45  ;;  %v568_v14 = vsel %vm540_vm2, %v3537_v18, 0.0  ;;  %v2632_v18 = vunpack.i.h.bf16 %v3569_v35 }
 0x296   : > { %v571_v10 = vsel %vm540_vm2, %v3598_v2, 0.0 }
 0x297   : > { %v3679_v50 = vpop.eup %2676  ;;  %v1384_v4 = vmul.f32 1.442695, %v1380_v55  ;;  %v964_v61 = vmul.f32 1.442695, %v957_v46 }
 0x298   : > { %v3682_v54 = vpop.eup %2678  ;;  %2395 = vmatmul.msk.f32.vlgmr.msrb.gmra.mxu0 %vm540_vm2, %v3679_v50 }
 0x299   : > { %2680 = vpow2.f32 %v1384_v4  ;;  %2406 = vmatmul.msk.f32.gmra.mxu3 %vm540_vm2, %v3682_v54  ;;  %1465 = vmatpush.msrb.mxu0 %v2626_v15  ;;  %v2641_v4 = vunpack.i.l.bf16 %v3577_v39 }
 0x29a   : > { %2682 = vpow2.f32 %v964_v61  ;;  %v2642_v61 = vunpack.i.h.bf16 %v3577_v39 }
 0x29b   : > { %1466 = vmatpush.msrb.mxu0 %v2627_v56 }
 0x29c   : > { %v1163_v20 = vpop.xlane.xlu1 %1162  ;;  %569 = vadd.xlane.f32.xlu1 %v568_v14 }
 0x29d   : > { %v1169_v59 = vsub.f32 %v3551_v25, %v1163_v20 }
 0x29f   : > { %v3692_v63 = vpop.eup %2680  ;;  %v1175_v24 = vmul.f32 1.442695, %v1169_v59  ;;  %v752_v59 = vsel %vm540_vm2, %v3636_v44, 0.0 }
 0x2a0   : > { %v2683_v3 = vpop.eup %2682 }
 0x2a1   : > { %2684 = vpow2.f32 %v1175_v24  ;;  %2396 = vmatmul.msk.f32.gmra.mxu0 %vm540_vm2, %v2683_v3  ;;  %2417 = vmatmul.msk.f32.vlgmr.msra.gmra.mxu3 %vm540_vm2, %v3692_v63  ;;  %v975_v5 = vsel %vm540_vm2, %v2683_v3, 0.0 }
 0x2a2   : > { %1856 = vmatpush.msra.mxu3 %v2631_v29  ;;  %976 = vadd.xlane.f32.xlu2 %v975_v5  ;;  %v600_v5 = vpop.f32.mrf.mxu3 }
 0x2a4   : > { %1857 = vmatpush.msra.mxu3 %v2632_v18  ;;  %v1166_v25 = vpop.xlane.xlu2 %1165  ;;  %v1373_v1 = vpop.xlane.xlu1 %1372  ;;  %750 = vadd.xlane.f32.xlu1 %v749_v28  ;;  %v758_v28 = vsel %vm540_vm2, %v3673_v49, 0.0  ;;  %v972_v49 = vsel %vm540_vm2, %v3679_v50, 0.0 }
 0x2a5   : > { %v1170_v58 = vsub.f32 %v3559_v30, %v1166_v25  ;;  %v1381_v7 = vsub.f32 %v3541_v19, %v1373_v1 }
 0x2a7   : > { %v2685_v9 = vpop.eup %2684  ;;  %v1177_v11 = vmul.f32 1.442695, %v1170_v58  ;;  %v1386_v12 = vmul.f32 1.442695, %v1381_v7 }
 0x2a8   : > { %v1185_v35 = vsel %vm540_vm2, %v2685_v9, 0.0 }
 0x2a9   : > { %2686 = vpow2.f32 %v1177_v11  ;;  %2407 = vmatmul.msk.f32.vlgmr.msra.gmra.mxu0 %vm540_vm2, %v2685_v9 }
 0x2aa   : > { %2688 = vpow2.f32 %v1386_v12  ;;  %1678 = vmatpush.msra.mxu0 %v2636_v47  ;;  %1186 = vadd.xlane.f32.xlu2 %v1185_v35 }
 0x2ac   : > { %1679 = vmatpush.msra.mxu0 %v2637_v16  ;;  %v1586_v30 = vpop.xlane.xlu2 %1585  ;;  %v1376_v19 = vpop.xlane.xlu0 %1375  ;;  %756 = vadd.xlane.f32.xlu1 %v755_v23 }
 0x2ad   : > { %v1382_v17 = vsub.f32 %v3567_v34, %v1376_v19  ;;  %v1583_v62 = vpop.xlane.xlu1 %1582  ;;  %v1594_v34 = vsub.f32 %v3565_v33, %v1586_v30 }
 0x2ae   : > { %v1593_v21 = vsub.f32 %v3555_v27, %v1583_v62 }
 0x2af   : > { %v2687_v31 = vpop.eup %2686  ;;  %v1388_v32 = vmul.f32 1.442695, %v1382_v17  ;;  %2017 = vmax.xlane.f32.xlu0 %v2016_v42  ;;  %v1599_v45 = vmul.f32 1.442695, %v1594_v34 }
 0x2b0   : > { %v2689_v36 = vpop.eup %2688  ;;  %v1597_v37 = vmul.f32 1.442695, %v1593_v21  ;;  %v1188_v38 = vsel %vm540_vm2, %v2687_v31, 0.0 }
 0x2b1   : > { %2408 = vmatmul.msk.f32.gmra.mxu0 %vm540_vm2, %v2687_v31  ;;  %2418 = vmatmul.msk.f32.gmra.mxu3 %vm540_vm2, %v2689_v36  ;;  %v1395_v52 = vsel %vm540_vm2, %v2689_v36, 0.0  ;;  %2690 = vpow2.f32 %v1388_v32 }
 0x2b2   : > { %1396 = vadd.xlane.f32.xlu2 %v1395_v52  ;;  %2692 = vpow2.f32 %v1597_v37 }
 0x2b4   : > { %v1796_v27 = vpop.xlane.xlu2 %1795  ;;  %1189 = vadd.xlane.f32.xlu1 %v1188_v38  ;;  %v603_v38 = vpop.f32.mrf.mxu3 }
 0x2b5   : > { %v1379_v51 = vpop.xlane.xlu1 %1378 }
 0x2b6   : > { %v1383_v60 = vsub.f32 %v3581_v41, %v1379_v51  ;;  %v1806_v41 = vsub.f32 %v3579_v40, %v1796_v27 }
 0x2b7   : > { %572 = vadd.xlane.f32.xlu0 %v571_v10  ;;  %v2691_v55 = vpop.eup %2690 }
 0x2b8   : > { %v1390_v46 = vmul.f32 1.442695, %v1383_v60  ;;  %v2693_v15 = vpop.eup %2692  ;;  %v1398_v14 = vsel %vm540_vm2, %v2691_v55, 0.0  ;;  %v1810_v24 = vmul.f32 1.442695, %v1806_v41 }
 0x2b9   : > { %2419 = vmatmul.msk.f32.vlgmr.msrb.gmra.mxu0 %vm540_vm2, %v2691_v55  ;;  %2429 = vmatmul.msk.f32.vlgmr.msrb.gmra.mxu3 %vm540_vm2, %v2693_v15  ;;  %v1605_v33 = vsel %vm540_vm2, %v2693_v15, 0.0 }
 0x2ba   : > { %2694 = vpow2.f32 %v1390_v46  ;;  %2069 = vmatpush.msrb.mxu3 %v2641_v4  ;;  %1606 = vadd.xlane.f32.xlu2 %v1605_v33 }
 0x2bb   : > { %2696 = vpow2.f32 %v1599_v45 }
 0x2bc   : > { %v567_v2 = vpop.xlane.xlu2 %566  ;;  %v1589_v56 = vpop.xlane.xlu0 %1588  ;;  %2070 = vmatpush.msrb.mxu3 %v2642_v61  ;;  %1399 = vadd.xlane.f32.xlu1 %v1398_v14 }
 0x2bd   : > { %2698 = vrcp.f32 %v567_v2  ;;  %v1595_v20 = vsub.f32 %v3590_v48, %v1589_v56 }
 0x2bf   : > { %v1601_v3 = vmul.f32 1.442695, %v1595_v20  ;;  %753 = vadd.xlane.f32.xlu0 %v752_v59 }
 0x2c0   : > { %v3734_v39 = vpop.eup %2694 }
 0x2c1   : > { %v2697_v40 = vpop.eup %2696  ;;  %2700 = vpow2.f32 %v1601_v3  ;;  %2420 = vmatmul.msk.f32.gmra.mxu0 %vm540_vm2, %v3734_v39 }
 0x2c2   : > { %2430 = vmatmul.msk.f32.gmra.mxu3 %vm540_vm2, %v2697_v40  ;;  %2702 = vpow2.f32 %v1810_v24  ;;  %v1608_v25 = vsel %vm540_vm2, %v2697_v40, 0.0 }
 0x2c3   : > { %v2699_v29 = vpop.eup %2698 }
 0x2c4   : > { %v639_v48 = vmul.f32 %v2699_v29, %v600_v5  ;;  %v1592_v18 = vpop.xlane.xlu0 %1591  ;;  %1609 = vadd.xlane.f32.xlu1 %v1608_v25 }
 0x2c5   : > { %v1596_v44 = vsub.f32 %v3596_v0, %v1592_v18 }
 0x2c6   : > { %643 = vst.msk [vmem:[#allocation2] sm:$0xff] %vm469_vm1, %v639_v48 }
 0x2c7   : > { %v2701_v1 = vpop.eup %2700  ;;  %v1603_v58 = vmul.f32 1.442695, %v1596_v44  ;;  %759 = vadd.xlane.f32.xlu0 %v758_v28 }
 0x2c8   : > { %v3744_v7 = vpop.eup %2702  ;;  %v1611_v45 = vsel %vm540_vm2, %v2701_v1, 0.0 }
 0x2c9   : > { %2704 = vpow2.f32 %v1603_v58  ;;  %2431 = vmatmul.msk.f32.vlgmr.msra.gmra.mxu0 %vm540_vm2, %v2701_v1  ;;  %v1818_v4 = vsel %vm540_vm2, %v3744_v7, 0.0 }
 0x2ca   : > { %2441 = vmatmul.msk.f32.vlgmr.msra.gmra.mxu3 %vm540_vm2, %v3744_v7 }
 0x2cc   : > { %v1799_v9 = vpop.xlane.xlu0 %1798  ;;  %v1802_v11 = vpop.xlane.xlu1 %1801 }
 0x2cd   : > { %v1807_v0 = vsub.f32 %v3606_v6, %v1799_v9  ;;  %v1808_v12 = vsub.f32 %v3609_v8, %v1802_v11  ;;  %v1182_v6 = vsel %vm540_vm2, %v3682_v54, 0.0  ;;  %v3776_v15 = vpop.f32.mrf.mxu0 }
 0x2cf   : > { %v2705_v47 = vpop.eup %2704  ;;  %v1812_v35 = vmul.f32 1.442695, %v1807_v0  ;;  %v1814_v16 = vmul.f32 1.442695, %v1808_v12  ;;  %973 = vadd.xlane.f32.xlu0 %v972_v49 }
 0x2d0   : > { %v1614_v30 = vsel %vm540_vm2, %v2705_v47, 0.0 }
 0x2d1   : > { %2706 = vpow2.f32 %v1812_v35  ;;  %2432 = vmatmul.msk.f32.gmra.mxu0 %vm540_vm2, %v2705_v47  ;;  %1615 = vadd.xlane.f32.xlu2 %v1614_v30 }
 0x2d2   : > { %2708 = vpow2.f32 %v1814_v16 }
 0x2d4   : > { %v2009_v19 = vpop.xlane.xlu0 %2008 }
 0x2d5   : > { %v2019_v23 = vsub.f32 %v3619_v57, %v2009_v19  ;;  %v1392_v57 = vsel %vm540_vm2, %v3692_v63, 0.0  ;;  %v3782_v59 = vpop.f32.mrf.mxu0 }
 0x2d7   : > { %v2707_v8 = vpop.eup %2706  ;;  %v2023_v17 = vmul.f32 1.442695, %v2019_v23  ;;  %1183 = vadd.xlane.f32.xlu0 %v1182_v6 }
 0x2d8   : > { %v2709_v50 = vpop.eup %2708  ;;  %2442 = vmatmul.msk.f32.gmra.mxu3 %vm540_vm2, %v2707_v8  ;;  %v1821_v3 = vsel %vm540_vm2, %v2707_v8, 0.0 }
 0x2d9   : > { %2710 = vpow2.f32 %v2023_v17  ;;  %v1824_v62 = vsel %vm540_vm2, %v2709_v50, 0.0 }
 0x2da   : > { %1825 = vadd.xlane.f32.xlu2 %v1824_v62 }
 0x2dc   : > { %v1805_v21 = vpop.xlane.xlu0 %1804  ;;  %v2015_v42 = vpop.xlane.xlu2 %2014 }
 0x2dd   : > { %v1809_v31 = vsub.f32 %v3623_v22, %v1805_v21  ;;  %v2021_v54 = vsub.f32 %v3634_v43, %v2015_v42  ;;  %v1401_v22 = vsel %vm540_vm2, %v3734_v39, 0.0 }
 0x2df   : > { %v2711_v32 = vpop.eup %2710  ;;  %v1816_v36 = vmul.f32 1.442695, %v1809_v31  ;;  %1393 = vadd.xlane.f32.xlu0 %v1392_v57  ;;  %v2027_v52 = vmul.f32 1.442695, %v2021_v54 }
 0x2e0   : > { %2453 = vmatmul.msk.f32.vlgmr.msrb.gmra.mxu3 %vm540_vm2, %v2711_v32  ;;  %v2031_v37 = vsel %vm540_vm2, %v2711_v32, 0.0 }
 0x2e1   : > { %2712 = vpow2.f32 %v1816_v36 }
 0x2e2   : > { %2032 = vadd.xlane.f32.xlu2 %v2031_v37  ;;  %2714 = vpow2.f32 %v2027_v52 }
 0x2e3   : > { %v3770_v10 = vpop.f32.mrf.mxu3 }
 0x2e4   : > { %v2012_v34 = vpop.xlane.xlu0 %2011  ;;  %v2650_v2 = vpop.permute.xlu1 %2649 }
 0x2e5   : > { %v2020_v27 = vsub.f32 %v3650_v53, %v2012_v34  ;;  %v968_v56 = vpop.xlane.xlu2 %967  ;;  %v2651_v20 = vunpack.i.l.bf16 %v2650_v2  ;;  %v2652_v24 = vunpack.i.h.bf16 %v2650_v2 }
 0x2e7   : > { %v2713_v63 = vpop.eup %2712  ;;  %v2025_v51 = vmul.f32 1.442695, %v2020_v27  ;;  %1402 = vadd.xlane.f32.xlu0 %v1401_v22  ;;  %v3786_v29 = vpop.f32.mrf.mxu0 }
 0x2e8   : > { %v1827_v43 = vsel %vm540_vm2, %v2713_v63, 0.0  ;;  %v2715_v60 = vpop.eup %2714 }
 0x2e9   : > { %2716 = vpow2.f32 %v2025_v51  ;;  %1828 = vadd.xlane.f32.xlu1 %v1827_v43  ;;  %v2037_v53 = vsel %vm540_vm2, %v2715_v60, 0.0 }
 0x2ea   : > { %2718 = vrcp.f32 %v968_v56 }
 0x2eb   : > { %v3780_v61 = vpop.f32.mrf.mxu3 }
 0x2ed   : > { %v971_v40 = vpop.xlane.xlu2 %970 }
 0x2ee   : > { %2720 = vrcp.f32 %v971_v40 }
 0x2ef   : > { %v2717_v55 = vpop.eup %2716  ;;  %1612 = vadd.xlane.f32.xlu0 %v1611_v45 }
 0x2f0   : > { %2454 = vmatmul.msk.f32.gmra.mxu3 %vm540_vm2, %v2717_v55  ;;  %v2034_v46 = vsel %vm540_vm2, %v2717_v55, 0.0  ;;  %v2719_v5 = vpop.eup %2718 }
 0x2f1   : > { %2038 = vadd.xlane.f32.xlu1 %v2037_v53  ;;  %2035 = vadd.xlane.f32.xlu2 %v2034_v46 }
 0x2f3   : > { %v1007_v39 = vpop.f32.mrf.mxu3 }
 0x2f4   : > { %v1052_v48 = vmul.f32 %v2719_v5, %v1007_v39  ;;  %v2721_v28 = vpop.eup %2720 }
 0x2f5   : > { %v1181_v25 = vpop.xlane.xlu2 %1180 }
 0x2f7   : > { %v2645_v33 = vpop.permute.xlu0 %2644  ;;  %1819 = vadd.xlane.f32.xlu0 %v1818_v4 }
 0x2f8   : > { %v2646_v41 = vunpack.i.l.bf16 %v2645_v33  ;;  %v2647_v14 = vunpack.i.h.bf16 %v2645_v33 }
 0x2fa   : > { %1891 = vmatpush.msrb.mxu0 %v2646_v41 }
 0x2fb   : > { %v1010_v18 = vpop.f32.mrf.mxu3 }
 0x2fc   : > { %1892 = vmatpush.msrb.mxu0 %v2647_v14  ;;  %v1053_v1 = vmul.f32 %v2721_v28, %v1010_v18 }
 0x2fd   : > { %2443 = vmatmul.msk.f32.vlgmr.msrb.gmra.mxu0 %vm540_vm2, %v2709_v50 }
 0x2fe   : > { %2104 = vmatpush.msra.mxu0 %v2651_v20 }
 0x2ff   : > { %1822 = vadd.xlane.f32.xlu0 %v1821_v3 }
 0x300   : > { %2105 = vmatpush.msra.mxu0 %v2652_v24 }
 0x303   : > { %v1220_v49 = vpop.f32.mrf.mxu3 }
 0x305   : > { %2444 = vmatmul.msk.f32.gmra.mxu0 %vm540_vm2, %v2713_v63 }
 0x309   : > { %1060 = vrot.lane.b32.xlu2 %v1052_v48, %s3021_s7 }
 0x30d   : > { %v3790_v44 = vpop.f32.mrf.mxu0  ;;  %2455 = vmatmul.msk.f32.vlgmr.msra.gmra.mxu0 %vm540_vm2, %v2715_v60 }
 0x30f   : > { %v570_v58 = vpop.xlane.xlu1 %569 }
 0x310   : > { %2722 = vrcp.f32 %v570_v58 }
 0x311   : > { %1062 = vrot.lane.b32.xlu2 %v1053_v1, %s3021_s7 }
 0x315   : > { %v977_v7 = vpop.xlane.xlu2 %976  ;;  %v3794_v9 = vpop.f32.mrf.mxu0 }
 0x316   : > { %v2723_v11 = vpop.eup %2722  ;;  %2724 = vrcp.f32 %v977_v7 }
 0x317   : > { %v640_v0 = vmul.f32 %v2723_v11, %v603_v38  ;;  %v751_v12 = vpop.xlane.xlu1 %750 }
 0x319   : > { %644 = vst.msk [vmem:[#allocation2 + $0x8] sm:$0xff] %vm469_vm1, %v640_v0 }
 0x31c   : > { %v2725_v47 = vpop.eup %2724  ;;  %v3803_v23 = vpop.f32.mrf.mxu3 }
 0x31d   : > { %v3799_v30 = vpop.xlane.xlu2 %1186 }
 0x31e   : > { %v1045_v35 = vpop.f32.mrf.mxu0 }
 0x31f   : > { %v3797_v16 = vmul.f32 %v2725_v47, %v1045_v35  ;;  %v3801_v19 = vpop.xlane.xlu1 %756 }
 0x322   : > { %v2018_v6 = vpop.xlane.xlu0 %2017 }
 0x323   : > { %v2022_v8 = vsub.f32 %v3708_v26, %v2018_v6 }
 0x324   : > { %v3808_v31 = vpop.f32.mrf.mxu3 }
 0x325   : > { %v2029_v17 = vmul.f32 1.442695, %v2022_v8  ;;  %v1397_v21 = vpop.xlane.xlu2 %1396 }
 0x326   : > { %v3806_v50 = vpop.f32.mrf.mxu0 }
 0x327   : > { %2726 = vpow2.f32 %v2029_v17  ;;  %v1190_v62 = vpop.xlane.xlu1 %1189 }
 0x328   : > { %2728 = vrcp.f32 %v1190_v62 }
 0x32a   : > { %v573_v42 = vpop.xlane.xlu0 %572 }
 0x32b   : > { %2730 = vrcp.f32 %v573_v42 }
 0x32c   : > { %2732 = vrcp.f32 %v1397_v21 }
 0x32d   : > { %v2727_v57 = vpop.eup %2726  ;;  %v1607_v38 = vpop.xlane.xlu2 %1606 }
 0x32e   : > { %v1258_v32 = vpop.f32.mrf.mxu0  ;;  %2456 = vmatmul.msk.f32.gmra.mxu0 %vm540_vm2, %v2727_v57  ;;  %v2040_v36 = vsel %vm540_vm2, %v2727_v57, 0.0  ;;  %v2729_v54 = vpop.eup %2728 }
 0x32f   : > { %2041 = vadd.xlane.f32.xlu0 %v2040_v36  ;;  %v3812_v26 = vmul.f32 %v2729_v54, %v1258_v32 }
 0x331   : > { %v2731_v37 = vpop.eup %2730 }
 0x332   : > { %v641_v52 = vmul.f32 %v2731_v37, %v3776_v15  ;;  %v754_v34 = vpop.xlane.xlu0 %753  ;;  %v2733_v27 = vpop.eup %2732 }
 0x333   : > { %2734 = vrcp.f32 %v754_v34 }
 0x334   : > { %645 = vst.msk [vmem:[#allocation2 + $0x10] sm:$0xff] %vm469_vm1, %v641_v52  ;;  %v1436_v22 = vpop.f32.mrf.mxu3  ;;  %2736 = vrcp.f32 %v1607_v38 }
 0x335   : > { %v1479_v63 = vmul.f32 %v2733_v27, %v1436_v22  ;;  %2738 = vrcp.f32 %v751_v12 }
 0x336   : > { %2740 = vrcp.f32 %v1181_v25  ;;  %v1468_v18 = vpop.f32.mrf.mxu0 }
 0x337   : > { %1488 = vrot.lane.b32.xlu2 %v1479_v63, %s3022_s9 }
 0x339   : > { %v2735_v51 = vpop.eup %2734 }
 0x33a   : > { %v760_v43 = vpop.xlane.xlu0 %759  ;;  %v840_v60 = vmul.f32 %v2735_v51, %v3780_v61  ;;  %v2737_v45 = vpop.eup %2736 }
 0x33b   : > { %2742 = vrcp.f32 %v760_v43  ;;  %v2739_v53 = vpop.eup %2738  ;;  %v1400_v61 = vpop.xlane.xlu1 %1399 }
 0x33c   : > { %849 = vrot.lane.b32.xlu1 %v840_v60, %s3023_s11  ;;  %v1646_v55 = vpop.f32.mrf.mxu3  ;;  %v2741_v15 = vpop.eup %2740  ;;  %v839_v33 = vmul.f32 %v2739_v53, %v3770_v10 }
 0x33d   : > { %v1691_v46 = vmul.f32 %v2737_v45, %v1646_v55  ;;  %v1265_v41 = vmul.f32 %v2741_v15, %v1220_v49 }
 0x33e   : > { %v1471_v0 = vpop.f32.mrf.mxu0 }
 0x33f   : > { %1699 = vrot.lane.b32.xlu2 %v1691_v46, %s3024_s10 }
 0x341   : > { %v2743_v4 = vpop.eup %2742 }
 0x342   : > { %v974_v2 = vpop.xlane.xlu0 %973  ;;  %v3822_v56 = vmul.f32 %v2743_v4, %v3790_v44 }
 0x343   : > { %847 = vrot.lane.b32.xlu0 %v839_v33, %s3023_s11  ;;  %v1610_v3 = vpop.xlane.xlu1 %1609 }
 0x344   : > { %1273 = vrot.lane.b32.xlu1 %v1265_v41, %s3025_s16  ;;  %v3826_v14 = vpop.xlane.xlu2 %1615 }
 0x345   : > { %v1649_v20 = vpop.f32.mrf.mxu3 }
 0x346   : > { %v1681_v8 = vpop.f32.mrf.mxu0 }
 0x34a   : > { %v1184_v24 = vpop.xlane.xlu0 %1183 }
 0x34b   : > { %2744 = vrcp.f32 %v1184_v24 }
 0x34c   : > { %2746 = vrcp.f32 %v1610_v3 }
 0x34d   : > { %v1826_v39 = vpop.xlane.xlu2 %1825  ;;  %v1859_v48 = vpop.f32.mrf.mxu3 }
 0x34e   : > { %v3838_v42 = vpop.f32.mrf.mxu0 }
 0x351   : > { %v2745_v40 = vpop.eup %2744 }
 0x352   : > { %v1394_v10 = vpop.xlane.xlu0 %1393  ;;  %v1266_v5 = vmul.f32 %v2745_v40, %v3803_v23  ;;  %v2747_v25 = vpop.eup %2746 }
 0x353   : > { %2748 = vrcp.f32 %v1394_v10  ;;  %v1692_v28 = vmul.f32 %v2747_v25, %v1649_v20  ;;  %v2153_v10 = vld [vmem:[#allocation11 + $0x38] sm:$0xff] }
 0x354   : > { %1275 = vrot.lane.b32.xlu1 %v1266_v5, %s3025_s16  ;;  %2750 = vrcp.f32 %v3801_v19  ;;  %v2152_v5 = vld [vmem:[#allocation11 + $0x30] sm:$0xff]  ;;  %2178 = vmatpush.msra.mxu1 %v2153_v10 }
 0x355   : > { %v2033_v1 = vpop.xlane.xlu2 %2032 }
 0x356   : > { %2752 = vrcp.f32 %v2033_v1  ;;  %2179 = vmatpush.msra.mxu1 %v2152_v5  ;;  %v2148_v1 = vld [vmem:[#allocation11 + $0x10] sm:$0xff] }
 0x357   : > { %2754 = vrcp.f32 %v1400_v61 }
 0x359   : > { %v2749_v44 = vpop.eup %2748 }
 0x35a   : > { %v1403_v58 = vpop.xlane.xlu0 %1402  ;;  %v1478_v7 = vmul.f32 %v2749_v44, %v3808_v31  ;;  %v2751_v12 = vpop.eup %2750  ;;  %v2150_v44 = vld [vmem:[#allocation11 + $0x20] sm:$0xff] }
 0x35b   : > { %v1862_v11 = vpop.f32.mrf.mxu3  ;;  %v841_v47 = vmul.f32 %v2751_v12, %v3786_v29 }
 0x35c   : > { %1486 = vrot.lane.b32.xlu0 %v1478_v7, %s3022_s9  ;;  %1701 = vrot.lane.b32.xlu1 %v1692_v28, %s3024_s10  ;;  %v2753_v35 = vpop.eup %2752  ;;  %v1829_v22 = vpop.xlane.xlu1 %1828  ;;  %v2149_v28 = vld [vmem:[#allocation11 + $0x18] sm:$0xff] }
 0x35d   : > { %v2755_v6 = vpop.eup %2754 }
 0x35e   : > { %v1480_v17 = vmul.f32 %v2755_v6, %v1468_v18 }
 0x362   : > { %v1613_v49 = vpop.xlane.xlu0 %1612 }
 0x363   : > { %v2072_v23 = vpop.f32.mrf.mxu3 }
 0x364   : > { %v2117_v19 = vmul.f32 %v2753_v35, %v2072_v23  ;;  %851 = vrot.lane.b32.xlu0 %v841_v47, %s3023_s11  ;;  %v2039_v55 = vpop.xlane.xlu1 %2038 }
 0x366   : > { %2125 = vrot.lane.b32.xlu2 %v2117_v19, %s3026_s26 }
 0x36a   : > { %v1820_v62 = vpop.xlane.xlu0 %1819 }
 0x36b   : > { %2756 = vrcp.f32 %v1820_v62 }
 0x36c   : > { %1490 = vrot.lane.b32.xlu0 %v1480_v17, %s3022_s9 }
 0x371   : > { %v2757_v21 = vpop.eup %2756 }
 0x372   : > { %v1823_v31 = vpop.xlane.xlu0 %1822  ;;  %v1904_v29 = vmul.f32 %v2757_v21, %v1859_v48  ;;  %v2151_v48 = vld [vmem:[#allocation11 + $0x28] sm:$0xff] }
 0x373   : > { %2758 = vrcp.f32 %v1823_v31  ;;  %v2075_v53 = vpop.f32.mrf.mxu3  ;;  %2180 = vmatpush.msra.mxu1 %v2151_v48 }
 0x374   : > { %2760 = vrcp.f32 %v1826_v39  ;;  %1912 = vrot.lane.b32.xlu1 %v1904_v29, %s3027_s27 }
 0x375   : > { %2762 = vrcp.f32 %v974_v2  ;;  %2181 = vmatpush.msra.mxu1 %v2150_v44 }
 0x376   : > { %2764 = vrcp.f32 %v1403_v58  ;;  %v2147_v58 = vld [vmem:[#allocation11 + $0x8] sm:$0xff] }
 0x377   : > { %2766 = vrcp.f32 %v3799_v30  ;;  %2182 = vmatpush.msra.mxu1 %v2149_v28 }
 0x378   : > { %2768 = vrcp.f32 %v1613_v49 }
 0x379   : > { %v2759_v57 = vpop.eup %2758  ;;  %2770 = vrcp.f32 %v1829_v22  ;;  %2183 = vmatpush.msra.mxu1 %v2148_v1 }
 0x37a   : > { %v2761_v32 = vpop.eup %2760  ;;  %v1894_v36 = vpop.f32.mrf.mxu0  ;;  %v1905_v54 = vmul.f32 %v2759_v57, %v1862_v11 }
 0x37b   : > { %v1906_v37 = vmul.f32 %v2761_v32, %v1894_v36  ;;  %v2763_v52 = vpop.eup %2762  ;;  %2184 = vmatpush.msra.mxu1 %v2147_v58 }
 0x37c   : > { %1914 = vrot.lane.b32.xlu1 %v1905_v54, %s3027_s27  ;;  %v1054_v34 = vmul.f32 %v2763_v52, %v3794_v9  ;;  %v2765_v27 = vpop.eup %2764  ;;  %v574_v9 = vsel %vm540_vm2, %v3615_v13, 0.0 }
 0x37d   : > { %1916 = vrot.lane.b32.xlu0 %v1906_v37, %s3027_s27  ;;  %v2767_v38 = vpop.eup %2766  ;;  %v1481_v51 = vmul.f32 %v2765_v27, %v1471_v0  ;;  %v2146_v0 = vld [vmem:[#allocation11] sm:$0xff] }
 0x37e   : > { %v1267_v63 = vmul.f32 %v2767_v38, %v3806_v50  ;;  %v2769_v30 = vpop.eup %2768  ;;  %v2036_v50 = vpop.xlane.xlu2 %2035  ;;  %2185 = vmatpush.msra.mxu1 %v2146_v0 }
 0x37f   : > { %v2771_v60 = vpop.eup %2770  ;;  %2772 = vrcp.f32 %v2036_v50 }
 0x380   : > { %2774 = vrcp.f32 %v2039_v55 }
 0x382   : > { %v1897_v43 = vpop.f32.mrf.mxu0 }
 0x383   : > { %v1907_v45 = vmul.f32 %v2771_v60, %v1897_v43 }
 0x384   : > { %1064 = vrot.lane.b32.xlu1 %v1054_v34, %s3021_s7 }
 0x385   : > { %1066 = vrot.lane.b32.xlu0 %v3797_v16, %s3021_s7  ;;  %v1693_v16 = vmul.f32 %v2769_v30, %v1681_v8  ;;  %v2773_v46 = vpop.eup %2772  ;;  %s2216_s7 = scalar_lea.hbm %s3948_s6, %s2470_s18 }
 0x386   : > { %v2118_v13 = vmul.f32 %v2773_v46, %v2075_v53  ;;  %v2775_v33 = vpop.eup %2774  ;;  %v1061_v41 = vpop.permute.xlu2 %1060 }
 0x38a   : > { %v2107_v15 = vpop.f32.mrf.mxu0 }
 0x38b   : > { %v2119_v2 = vmul.f32 %v2775_v33, %v2107_v15 }
 0x38c   : > { %1277 = vrot.lane.b32.xlu1 %v1267_v63, %s3025_s16 }
 0x38d   : > { %1492 = vrot.lane.b32.xlu0 %v1481_v51, %s3022_s9  ;;  %v2653_v51 = vld [vmem:[%s3947_s5] ss:$0 sm:$0xff]  ;;  %s2217_s9 = sshll.u32 %s338_s13, 4  ;;  %s2218_s9 = int_to_ptr.vmem [resolvable:$true] %s2217_s9 }
 0x38e   : > { %v1063_v3 = vpop.permute.xlu2 %1062 }
 0x38f   : > { %575 = vadd.xlane.f32.xlu2 %v574_v9 }
 0x394   : > { %1703 = vrot.lane.b32.xlu1 %v1693_v16, %s3024_s10 }
 0x395   : > { %1918 = vrot.lane.b32.xlu0 %v1907_v45, %s3027_s27 }
 0x396   : > { %v1489_v18 = vpop.permute.xlu2 %1488 }
 0x39c   : > { %853 = vrot.lane.b32.xlu1 %v3822_v56, %s3023_s11 }
 0x39e   : > { %v1700_v12 = vpop.permute.xlu2 %1699 }
 0x3a2   : > { %v2042_v4 = vpop.xlane.xlu0 %2041 }
 0x3a3   : > { %2776 = vrcp.f32 %v2042_v4 }
 0x3a4   : > { %2127 = vrot.lane.b32.xlu1 %v2118_v13, %s3026_s26  ;;  %2778 = vrcp.f32 %v3826_v14 }
 0x3a7   : > { %2129 = vrot.lane.b32.xlu2 %v2119_v2, %s3026_s26 }
 0x3a9   : > { %v2777_v61 = vpop.eup %2776 }
 0x3aa   : > { %v2779_v39 = vpop.eup %2778 }
 0x3ab   : > { %v2110_v20 = vpop.f32.mrf.mxu0  ;;  %v1694_v40 = vmul.f32 %v2779_v39, %v3838_v42 }
 0x3ac   : > { %v2120_v24 = vmul.f32 %v2777_v61, %v2110_v20  ;;  %1279 = vrot.lane.b32.xlu1 %v3812_v26, %s3025_s16 }
 0x3ae   : > { %v850_v56 = vpop.permute.xlu1 %849 }
 0x3af   : > { %861 = vst.msk [vmem:[#allocation2 + $0x8] sm:$0xff] %vm859_vm3, %v850_v56  ;;  %2131 = vrot.lane.b32.xlu2 %v2120_v24, %s3026_s26 }
 0x3b0   : > { %1074 = vst.msk [vmem:[#allocation2 + $0x8] sm:$0xff] %vm1072_vm4, %v1063_v3 }
 0x3b4   : > { %1705 = vrot.lane.b32.xlu1 %v1694_v40, %s3024_s10  ;;  %s2219_s10 = sshll.u32 %s2216_s7, 4  ;;  %s2220_s10 = int_to_ptr.hbm [resolvable:$true] %s2219_s10 }
 0x3b5   : > { %v848_v14 = vpop.permute.xlu0 %847  ;;  %s2946_s16 = sshra.s32 %s2220_s10, 4  ;;  %s2947_s16 = int_to_ptr.hbm [resolvable:$true] %s2946_s16 }
 0x3b6   : > { %860 = vst.msk [vmem:[#allocation2] sm:$0xff] %vm859_vm3, %v848_v14  ;;  %v1274_v26 = vpop.permute.xlu1 %1273  ;;  %s2948_s26 = scalar_lea.hbm %s2947_s16, 32  ;;  %p2953_p11 = scmp.lt.s32.totalorder %s2947_s16, %s3948_s6 }
 0x3b7   : > { %1073 = vst.msk [vmem:[#allocation2] sm:$0xff] %vm1072_vm4, %v1061_v41  ;;  %p2949_p1 = scmp.ne.s32.totalorder %s2947_s16, %s2948_s26  ;;  %p2954_p2 = scmp.lt.s32.totalorder %s2952_s8, %s2948_s26 }
 0x3b8   : > { %1286 = vst.msk [vmem:[#allocation2] sm:$0xff] %vm1285_vm5, %v1274_v26 }
 0x3b9   : > { %p2950_p4 = pnand %p2949_p1, %p3160_p3  ;;  %p2955_p9 = por %p2954_p2, %p2953_p11 }
 0x3bb   : > { %p2951_p8 = pneg %p2950_p4 }
 0x3bd   : > { %p2956_p10 = pnand %p2955_p9, %p2951_p8 }
 0x3c0   : > { %v2126_v35 = vpop.permute.xlu2 %2125 }
 0x3c6   : > { %v1276_v25 = vpop.permute.xlu1 %1275 }
 0x3c7   : > { %1287 = vst.msk [vmem:[#allocation2 + $0x8] sm:$0xff] %vm1285_vm5, %v1276_v25 }
 0x3c8   : > { %1500 = vst.msk [vmem:[#allocation2 + $0x8] sm:$0xff] %vm1498_vm6, %v1489_v18 }
 0x3ce   : > { %v1487_v7 = vpop.permute.xlu0 %1486  ;;  %v1702_v11 = vpop.permute.xlu1 %1701 }
 0x3cf   : > { %1499 = vst.msk [vmem:[#allocation2] sm:$0xff] %vm1498_vm6, %v1487_v7 }
 0x3d0   : > { %1713 = vst.msk [vmem:[#allocation2 + $0x8] sm:$0xff] %vm1711_vm7, %v1702_v11 }
 0x3d1   : > { %1712 = vst.msk [vmem:[#allocation2] sm:$0xff] %vm1711_vm7, %v1700_v12 }
 0x3d6   : > { %v852_v49 = vpop.permute.xlu0 %851 }
 0x3d7   : > { %862 = vst.msk [vmem:[#allocation2 + $0x10] sm:$0xff] %vm859_vm3, %v852_v49 }
 0x3de   : > { %v1491_v8 = vpop.permute.xlu0 %1490 }
 0x3e6   : > { %v1913_v47 = vpop.permute.xlu1 %1912 }
 0x3e7   : > { %1925 = vst.msk [vmem:[#allocation2] sm:$0xff] %vm1924_vm8, %v1913_v47 }
 0x3e8   : > { %2138 = vst.msk [vmem:[#allocation2] sm:$0xff] %vm2137_vm9, %v2126_v35 }
 0x3ee   : > { %v1915_v23 = vpop.permute.xlu1 %1914 }
 0x3ef   : > { %1926 = vst.msk [vmem:[#allocation2 + $0x8] sm:$0xff] %vm1924_vm8, %v1915_v23  ;;  %v2142_v19 = vld [vmem:[#allocation2] sm:$0xff]  ;;  %v1917_v21 = vpop.permute.xlu0 %1916 }
 0x3f0   : > { %2457 = vmatmul.msk.f32.vlgmr.msra.gmra.mxu1 %vm353_vm0, %v2142_v19 }
 0x3f6   : > { %v1065_v6 = vpop.permute.xlu1 %1064 }
 0x3f7   : > { %1075 = vst.msk [vmem:[#allocation2 + $0x10] sm:$0xff] %vm1072_vm4, %v1065_v6  ;;  %v1067_v36 = vpop.permute.xlu0 %1066 }
 0x3fe   : > { %v1278_v17 = vpop.permute.xlu1 %1277 }
 0x3ff   : > { %1288 = vst.msk [vmem:[#allocation2 + $0x10] sm:$0xff] %vm1285_vm5, %v1278_v17  ;;  %v1493_v37 = vpop.permute.xlu0 %1492 }
 0x400   : > { %1501 = vst.msk [vmem:[#allocation2 + $0x10] sm:$0xff] %vm1498_vm6, %v1491_v8 }
 0x402   : > { %v576_v62 = vpop.xlane.xlu2 %575 }
 0x403   : > { %2780 = vrcp.f32 %v576_v62 }
 0x406   : > { %v1704_v42 = vpop.permute.xlu1 %1703 }
 0x407   : > { %1714 = vst.msk [vmem:[#allocation2 + $0x10] sm:$0xff] %vm1711_vm7, %v1704_v42  ;;  %v1919_v38 = vpop.permute.xlu0 %1918 }
 0x408   : > { %1927 = vst.msk [vmem:[#allocation2 + $0x10] sm:$0xff] %vm1924_vm8, %v1917_v21 }
 0x409   : > { %v2781_v31 = vpop.eup %2780 }
 0x40a   : > { %v642_v29 = vmul.f32 %v2781_v31, %v3782_v59  ;;  %v2130_v57 = vpop.permute.xlu2 %2129 }
 0x40b   : > { %2140 = vst.msk [vmem:[#allocation2 + $0x10] sm:$0xff] %vm2137_vm9, %v2130_v57 }
 0x40c   : > { %646 = vst.msk [vmem:[#allocation2 + $0x18] sm:$0xff] %vm469_vm1, %v642_v29 }
 0x40e   : > { %v854_v32 = vpop.permute.xlu1 %853 }
 0x40f   : > { %863 = vst.msk [vmem:[#allocation2 + $0x18] sm:$0xff] %vm859_vm3, %v854_v32 }
 0x410   : > { %1076 = vst.msk [vmem:[#allocation2 + $0x18] sm:$0xff] %vm1072_vm4, %v1067_v36 }
 0x412   : > { %v2144_v27 = vld [vmem:[#allocation2 + $0x10] sm:$0xff]  ;;  %v2132_v22 = vpop.permute.xlu2 %2131 }
 0x416   : > { %v2128_v54 = vpop.permute.xlu1 %2127 }
 0x417   : > { %2139 = vst.msk [vmem:[#allocation2 + $0x8] sm:$0xff] %vm2137_vm9, %v2128_v54 }
 0x41e   : > { %v1280_v52 = vpop.permute.xlu1 %1279  ;;  %v2143_v34 = vld [vmem:[#allocation2 + $0x8] sm:$0xff] }
 0x41f   : > { %1289 = vst.msk [vmem:[#allocation2 + $0x18] sm:$0xff] %vm1285_vm5, %v1280_v52  ;;  %2458 = vmatmul.msk.f32.gmra.mxu1 %vm353_vm0, %v2143_v34 }
 0x420   : > { %1502 = vst.msk [vmem:[#allocation2 + $0x18] sm:$0xff] %vm1498_vm6, %v1493_v37 }
 0x426   : > { %v1706_v59 = vpop.permute.xlu1 %1705 }
 0x427   : > { %1715 = vst.msk [vmem:[#allocation2 + $0x18] sm:$0xff] %vm1711_vm7, %v1706_v59  ;;  %2459 = vmatmul.msk.f32.gmra.mxu1 %vm353_vm0, %v2144_v27 }
 0x428   : > { %1928 = vst.msk [vmem:[#allocation2 + $0x18] sm:$0xff] %vm1924_vm8, %v1919_v38 }
 0x429   : > { %2141 = vst.msk [vmem:[#allocation2 + $0x18] sm:$0xff] %vm2137_vm9, %v2132_v22 }
 0x430   : > { %v2145_v63 = vld [vmem:[#allocation2 + $0x18] sm:$0xff] }
 0x431   : > { %2460 = vmatmul.msk.f32.gmra.mxu1 %vm353_vm0, %v2145_v63 }
 0x46d   : > { %v2187_v9 = vpop.f32.mrf.mxu1 }
 0x46e   : > { %v2188_v30 = vadd.f32 %v2653_v51, %v2187_v9 }
 0x470   : > { %2199 = vst.msk [vmem:[%s338_s13] sm:$0xff] %vm353_vm0, %v2188_v30 }
 0x49c   : > { %v2190_v43 = vpop.f32.mrf.mxu1 }
 0x49d   : > { %v2191_v60 = vadd.f32 %v2653_v51, %v2190_v43 }
 0x49f   : > { %2200 = vst.msk [vmem:[%s338_s13 + $0x8] sm:$0xff] %vm353_vm0, %v2191_v60 }
 0x4a4   : > { %v2193_v16 = vpop.f32.mrf.mxu1 }
 0x4a5   : > { %v2194_v45 = vadd.f32 %v2653_v51, %v2193_v16 }
 0x4a7   : > { %2201 = vst.msk [vmem:[%s338_s13 + $0x10] sm:$0xff] %vm353_vm0, %v2194_v45 }
 0x4ae   : > { %v2196_v50 = vpop.f32.mrf.mxu1 }
 0x4af   : > { %v2197_v55 = vadd.f32 %v2653_v51, %v2196_v50 }
 0x4b1   : > { %2202 = vst.msk [vmem:[%s338_s13 + $0x18] sm:$0xff] %vm353_vm0, %v2197_v55 }
 0x4b2   : > { %2959 = shalt.err (!%p2956_p10)
}
 0x4b3   : > { %s3028_s29 = smov 128  }
 0x4b4   : > { %2497 = dma.vmem_to_hbm [thread:$0]  (%p3160_p3), %s2218_s9, 512, %s2220_s10, %s2204_s15, %s3028_s29, %s3028_s29, %s3023_s11  }
 0x4b5 PF: > { %s2234_s13 = sand.u32 1, %s2994_s21   ;;  %p3959_p12 = scmp.ge.s32.totalorder %s3006_s24, 2 }
 0x4b6   : > { %s2235_s17 = scalar_lea.sflag [#allocation5], %s2234_s13 }
 0x4b7   : > { %p2517_p13 = pnand %p3959_p12, %p3099_p6 }
 0x4b9   : > { %p2518_p0 = pneg %p2517_p13 }
 0x4bb   : > { %2989 = dma.done.wait (%p2518_p0), %s2235_s17, 512  }
 0x4bc   : > { %2991 = vsyncadd (%p2518_p0), %s2235_s17, 4294966784  ;;  %p21_p5 = scmp.ge.s32.totalorder %s3150_s14, 4   ;;  %s3960_s21 = smov %s2998_s22 }
 0x4bd   : > { %s3961_s22 = smov %s3002_s23  ;;  %s3962_s23 = smov %s3166_s20 }
 0x4be   : > { %s3963_s24 = smov %s3150_s14  ;;  %23 = sbr.rel (!%p21_p5) target bundleno = 7 (0x7), region = 105 }
 0x4c3   :  { %2241 = vsyncpa [#allocation4], 1 }
 0x4c4   :  { %2243 = vsyncpa [#allocation4 + $0x1], 1 }
 0x4c5   :  { %2244 = vsyncpa [#allocation7], 1 }
 0x4c6   :  { %2245 = vsyncpa [#allocation10], 1 }
 0x4c7   :  { %2246 = vsyncpa [#allocation5], 1 }
 0x4c8   :  { %2248 = vsyncpa [#allocation5 + $0x1], 1 }

</bundles_post_ra>
